<compile_context>
chip_gen: v5e
topology: v5e:2x2
jax: 0.10.0
libtpu: 0.0.40
codegen_flags: <defaults>
</compile_context>

<pallas_src>
import functools
import math

import jax
import jax.numpy as jnp
from jax.experimental import pallas as pl
from jax.experimental.pallas import tpu as pltpu

F32 = jnp.float32
EPS = 1e-5  # torch default eps for BatchNorm1d / LayerNorm

# Per-layer parameter names (stacked along a leading num_layers axis).
LAYER_PARAM_NAMES = (
    "ffn1_ln", "ffn1_w1", "ffn1_b1", "ffn1_w2", "ffn1_b2",
    "attn_ln", "attn_wqkv", "attn_bqkv", "attn_wo", "attn_bo",
    "conv_ln", "conv_pw1", "conv_pb1", "conv_dw", "conv_db", "conv_pw2", "conv_pb2",
    "ffn2_ln", "ffn2_w1", "ffn2_b1", "ffn2_w2", "ffn2_b2",
    "final_ln",
)


# ----------------------------------------------------------------------------- specs
def _const_spec(shape):
    nd = len(shape)
    return pl.BlockSpec(tuple(shape), lambda l, _nd=nd: (0,) * _nd)


def _layer_spec(shape):
    nd = len(shape)
    return pl.BlockSpec((1,) + tuple(shape[1:]),
                        lambda l, _nd=nd: (l,) + (0,) * (_nd - 1))


# ----------------------------------------------------------------------------- math helpers
def _sigmoid(x):
    return pl.reciprocal(1.0 + jnp.exp(-x), approx=True)


def _silu(x):
    return x * _sigmoid(x)


def _gelu(x):
    # TODO(synk): PyTorch F.gelu default is exact erf-GELU; tanh approximation used here.
    c = math.sqrt(2.0 / math.pi)
    return 0.5 * x * (1.0 + jnp.tanh(c * (x + 0.044715 * x * x * x)))


def _layernorm(x, ln):
    # ln: (2, C) rows = [gamma, beta]; normalize over last axis
    mu = jnp.mean(x, axis=-1, keepdims=True)
    var = jnp.mean((x - mu) ** 2, axis=-1, keepdims=True)
    return (x - mu) * jax.lax.rsqrt(var + EPS) * ln[0:1] + ln[1:2]


def _shift_time(x, offset):
    # out[t, :] = x[t + offset, :] if 0 <= t + offset < T else 0   (zero 'same' padding)
    # Implemented with an XLU sublane roll + mask (no scratch, no misaligned stores).
    T = x.shape[0]
    if offset == 0:
        return x
    rolled = pltpu.roll(x, (-offset) % T, axis=0)
    t = jax.lax.broadcasted_iota(jnp.int32, (T, 1), 0)
    valid = jnp.logical_and(t + offset >= 0, t + offset < T)
    return jnp.where(valid, rolled, 0.0)


# ----------------------------------------------------------------------------- module bodies
def _ffn(h, ln, w1, b1, w2, b2):
    # 0.5 * Linear(SiLU(Linear(LN(h)))) with the 0.5 already folded into w2/b2.
    xl = _layernorm(h, ln)
    a = _silu(jnp.dot(xl, w1, preferred_element_type=F32) + b1)
    return jnp.dot(a, w2, preferred_element_type=F32) + b2


def _mha(h, mask, ln, wqkv, bqkv, wo, bo, num_heads, B, T):
    # MultiheadAttention(LN(h)) with key-padding mask; 1/sqrt(Dh) folded into wq/bq.
    BT, D = h.shape
    Dh = D // num_heads
    xl = _layernorm(h, ln)
    qkv = jnp.dot(xl, wqkv, preferred_element_type=F32) + bqkv      # one (BT,D)@(D,3D)
    q, k, v = qkv[:, 0:D], qkv[:, D:2 * D], qkv[:, 2 * D:3 * D]

    ctx_rows = []
    for b in range(B):                                              # static tiny batch loop
        rs = slice(b * T, (b + 1) * T)
        qb, kb, vb = q[rs], k[rs], v[rs]
        kmask = mask[b:b + 1, :]                                    # (1, T) additive key mask
        heads = []
        for hh in range(num_heads):
            cs = slice(hh * Dh, (hh + 1) * Dh)
            s = jnp.dot(qb[:, cs], kb[:, cs].T, preferred_element_type=F32) + kmask
            s = s - jnp.max(s, axis=-1, keepdims=True)
            p = jnp.exp(s)
            p = p * pl.reciprocal(jnp.sum(p, axis=-1, keepdims=True), approx=True)
            heads.append(jnp.dot(p, vb[:, cs], preferred_element_type=F32))
        ctx_rows.append(jnp.concatenate(heads, axis=1))             # (T, D)
    ctx = jnp.concatenate(ctx_rows, axis=0)                         # (BT, D)
    # Single full-width output projection (contraction depth D, not Dh).
    return jnp.dot(ctx, wo, preferred_element_type=F32) + bo


def _conv_module(h, ln, pw1, pb1, dw, db, pw2, pb2, B, T, DK):
    # LN -> pointwise (D->2D) -> GLU -> depthwise conv -> (folded BN) -> SiLU -> pointwise.
    BT, D = h.shape
    xl = _layernorm(h, ln)
    a = jnp.dot(xl, pw1, preferred_element_type=F32) + pb1          # (BT, 2D)
    glu = a[:, :D] * _sigmoid(a[:, D:])

    pad = (DK - 1) // 2
    rows = []
    for b in range(B):                                              # depthwise conv per batch
        gb = glu[b * T:(b + 1) * T, :]
        acc = jnp.zeros((T, D), F32)
        for kk in range(DK):
            acc = acc + _shift_time(gb, kk - pad) * dw[kk:kk + 1, :]
        rows.append(acc)
    y = jnp.concatenate(rows, axis=0) + db                          # BN folded into dw/db
    y = _silu(y)
    return jnp.dot(y, pw2, preferred_element_type=F32) + pb2


# ----------------------------------------------------------------------------- fused kernel
def _conformer_kernel(*refs, num_heads, B, T, K, DK):
    nl = len(LAYER_PARAM_NAMES)
    x_ref, mask_ref, bn1_ref, fcw_ref, fcb_ref = refs[:5]
    layer_refs = refs[5:5 + nl]
    ow_ref, ob_ref = refs[5 + nl], refs[6 + nl]
    o_ref = refs[7 + nl]
    h_sc = refs[8 + nl]                                             # (B*T, H) VMEM residual stream

    l = pl.program_id(0)
    lp = {name: r[0] for name, r in zip(LAYER_PARAM_NAMES, layer_refs)}

    # ---- frontend: BN1 -> Conv1d('same') -> BN2 -> GELU, run once at layer 0 ----
    @pl.when(l == 0)
    def _frontend():
        x = x_ref[...]                                              # (B*T, F)
        bn1 = bn1_ref[...]                                          # rows: [scale, shift]
        xn = x * bn1[0:1] + bn1[1:2]
        pad = (K - 1) // 2
        rows = []
        for b in range(B):
            xb = xn[b * T:(b + 1) * T, :]
            rows.append(jnp.concatenate(
                [_shift_time(xb, kk - pad) for kk in range(K)], axis=1))
        unf = jnp.concatenate(rows, axis=0)                         # (B*T, K*F) unfold
        h0 = jnp.dot(unf, fcw_ref[...], preferred_element_type=F32) + fcb_ref[...]
        h_sc[...] = _gelu(h0)

    # ---- one Conformer layer per grid step ----
    mask = mask_ref[...]                                            # (B, T) additive key mask
    h = h_sc[...]
    h = h + _ffn(h, lp["ffn1_ln"], lp["ffn1_w1"], lp["ffn1_b1"],
                 lp["ffn1_w2"], lp["ffn1_b2"])
    h = h + _mha(h, mask, lp["attn_ln"], lp["attn_wqkv"], lp["attn_bqkv"],
                 lp["attn_wo"], lp["attn_bo"], num_heads, B, T)
    h = h + _conv_module(h, lp["conv_ln"], lp["conv_pw1"], lp["conv_pb1"],
                         lp["conv_dw"], lp["conv_db"], lp["conv_pw2"], lp["conv_pb2"],
                         B, T, DK)
    h = h + _ffn(h, lp["ffn2_ln"], lp["ffn2_w1"], lp["ffn2_b1"],
                 lp["ffn2_w2"], lp["ffn2_b2"])
    h = _layernorm(h, lp["final_ln"])
    h_sc[...] = h

    # ---- output projection, once on the last layer ----
    @pl.when(l == pl.num_programs(0) - 1)
    def _head():
        o_ref[...] = jnp.dot(h, ow_ref[...], preferred_element_type=F32) + ob_ref[...]


# ----------------------------------------------------------------------------- wrapper
def conformer_forward(x, lengths, params, num_heads):
    B, T, Fdim = x.shape
    H = params["fconv_w"].shape[1]
    V = params["out_w"].shape[1]
    K = params["fconv_w"].shape[0] // Fdim
    DK = params["layers"]["conv_dw"].shape[1]
    L = params["layers"]["final_ln"].shape[0]

    # additive key-padding mask: 0 for valid frames, large negative for padding
    mask_add = jnp.where(jnp.arange(T)[None, :] >= lengths[:, None],
                         jnp.float32(-1e9), jnp.float32(0.0)).astype(F32)   # (B, T)
    x2d = x.reshape(B * T, Fdim)

    inputs = [x2d, mask_add, params["bn1"], params["fconv_w"], params["fconv_b"]]
    in_specs = [_const_spec(a.shape) for a in inputs]
    for name in LAYER_PARAM_NAMES:
        arr = params["layers"][name]
        inputs.append(arr)
        in_specs.append(_layer_spec(arr.shape))
    inputs += [params["out_w"], params["out_b"]]
    in_specs += [_const_spec(params["out_w"].shape), _const_spec(params["out_b"].shape)]

    kernel = functools.partial(_conformer_kernel, num_heads=num_heads,
                               B=B, T=T, K=K, DK=DK)

    logits2d = pl.pallas_call(
        kernel,
        out_shape=jax.ShapeDtypeStruct((B * T, V), F32),
        grid=(L,),
        in_specs=in_specs,
        out_specs=pl.BlockSpec((B * T, V), lambda l: (0, 0)),
        scratch_shapes=[pltpu.VMEM((B * T, H), F32)],
        compiler_params=pltpu.CompilerParams(
            dimension_semantics=("arbitrary",)),       # layer axis carries state
    )(*inputs)
    return logits2d.reshape(B, T, V)


# ----------------------------------------------------------------------------- params
def init_params(key, Fdim, H, FFN, num_layers, K, DK, V, num_heads):
    keys = iter(jax.random.split(key, 1024))

    def nrm(shape, s=0.1):
        return (s * jax.random.normal(next(keys), shape)).astype(F32)

    def bn_fold(C):  # synthetic running stats, folded to (scale, shift)
        gamma = 1.0 + 0.05 * jax.random.normal(next(keys), (C,))
        beta = 0.05 * jax.random.normal(next(keys), (C,))
        mean = 0.05 * jax.random.normal(next(keys), (C,))
        var = 1.0 + 0.1 * jnp.abs(jax.random.normal(next(keys), (C,)))
        scale = (gamma * jax.lax.rsqrt(var + EPS)).astype(F32)
        shift = (beta - mean * scale).astype(F32)
        return scale, shift

    def ln_pack(C):  # rows: [gamma, beta]
        gamma = 1.0 + 0.05 * jax.random.normal(next(keys), (C,))
        beta = 0.05 * jax.random.normal(next(keys), (C,))
        return jnp.stack([gamma, beta]).astype(F32)

    # frontend: BN1 (scale/shift applied in-kernel), Conv1d weight with BN2 folded in
    s1, t1 = bn_fold(Fdim)
    bn1 = jnp.stack([s1, t1])                                        # (2, F)
    w = nrm((K, Fdim, H))                                            # torch (H,F,K) -> (K,F,H)
    s2, t2 = bn_fold(H)
    fconv_w = (w * s2[None, None, :]).reshape(K * Fdim, H)           # (K*F, H), BN2 scale folded
    fconv_b = t2[None, :]                                            # (1, H),  BN2 shift

    def ffn_p():
        return dict(ln=ln_pack(H), w1=nrm((H, FFN)), b1=nrm((1, FFN), 0.02),
                    w2=0.5 * nrm((FFN, H)), b2=0.5 * nrm((1, H), 0.02))   # 0.5 residual folded

    layers = []
    qscale = 1.0 / math.sqrt(H // num_heads)
    for _ in range(num_layers):
        f1, f2 = ffn_p(), ffn_p()
        wq, wk, wv = nrm((H, H)), nrm((H, H)), nrm((H, H))
        bq, bk, bv = nrm((1, H), 0.02), nrm((1, H), 0.02), nrm((1, H), 0.02)
        wqkv = jnp.concatenate([wq * qscale, wk, wv], axis=1)        # (H, 3H), q-scale folded
        bqkv = jnp.concatenate([bq * qscale, bk, bv], axis=1)        # (1, 3H)
        dw, db = nrm((DK, H)), nrm((1, H), 0.02)
        sc, tc = bn_fold(H)                                          # conv-module BatchNorm
        dwf = dw * sc[None, :]                                       # folded into depthwise w/b
        dbf = db * sc[None, :] + tc[None, :]
        layers.append(dict(
            ffn1_ln=f1["ln"], ffn1_w1=f1["w1"], ffn1_b1=f1["b1"],
            ffn1_w2=f1["w2"], ffn1_b2=f1["b2"],
            attn_ln=ln_pack(H), attn_wqkv=wqkv, attn_bqkv=bqkv,
            attn_wo=nrm((H, H)), attn_bo=nrm((1, H), 0.02),
            conv_ln=ln_pack(H), conv_pw1=nrm((H, 2 * H)), conv_pb1=nrm((1, 2 * H), 0.02),
            conv_dw=dwf, conv_db=dbf, conv_pw2=nrm((H, H)), conv_pb2=nrm((1, H), 0.02),
            ffn2_ln=f2["ln"], ffn2_w1=f2["w1"], ffn2_b1=f2["b1"],
            ffn2_w2=f2["w2"], ffn2_b2=f2["b2"],
            final_ln=ln_pack(H),
        ))
    stacked = {name: jnp.stack([lyr[name] for lyr in layers]) for name in LAYER_PARAM_NAMES}

    return dict(bn1=bn1, fconv_w=fconv_w, fconv_b=fconv_b, layers=stacked,
                out_w=nrm((H, V)), out_b=nrm((1, V), 0.02))


# ----------------------------------------------------------------------------- main
if __name__ == "__main__":
    B, T = 2, 16
    Fdim, H, FFN = 24, 32, 64          # feature_vector_size, hidden_layer_size, ffn_dim
    NUM_HEADS, NUM_LAYERS = 4, 2
    K, DK = 3, 7                       # cnn kernel_size, depthwise_conv_kernel_size
    V = 48                             # vocabulary_size

    key = jax.random.PRNGKey(0)
    kx, kp = jax.random.split(key)
    x = jax.random.normal(kx, (B, T, Fdim), dtype=F32)       # (batch, time, features)
    input_lengths = jnp.array([16, 11], dtype=jnp.int32)
    params = init_params(kp, Fdim, H, FFN, NUM_LAYERS, K, DK, V, NUM_HEADS)

    forward = jax.jit(conformer_forward, static_argnums=(3,))
    logits = forward(x, input_lengths, params, NUM_HEADS)
    jax.block_until_ready(logits)
    assert logits.shape == (B, T, V) and logits.dtype == F32
    assert bool(jnp.all(jnp.isfinite(logits)))
    print("KERNEL_OK")
</pallas_src>

<mosaic_0001>
module attributes {stable_mosaic.version = 11 : i64} {
  func.func @_conformer_kernel(%arg0: i32, %arg1: memref<32x24xf32, #tpu.memory_space<vmem>>, %arg2: memref<2x16xf32, #tpu.memory_space<vmem>>, %arg3: memref<2x24xf32, #tpu.memory_space<vmem>>, %arg4: memref<72x32xf32, #tpu.memory_space<vmem>>, %arg5: memref<1x32xf32, #tpu.memory_space<vmem>>, %arg6: memref<1x2x32xf32, #tpu.memory_space<vmem>>, %arg7: memref<1x32x64xf32, #tpu.memory_space<vmem>>, %arg8: memref<1x1x64xf32, #tpu.memory_space<vmem>>, %arg9: memref<1x64x32xf32, #tpu.memory_space<vmem>>, %arg10: memref<1x1x32xf32, #tpu.memory_space<vmem>>, %arg11: memref<1x2x32xf32, #tpu.memory_space<vmem>>, %arg12: memref<1x32x96xf32, #tpu.memory_space<vmem>>, %arg13: memref<1x1x96xf32, #tpu.memory_space<vmem>>, %arg14: memref<1x32x32xf32, #tpu.memory_space<vmem>>, %arg15: memref<1x1x32xf32, #tpu.memory_space<vmem>>, %arg16: memref<1x2x32xf32, #tpu.memory_space<vmem>>, %arg17: memref<1x32x64xf32, #tpu.memory_space<vmem>>, %arg18: memref<1x1x64xf32, #tpu.memory_space<vmem>>, %arg19: memref<1x7x32xf32, #tpu.memory_space<vmem>>, %arg20: memref<1x1x32xf32, #tpu.memory_space<vmem>>, %arg21: memref<1x32x32xf32, #tpu.memory_space<vmem>>, %arg22: memref<1x1x32xf32, #tpu.memory_space<vmem>>, %arg23: memref<1x2x32xf32, #tpu.memory_space<vmem>>, %arg24: memref<1x32x64xf32, #tpu.memory_space<vmem>>, %arg25: memref<1x1x64xf32, #tpu.memory_space<vmem>>, %arg26: memref<1x64x32xf32, #tpu.memory_space<vmem>>, %arg27: memref<1x1x32xf32, #tpu.memory_space<vmem>>, %arg28: memref<1x2x32xf32, #tpu.memory_space<vmem>>, %arg29: memref<32x48xf32, #tpu.memory_space<vmem>>, %arg30: memref<1x48xf32, #tpu.memory_space<vmem>>, %arg31: memref<32x48xf32, #tpu.memory_space<vmem>>, %arg32: memref<32x32xf32, #tpu.memory_space<vmem>>) attributes {dimension_semantics = [#tpu.dimension_semantics<arbitrary>], iteration_bounds = array<i64: 2>, scalar_prefetch = 0 : i64, scratch_operands = 1 : i64, tpu.core_type = #tpu.core_type<tc>, window_params = [{pipeline_mode = #tpu.pipeline_mode<synchronous>, transform_indices = @transform_0, window_bounds = array<i64: 32, 24>}, {pipeline_mode = #tpu.pipeline_mode<synchronous>, transform_indices = @transform_1, window_bounds = array<i64: 2, 16>}, {pipeline_mode = #tpu.pipeline_mode<synchronous>, transform_indices = @transform_2, window_bounds = array<i64: 2, 24>}, {pipeline_mode = #tpu.pipeline_mode<synchronous>, transform_indices = @transform_3, window_bounds = array<i64: 72, 32>}, {pipeline_mode = #tpu.pipeline_mode<synchronous>, transform_indices = @transform_4, window_bounds = array<i64: 1, 32>}, {transform_indices = @transform_5, window_bounds = array<i64: 1, 2, 32>}, {transform_indices = @transform_6, window_bounds = array<i64: 1, 32, 64>}, {transform_indices = @transform_7, window_bounds = array<i64: 1, 1, 64>}, {transform_indices = @transform_8, window_bounds = array<i64: 1, 64, 32>}, {transform_indices = @transform_9, window_bounds = array<i64: 1, 1, 32>}, {transform_indices = @transform_10, window_bounds = array<i64: 1, 2, 32>}, {transform_indices = @transform_11, window_bounds = array<i64: 1, 32, 96>}, {transform_indices = @transform_12, window_bounds = array<i64: 1, 1, 96>}, {transform_indices = @transform_13, window_bounds = array<i64: 1, 32, 32>}, {transform_indices = @transform_14, window_bounds = array<i64: 1, 1, 32>}, {transform_indices = @transform_15, window_bounds = array<i64: 1, 2, 32>}, {transform_indices = @transform_16, window_bounds = array<i64: 1, 32, 64>}, {transform_indices = @transform_17, window_bounds = array<i64: 1, 1, 64>}, {transform_indices = @transform_18, window_bounds = array<i64: 1, 7, 32>}, {transform_indices = @transform_19, window_bounds = array<i64: 1, 1, 32>}, {transform_indices = @transform_20, window_bounds = array<i64: 1, 32, 32>}, {transform_indices = @transform_21, window_bounds = array<i64: 1, 1, 32>}, {transform_indices = @transform_22, window_bounds = array<i64: 1, 2, 32>}, {transform_indices = @transform_23, window_bounds = array<i64: 1, 32, 64>}, {transform_indices = @transform_24, window_bounds = array<i64: 1, 1, 64>}, {transform_indices = @transform_25, window_bounds = array<i64: 1, 64, 32>}, {transform_indices = @transform_26, window_bounds = array<i64: 1, 1, 32>}, {transform_indices = @transform_27, window_bounds = array<i64: 1, 2, 32>}, {pipeline_mode = #tpu.pipeline_mode<synchronous>, transform_indices = @transform_28, window_bounds = array<i64: 32, 48>}, {pipeline_mode = #tpu.pipeline_mode<synchronous>, transform_indices = @transform_29, window_bounds = array<i64: 1, 48>}, {pipeline_mode = #tpu.pipeline_mode<synchronous>, transform_indices = @transform_30, window_bounds = array<i64: 32, 48>}]} {
    %c0 = arith.constant 0 : index
    %c0_0 = arith.constant 0 : index
    %c0_1 = arith.constant 0 : index
    %0 = vector.load %arg6[%c0, %c0_0, %c0_1] : memref<1x2x32xf32, #tpu.memory_space<vmem>>, vector<1x2x32xf32>
    %1 = vector.shape_cast %0 : vector<1x2x32xf32> to vector<2x32xf32>
    %c0_2 = arith.constant 0 : index
    %c0_3 = arith.constant 0 : index
    %c0_4 = arith.constant 0 : index
    %2 = vector.load %arg7[%c0_2, %c0_3, %c0_4] : memref<1x32x64xf32, #tpu.memory_space<vmem>>, vector<1x32x64xf32>
    %3 = vector.shape_cast %2 : vector<1x32x64xf32> to vector<32x64xf32>
    %c0_5 = arith.constant 0 : index
    %c0_6 = arith.constant 0 : index
    %c0_7 = arith.constant 0 : index
    %4 = vector.load %arg8[%c0_5, %c0_6, %c0_7] : memref<1x1x64xf32, #tpu.memory_space<vmem>>, vector<1x1x64xf32>
    %5 = vector.shape_cast %4 : vector<1x1x64xf32> to vector<1x64xf32>
    %c0_8 = arith.constant 0 : index
    %c0_9 = arith.constant 0 : index
    %c0_10 = arith.constant 0 : index
    %6 = vector.load %arg9[%c0_8, %c0_9, %c0_10] : memref<1x64x32xf32, #tpu.memory_space<vmem>>, vector<1x64x32xf32>
    %7 = vector.shape_cast %6 : vector<1x64x32xf32> to vector<64x32xf32>
    %c0_11 = arith.constant 0 : index
    %c0_12 = arith.constant 0 : index
    %c0_13 = arith.constant 0 : index
    %8 = vector.load %arg10[%c0_11, %c0_12, %c0_13] : memref<1x1x32xf32, #tpu.memory_space<vmem>>, vector<1x1x32xf32>
    %9 = vector.shape_cast %8 : vector<1x1x32xf32> to vector<1x32xf32>
    %c0_14 = arith.constant 0 : index
    %c0_15 = arith.constant 0 : index
    %c0_16 = arith.constant 0 : index
    %10 = vector.load %arg11[%c0_14, %c0_15, %c0_16] : memref<1x2x32xf32, #tpu.memory_space<vmem>>, vector<1x2x32xf32>
    %11 = vector.shape_cast %10 : vector<1x2x32xf32> to vector<2x32xf32>
    %c0_17 = arith.constant 0 : index
    %c0_18 = arith.constant 0 : index
    %c0_19 = arith.constant 0 : index
    %12 = vector.load %arg12[%c0_17, %c0_18, %c0_19] : memref<1x32x96xf32, #tpu.memory_space<vmem>>, vector<1x32x96xf32>
    %13 = vector.shape_cast %12 : vector<1x32x96xf32> to vector<32x96xf32>
    %c0_20 = arith.constant 0 : index
    %c0_21 = arith.constant 0 : index
    %c0_22 = arith.constant 0 : index
    %14 = vector.load %arg13[%c0_20, %c0_21, %c0_22] : memref<1x1x96xf32, #tpu.memory_space<vmem>>, vector<1x1x96xf32>
    %15 = vector.shape_cast %14 : vector<1x1x96xf32> to vector<1x96xf32>
    %c0_23 = arith.constant 0 : index
    %c0_24 = arith.constant 0 : index
    %c0_25 = arith.constant 0 : index
    %16 = vector.load %arg14[%c0_23, %c0_24, %c0_25] : memref<1x32x32xf32, #tpu.memory_space<vmem>>, vector<1x32x32xf32>
    %17 = vector.shape_cast %16 : vector<1x32x32xf32> to vector<32x32xf32>
    %c0_26 = arith.constant 0 : index
    %c0_27 = arith.constant 0 : index
    %c0_28 = arith.constant 0 : index
    %18 = vector.load %arg15[%c0_26, %c0_27, %c0_28] : memref<1x1x32xf32, #tpu.memory_space<vmem>>, vector<1x1x32xf32>
    %19 = vector.shape_cast %18 : vector<1x1x32xf32> to vector<1x32xf32>
    %c0_29 = arith.constant 0 : index
    %c0_30 = arith.constant 0 : index
    %c0_31 = arith.constant 0 : index
    %20 = vector.load %arg16[%c0_29, %c0_30, %c0_31] : memref<1x2x32xf32, #tpu.memory_space<vmem>>, vector<1x2x32xf32>
    %21 = vector.shape_cast %20 : vector<1x2x32xf32> to vector<2x32xf32>
    %c0_32 = arith.constant 0 : index
    %c0_33 = arith.constant 0 : index
    %c0_34 = arith.constant 0 : index
    %22 = vector.load %arg17[%c0_32, %c0_33, %c0_34] : memref<1x32x64xf32, #tpu.memory_space<vmem>>, vector<1x32x64xf32>
    %23 = vector.shape_cast %22 : vector<1x32x64xf32> to vector<32x64xf32>
    %c0_35 = arith.constant 0 : index
    %c0_36 = arith.constant 0 : index
    %c0_37 = arith.constant 0 : index
    %24 = vector.load %arg18[%c0_35, %c0_36, %c0_37] : memref<1x1x64xf32, #tpu.memory_space<vmem>>, vector<1x1x64xf32>
    %25 = vector.shape_cast %24 : vector<1x1x64xf32> to vector<1x64xf32>
    %c0_38 = arith.constant 0 : index
    %c0_39 = arith.constant 0 : index
    %c0_40 = arith.constant 0 : index
    %26 = vector.load %arg19[%c0_38, %c0_39, %c0_40] : memref<1x7x32xf32, #tpu.memory_space<vmem>>, vector<1x7x32xf32>
    %27 = vector.shape_cast %26 : vector<1x7x32xf32> to vector<7x32xf32>
    %c0_41 = arith.constant 0 : index
    %c0_42 = arith.constant 0 : index
    %c0_43 = arith.constant 0 : index
    %28 = vector.load %arg20[%c0_41, %c0_42, %c0_43] : memref<1x1x32xf32, #tpu.memory_space<vmem>>, vector<1x1x32xf32>
    %29 = vector.shape_cast %28 : vector<1x1x32xf32> to vector<1x32xf32>
    %c0_44 = arith.constant 0 : index
    %c0_45 = arith.constant 0 : index
    %c0_46 = arith.constant 0 : index
    %30 = vector.load %arg21[%c0_44, %c0_45, %c0_46] : memref<1x32x32xf32, #tpu.memory_space<vmem>>, vector<1x32x32xf32>
    %31 = vector.shape_cast %30 : vector<1x32x32xf32> to vector<32x32xf32>
    %c0_47 = arith.constant 0 : index
    %c0_48 = arith.constant 0 : index
    %c0_49 = arith.constant 0 : index
    %32 = vector.load %arg22[%c0_47, %c0_48, %c0_49] : memref<1x1x32xf32, #tpu.memory_space<vmem>>, vector<1x1x32xf32>
    %33 = vector.shape_cast %32 : vector<1x1x32xf32> to vector<1x32xf32>
    %c0_50 = arith.constant 0 : index
    %c0_51 = arith.constant 0 : index
    %c0_52 = arith.constant 0 : index
    %34 = vector.load %arg23[%c0_50, %c0_51, %c0_52] : memref<1x2x32xf32, #tpu.memory_space<vmem>>, vector<1x2x32xf32>
    %35 = vector.shape_cast %34 : vector<1x2x32xf32> to vector<2x32xf32>
    %c0_53 = arith.constant 0 : index
    %c0_54 = arith.constant 0 : index
    %c0_55 = arith.constant 0 : index
    %36 = vector.load %arg24[%c0_53, %c0_54, %c0_55] : memref<1x32x64xf32, #tpu.memory_space<vmem>>, vector<1x32x64xf32>
    %37 = vector.shape_cast %36 : vector<1x32x64xf32> to vector<32x64xf32>
    %c0_56 = arith.constant 0 : index
    %c0_57 = arith.constant 0 : index
    %c0_58 = arith.constant 0 : index
    %38 = vector.load %arg25[%c0_56, %c0_57, %c0_58] : memref<1x1x64xf32, #tpu.memory_space<vmem>>, vector<1x1x64xf32>
    %39 = vector.shape_cast %38 : vector<1x1x64xf32> to vector<1x64xf32>
    %c0_59 = arith.constant 0 : index
    %c0_60 = arith.constant 0 : index
    %c0_61 = arith.constant 0 : index
    %40 = vector.load %arg26[%c0_59, %c0_60, %c0_61] : memref<1x64x32xf32, #tpu.memory_space<vmem>>, vector<1x64x32xf32>
    %41 = vector.shape_cast %40 : vector<1x64x32xf32> to vector<64x32xf32>
    %c0_62 = arith.constant 0 : index
    %c0_63 = arith.constant 0 : index
    %c0_64 = arith.constant 0 : index
    %42 = vector.load %arg27[%c0_62, %c0_63, %c0_64] : memref<1x1x32xf32, #tpu.memory_space<vmem>>, vector<1x1x32xf32>
    %43 = vector.shape_cast %42 : vector<1x1x32xf32> to vector<1x32xf32>
    %c0_65 = arith.constant 0 : index
    %c0_66 = arith.constant 0 : index
    %c0_67 = arith.constant 0 : index
    %44 = vector.load %arg28[%c0_65, %c0_66, %c0_67] : memref<1x2x32xf32, #tpu.memory_space<vmem>>, vector<1x2x32xf32>
    %45 = vector.shape_cast %44 : vector<1x2x32xf32> to vector<2x32xf32>
    %c0_i32 = arith.constant 0 : i32
    %46 = arith.cmpi eq, %arg0, %c0_i32 : i32
    %47 = arith.extui %46 : i1 to i32
    %c0_i32_68 = arith.constant 0 : i32
    %48 = arith.cmpi ne, %47, %c0_i32_68 : i32
    scf.if %48 {
      %c0_213 = arith.constant 0 : index
      %c0_214 = arith.constant 0 : index
      %634 = vector.load %arg1[%c0_213, %c0_214] : memref<32x24xf32, #tpu.memory_space<vmem>>, vector<32x24xf32>
      %c0_215 = arith.constant 0 : index
      %c0_216 = arith.constant 0 : index
      %635 = vector.load %arg3[%c0_215, %c0_216] : memref<2x24xf32, #tpu.memory_space<vmem>>, vector<2x24xf32>
      %636 = vector.extract_strided_slice %635 {offsets = [0, 0], sizes = [1, 24], strides = [1, 1]} : vector<2x24xf32> to vector<1x24xf32>
      %637 = vector.broadcast %636 : vector<1x24xf32> to vector<32x24xf32>
      %638 = arith.mulf %634, %637 : vector<32x24xf32>
      %639 = vector.extract_strided_slice %635 {offsets = [1, 0], sizes = [1, 24], strides = [1, 1]} : vector<2x24xf32> to vector<1x24xf32>
      %640 = vector.broadcast %639 : vector<1x24xf32> to vector<32x24xf32>
      %641 = arith.addf %638, %640 : vector<32x24xf32>
      %642 = vector.extract_strided_slice %641 {offsets = [0, 0], sizes = [16, 24], strides = [1, 1]} : vector<32x24xf32> to vector<16x24xf32>
      %c1_i32_217 = arith.constant 1 : i32
      %643 = tpu.dynamic_rotate %642 by %c1_i32_217 dim 0 : vector<16x24xf32>, i32 -> vector<16x24xf32>
      %644 = tpu.iota {dimensions = array<i32: 0>} : vector<16x1xi32>
      %c-1_i32_218 = arith.constant -1 : i32
      %645 = vector.broadcast %c-1_i32_218 : i32 to vector<16x1xi32>
      %646 = arith.addi %644, %645 : vector<16x1xi32>
      %c0_i32_219 = arith.constant 0 : i32
      %647 = vector.broadcast %c0_i32_219 : i32 to vector<16x1xi32>
      %648 = arith.cmpi sge, %646, %647 : vector<16x1xi32>
      %c-1_i32_220 = arith.constant -1 : i32
      %649 = vector.broadcast %c-1_i32_220 : i32 to vector<16x1xi32>
      %650 = arith.addi %644, %649 : vector<16x1xi32>
      %c16_i32_221 = arith.constant 16 : i32
      %651 = vector.broadcast %c16_i32_221 : i32 to vector<16x1xi32>
      %652 = arith.cmpi slt, %650, %651 : vector<16x1xi32>
      %653 = arith.andi %648, %652 : vector<16x1xi1>
      %cst_222 = arith.constant 0.000000e+00 : f32
      %654 = vector.shape_cast %653 : vector<16x1xi1> to vector<16x1xi1>
      %655 = vector.broadcast %654 : vector<16x1xi1> to vector<16x24xi1>
      %656 = vector.broadcast %cst_222 : f32 to vector<16x24xf32>
      %657 = arith.select %655, %643, %656 : vector<16x24xi1>, vector<16x24xf32>
      %c15_i32_223 = arith.constant 15 : i32
      %658 = tpu.dynamic_rotate %642 by %c15_i32_223 dim 0 : vector<16x24xf32>, i32 -> vector<16x24xf32>
      %659 = tpu.iota {dimensions = array<i32: 0>} : vector<16x1xi32>
      %c1_i32_224 = arith.constant 1 : i32
      %660 = vector.broadcast %c1_i32_224 : i32 to vector<16x1xi32>
      %661 = arith.addi %659, %660 : vector<16x1xi32>
      %c0_i32_225 = arith.constant 0 : i32
      %662 = vector.broadcast %c0_i32_225 : i32 to vector<16x1xi32>
      %663 = arith.cmpi sge, %661, %662 : vector<16x1xi32>
      %c1_i32_226 = arith.constant 1 : i32
      %664 = vector.broadcast %c1_i32_226 : i32 to vector<16x1xi32>
      %665 = arith.addi %659, %664 : vector<16x1xi32>
      %c16_i32_227 = arith.constant 16 : i32
      %666 = vector.broadcast %c16_i32_227 : i32 to vector<16x1xi32>
      %667 = arith.cmpi slt, %665, %666 : vector<16x1xi32>
      %668 = arith.andi %663, %667 : vector<16x1xi1>
      %cst_228 = arith.constant 0.000000e+00 : f32
      %669 = vector.shape_cast %668 : vector<16x1xi1> to vector<16x1xi1>
      %670 = vector.broadcast %669 : vector<16x1xi1> to vector<16x24xi1>
      %671 = vector.broadcast %cst_228 : f32 to vector<16x24xf32>
      %672 = arith.select %670, %658, %671 : vector<16x24xi1>, vector<16x24xf32>
      %673 = tpu.concatenate %657, %642, %672 in 1 : vector<16x24xf32>, vector<16x24xf32>, vector<16x24xf32> -> vector<16x72xf32>
      %674 = vector.extract_strided_slice %641 {offsets = [16, 0], sizes = [16, 24], strides = [1, 1]} : vector<32x24xf32> to vector<16x24xf32>
      %c1_i32_229 = arith.constant 1 : i32
      %675 = tpu.dynamic_rotate %674 by %c1_i32_229 dim 0 : vector<16x24xf32>, i32 -> vector<16x24xf32>
      %676 = tpu.iota {dimensions = array<i32: 0>} : vector<16x1xi32>
      %c-1_i32_230 = arith.constant -1 : i32
      %677 = vector.broadcast %c-1_i32_230 : i32 to vector<16x1xi32>
      %678 = arith.addi %676, %677 : vector<16x1xi32>
      %c0_i32_231 = arith.constant 0 : i32
      %679 = vector.broadcast %c0_i32_231 : i32 to vector<16x1xi32>
      %680 = arith.cmpi sge, %678, %679 : vector<16x1xi32>
      %c-1_i32_232 = arith.constant -1 : i32
      %681 = vector.broadcast %c-1_i32_232 : i32 to vector<16x1xi32>
      %682 = arith.addi %676, %681 : vector<16x1xi32>
      %c16_i32_233 = arith.constant 16 : i32
      %683 = vector.broadcast %c16_i32_233 : i32 to vector<16x1xi32>
      %684 = arith.cmpi slt, %682, %683 : vector<16x1xi32>
      %685 = arith.andi %680, %684 : vector<16x1xi1>
      %cst_234 = arith.constant 0.000000e+00 : f32
      %686 = vector.shape_cast %685 : vector<16x1xi1> to vector<16x1xi1>
      %687 = vector.broadcast %686 : vector<16x1xi1> to vector<16x24xi1>
      %688 = vector.broadcast %cst_234 : f32 to vector<16x24xf32>
      %689 = arith.select %687, %675, %688 : vector<16x24xi1>, vector<16x24xf32>
      %c15_i32_235 = arith.constant 15 : i32
      %690 = tpu.dynamic_rotate %674 by %c15_i32_235 dim 0 : vector<16x24xf32>, i32 -> vector<16x24xf32>
      %691 = tpu.iota {dimensions = array<i32: 0>} : vector<16x1xi32>
      %c1_i32_236 = arith.constant 1 : i32
      %692 = vector.broadcast %c1_i32_236 : i32 to vector<16x1xi32>
      %693 = arith.addi %691, %692 : vector<16x1xi32>
      %c0_i32_237 = arith.constant 0 : i32
      %694 = vector.broadcast %c0_i32_237 : i32 to vector<16x1xi32>
      %695 = arith.cmpi sge, %693, %694 : vector<16x1xi32>
      %c1_i32_238 = arith.constant 1 : i32
      %696 = vector.broadcast %c1_i32_238 : i32 to vector<16x1xi32>
      %697 = arith.addi %691, %696 : vector<16x1xi32>
      %c16_i32_239 = arith.constant 16 : i32
      %698 = vector.broadcast %c16_i32_239 : i32 to vector<16x1xi32>
      %699 = arith.cmpi slt, %697, %698 : vector<16x1xi32>
      %700 = arith.andi %695, %699 : vector<16x1xi1>
      %cst_240 = arith.constant 0.000000e+00 : f32
      %701 = vector.shape_cast %700 : vector<16x1xi1> to vector<16x1xi1>
      %702 = vector.broadcast %701 : vector<16x1xi1> to vector<16x24xi1>
      %703 = vector.broadcast %cst_240 : f32 to vector<16x24xf32>
      %704 = arith.select %702, %690, %703 : vector<16x24xi1>, vector<16x24xf32>
      %705 = tpu.concatenate %689, %674, %704 in 1 : vector<16x24xf32>, vector<16x24xf32>, vector<16x24xf32> -> vector<16x72xf32>
      %706 = tpu.concatenate %673, %705 in 0 : vector<16x72xf32>, vector<16x72xf32> -> vector<32x72xf32>
      %c0_241 = arith.constant 0 : index
      %c0_242 = arith.constant 0 : index
      %707 = vector.load %arg4[%c0_241, %c0_242] : memref<72x32xf32, #tpu.memory_space<vmem>>, vector<72x32xf32>
      %cst_243 = arith.constant dense<0.000000e+00> : vector<32x32xf32>
      %708 = tpu.matmul %706, %707, %cst_243 {dimension_numbers = #tpu.dot_dimension_numbers<[1], [0], [0], [1], [0, 0, 1, 1], [], []>} : vector<32x72xf32>, vector<72x32xf32>, vector<32x32xf32> -> vector<32x32xf32>
      %c0_244 = arith.constant 0 : index
      %c0_245 = arith.constant 0 : index
      %709 = vector.load %arg5[%c0_244, %c0_245] : memref<1x32xf32, #tpu.memory_space<vmem>>, vector<1x32xf32>
      %710 = vector.broadcast %709 : vector<1x32xf32> to vector<32x32xf32>
      %711 = arith.addf %708, %710 : vector<32x32xf32>
      %cst_246 = arith.constant 5.000000e-01 : f32
      %712 = vector.broadcast %cst_246 : f32 to vector<32x32xf32>
      %713 = arith.mulf %712, %711 : vector<32x32xf32>
      %cst_247 = arith.constant 4.471500e-02 : f32
      %714 = vector.broadcast %cst_247 : f32 to vector<32x32xf32>
      %715 = arith.mulf %714, %711 : vector<32x32xf32>
      %716 = arith.mulf %715, %711 : vector<32x32xf32>
      %717 = arith.mulf %716, %711 : vector<32x32xf32>
      %718 = arith.addf %711, %717 : vector<32x32xf32>
      %cst_248 = arith.constant 0.797884583 : f32
      %719 = vector.broadcast %cst_248 : f32 to vector<32x32xf32>
      %720 = arith.mulf %719, %718 : vector<32x32xf32>
      %721 = math.tanh %720 : vector<32x32xf32>
      %cst_249 = arith.constant 1.000000e+00 : f32
      %722 = vector.broadcast %cst_249 : f32 to vector<32x32xf32>
      %723 = arith.addf %722, %721 : vector<32x32xf32>
      %724 = arith.mulf %713, %723 : vector<32x32xf32>
      %c0_250 = arith.constant 0 : index
      %c0_251 = arith.constant 0 : index
      %725 = vector.load %arg32[%c0_250, %c0_251] : memref<32x32xf32, #tpu.memory_space<vmem>>, vector<32x32xf32>
      tpu.vector_store %arg32[%c0_250, %c0_251], %724 {strides = array<i32>} : memref<32x32xf32, #tpu.memory_space<vmem>>, vector<32x32xf32>,
    } else {
    }
    %c0_69 = arith.constant 0 : index
    %c0_70 = arith.constant 0 : index
    %49 = vector.load %arg2[%c0_69, %c0_70] : memref<2x16xf32, #tpu.memory_space<vmem>>, vector<2x16xf32>
    %c0_71 = arith.constant 0 : index
    %c0_72 = arith.constant 0 : index
    %50 = vector.load %arg32[%c0_71, %c0_72] : memref<32x32xf32, #tpu.memory_space<vmem>>, vector<32x32xf32>
    %cst = arith.constant dense<0.000000e+00> : vector<32xf32>
    %51 = vector.multi_reduction <add>, %50, %cst [1] : vector<32x32xf32> to vector<32xf32>
    %52 = vector.shape_cast %51 : vector<32xf32> to vector<32x1xf32>
    %cst_73 = arith.constant 3.200000e+01 : f32
    %53 = vector.broadcast %cst_73 : f32 to vector<32x1xf32>
    %54 = arith.divf %52, %53 : vector<32x1xf32>
    %55 = vector.broadcast %54 : vector<32x1xf32> to vector<32x32xf32>
    %56 = arith.subf %50, %55 : vector<32x32xf32>
    %57 = arith.mulf %56, %56 : vector<32x32xf32>
    %cst_74 = arith.constant dense<0.000000e+00> : vector<32xf32>
    %58 = vector.multi_reduction <add>, %57, %cst_74 [1] : vector<32x32xf32> to vector<32xf32>
    %59 = vector.shape_cast %58 : vector<32xf32> to vector<32x1xf32>
    %cst_75 = arith.constant 3.200000e+01 : f32
    %60 = vector.broadcast %cst_75 : f32 to vector<32x1xf32>
    %61 = arith.divf %59, %60 : vector<32x1xf32>
    %62 = vector.broadcast %54 : vector<32x1xf32> to vector<32x32xf32>
    %63 = arith.subf %50, %62 : vector<32x32xf32>
    %cst_76 = arith.constant 9.99999974E-6 : f32
    %64 = vector.broadcast %cst_76 : f32 to vector<32x1xf32>
    %65 = arith.addf %61, %64 : vector<32x1xf32>
    %66 = math.rsqrt %65 : vector<32x1xf32>
    %67 = vector.broadcast %66 : vector<32x1xf32> to vector<32x32xf32>
    %68 = arith.mulf %63, %67 : vector<32x32xf32>
    %69 = vector.extract_strided_slice %1 {offsets = [0, 0], sizes = [1, 32], strides = [1, 1]} : vector<2x32xf32> to vector<1x32xf32>
    %70 = vector.broadcast %69 : vector<1x32xf32> to vector<32x32xf32>
    %71 = arith.mulf %68, %70 : vector<32x32xf32>
    %72 = vector.extract_strided_slice %1 {offsets = [1, 0], sizes = [1, 32], strides = [1, 1]} : vector<2x32xf32> to vector<1x32xf32>
    %73 = vector.broadcast %72 : vector<1x32xf32> to vector<32x32xf32>
    %74 = arith.addf %71, %73 : vector<32x32xf32>
    %cst_77 = arith.constant dense<0.000000e+00> : vector<32x64xf32>
    %75 = tpu.matmul %74, %3, %cst_77 {dimension_numbers = #tpu.dot_dimension_numbers<[1], [0], [0], [1], [0, 0, 1, 1], [], []>} : vector<32x32xf32>, vector<32x64xf32>, vector<32x64xf32> -> vector<32x64xf32>
    %76 = vector.broadcast %5 : vector<1x64xf32> to vector<32x64xf32>
    %77 = arith.addf %75, %76 : vector<32x64xf32>
    %cst_78 = arith.constant 0.000000e+00 : f32
    %78 = vector.broadcast %cst_78 : f32 to vector<32x64xf32>
    %79 = arith.subf %78, %77 : vector<32x64xf32>
    %80 = math.exp %79 : vector<32x64xf32>
    %cst_79 = arith.constant 1.000000e+00 : f32
    %81 = vector.broadcast %cst_79 : f32 to vector<32x64xf32>
    %82 = arith.addf %81, %80 : vector<32x64xf32>
    %83 = tpu.reciprocal %82 {approx = true} : vector<32x64xf32> -> vector<32x64xf32>
    %84 = arith.mulf %77, %83 : vector<32x64xf32>
    %cst_80 = arith.constant dense<0.000000e+00> : vector<32x32xf32>
    %85 = tpu.matmul %84, %7, %cst_80 {dimension_numbers = #tpu.dot_dimension_numbers<[1], [0], [0], [1], [0, 0, 1, 1], [], []>} : vector<32x64xf32>, vector<64x32xf32>, vector<32x32xf32> -> vector<32x32xf32>
    %86 = vector.broadcast %9 : vector<1x32xf32> to vector<32x32xf32>
    %87 = arith.addf %85, %86 : vector<32x32xf32>
    %88 = arith.addf %50, %87 : vector<32x32xf32>
    %cst_81 = arith.constant dense<0.000000e+00> : vector<32xf32>
    %89 = vector.multi_reduction <add>, %88, %cst_81 [1] : vector<32x32xf32> to vector<32xf32>
    %90 = vector.shape_cast %89 : vector<32xf32> to vector<32x1xf32>
    %cst_82 = arith.constant 3.200000e+01 : f32
    %91 = vector.broadcast %cst_82 : f32 to vector<32x1xf32>
    %92 = arith.divf %90, %91 : vector<32x1xf32>
    %93 = vector.broadcast %92 : vector<32x1xf32> to vector<32x32xf32>
    %94 = arith.subf %88, %93 : vector<32x32xf32>
    %95 = arith.mulf %94, %94 : vector<32x32xf32>
    %cst_83 = arith.constant dense<0.000000e+00> : vector<32xf32>
    %96 = vector.multi_reduction <add>, %95, %cst_83 [1] : vector<32x32xf32> to vector<32xf32>
    %97 = vector.shape_cast %96 : vector<32xf32> to vector<32x1xf32>
    %cst_84 = arith.constant 3.200000e+01 : f32
    %98 = vector.broadcast %cst_84 : f32 to vector<32x1xf32>
    %99 = arith.divf %97, %98 : vector<32x1xf32>
    %100 = vector.broadcast %92 : vector<32x1xf32> to vector<32x32xf32>
    %101 = arith.subf %88, %100 : vector<32x32xf32>
    %cst_85 = arith.constant 9.99999974E-6 : f32
    %102 = vector.broadcast %cst_85 : f32 to vector<32x1xf32>
    %103 = arith.addf %99, %102 : vector<32x1xf32>
    %104 = math.rsqrt %103 : vector<32x1xf32>
    %105 = vector.broadcast %104 : vector<32x1xf32> to vector<32x32xf32>
    %106 = arith.mulf %101, %105 : vector<32x32xf32>
    %107 = vector.extract_strided_slice %11 {offsets = [0, 0], sizes = [1, 32], strides = [1, 1]} : vector<2x32xf32> to vector<1x32xf32>
    %108 = vector.broadcast %107 : vector<1x32xf32> to vector<32x32xf32>
    %109 = arith.mulf %106, %108 : vector<32x32xf32>
    %110 = vector.extract_strided_slice %11 {offsets = [1, 0], sizes = [1, 32], strides = [1, 1]} : vector<2x32xf32> to vector<1x32xf32>
    %111 = vector.broadcast %110 : vector<1x32xf32> to vector<32x32xf32>
    %112 = arith.addf %109, %111 : vector<32x32xf32>
    %cst_86 = arith.constant dense<0.000000e+00> : vector<32x96xf32>
    %113 = tpu.matmul %112, %13, %cst_86 {dimension_numbers = #tpu.dot_dimension_numbers<[1], [0], [0], [1], [0, 0, 1, 1], [], []>} : vector<32x32xf32>, vector<32x96xf32>, vector<32x96xf32> -> vector<32x96xf32>
    %114 = vector.broadcast %15 : vector<1x96xf32> to vector<32x96xf32>
    %115 = arith.addf %113, %114 : vector<32x96xf32>
    %116 = vector.extract_strided_slice %115 {offsets = [0, 0], sizes = [32, 32], strides = [1, 1]} : vector<32x96xf32> to vector<32x32xf32>
    %117 = vector.extract_strided_slice %115 {offsets = [0, 32], sizes = [32, 32], strides = [1, 1]} : vector<32x96xf32> to vector<32x32xf32>
    %118 = vector.extract_strided_slice %115 {offsets = [0, 64], sizes = [32, 32], strides = [1, 1]} : vector<32x96xf32> to vector<32x32xf32>
    %119 = vector.extract_strided_slice %116 {offsets = [0, 0], sizes = [16, 32], strides = [1, 1]} : vector<32x32xf32> to vector<16x32xf32>
    %120 = vector.extract_strided_slice %117 {offsets = [0, 0], sizes = [16, 32], strides = [1, 1]} : vector<32x32xf32> to vector<16x32xf32>
    %121 = vector.extract_strided_slice %118 {offsets = [0, 0], sizes = [16, 32], strides = [1, 1]} : vector<32x32xf32> to vector<16x32xf32>
    %122 = vector.extract_strided_slice %49 {offsets = [0, 0], sizes = [1, 16], strides = [1, 1]} : vector<2x16xf32> to vector<1x16xf32>
    %123 = vector.extract_strided_slice %119 {offsets = [0, 0], sizes = [16, 8], strides = [1, 1]} : vector<16x32xf32> to vector<16x8xf32>
    %124 = vector.extract_strided_slice %120 {offsets = [0, 0], sizes = [16, 8], strides = [1, 1]} : vector<16x32xf32> to vector<16x8xf32>
    %125 = tpu.transpose %124, [1, 0] : vector<16x8xf32> -> vector<8x16xf32>
    %cst_87 = arith.constant dense<0.000000e+00> : vector<16x16xf32>
    %126 = tpu.matmul %123, %125, %cst_87 {dimension_numbers = #tpu.dot_dimension_numbers<[1], [0], [0], [1], [0, 0, 1, 1], [], []>} : vector<16x8xf32>, vector<8x16xf32>, vector<16x16xf32> -> vector<16x16xf32>
    %127 = vector.broadcast %122 : vector<1x16xf32> to vector<16x16xf32>
    %128 = arith.addf %126, %127 : vector<16x16xf32>
    %cst_88 = arith.constant dense<0xFF800000> : vector<16xf32>
    %129 = vector.multi_reduction <maximumf>, %128, %cst_88 [1] : vector<16x16xf32> to vector<16xf32>
    %130 = vector.shape_cast %129 : vector<16xf32> to vector<16x1xf32>
    %131 = vector.broadcast %130 : vector<16x1xf32> to vector<16x16xf32>
    %132 = arith.subf %128, %131 : vector<16x16xf32>
    %133 = math.exp %132 : vector<16x16xf32>
    %cst_89 = arith.constant dense<0.000000e+00> : vector<16xf32>
    %134 = vector.multi_reduction <add>, %133, %cst_89 [1] : vector<16x16xf32> to vector<16xf32>
    %135 = vector.shape_cast %134 : vector<16xf32> to vector<16x1xf32>
    %136 = tpu.reciprocal %135 {approx = true} : vector<16x1xf32> -> vector<16x1xf32>
    %137 = vector.broadcast %136 : vector<16x1xf32> to vector<16x16xf32>
    %138 = arith.mulf %133, %137 : vector<16x16xf32>
    %139 = vector.extract_strided_slice %121 {offsets = [0, 0], sizes = [16, 8], strides = [1, 1]} : vector<16x32xf32> to vector<16x8xf32>
    %cst_90 = arith.constant dense<0.000000e+00> : vector<16x8xf32>
    %140 = tpu.matmul %138, %139, %cst_90 {dimension_numbers = #tpu.dot_dimension_numbers<[1], [0], [0], [1], [0, 0, 1, 1], [], []>} : vector<16x16xf32>, vector<16x8xf32>, vector<16x8xf32> -> vector<16x8xf32>
    %141 = vector.extract_strided_slice %119 {offsets = [0, 8], sizes = [16, 8], strides = [1, 1]} : vector<16x32xf32> to vector<16x8xf32>
    %142 = vector.extract_strided_slice %120 {offsets = [0, 8], sizes = [16, 8], strides = [1, 1]} : vector<16x32xf32> to vector<16x8xf32>
    %143 = tpu.transpose %142, [1, 0] : vector<16x8xf32> -> vector<8x16xf32>
    %cst_91 = arith.constant dense<0.000000e+00> : vector<16x16xf32>
    %144 = tpu.matmul %141, %143, %cst_91 {dimension_numbers = #tpu.dot_dimension_numbers<[1], [0], [0], [1], [0, 0, 1, 1], [], []>} : vector<16x8xf32>, vector<8x16xf32>, vector<16x16xf32> -> vector<16x16xf32>
    %145 = vector.broadcast %122 : vector<1x16xf32> to vector<16x16xf32>
    %146 = arith.addf %144, %145 : vector<16x16xf32>
    %cst_92 = arith.constant dense<0xFF800000> : vector<16xf32>
    %147 = vector.multi_reduction <maximumf>, %146, %cst_92 [1] : vector<16x16xf32> to vector<16xf32>
    %148 = vector.shape_cast %147 : vector<16xf32> to vector<16x1xf32>
    %149 = vector.broadcast %148 : vector<16x1xf32> to vector<16x16xf32>
    %150 = arith.subf %146, %149 : vector<16x16xf32>
    %151 = math.exp %150 : vector<16x16xf32>
    %cst_93 = arith.constant dense<0.000000e+00> : vector<16xf32>
    %152 = vector.multi_reduction <add>, %151, %cst_93 [1] : vector<16x16xf32> to vector<16xf32>
    %153 = vector.shape_cast %152 : vector<16xf32> to vector<16x1xf32>
    %154 = tpu.reciprocal %153 {approx = true} : vector<16x1xf32> -> vector<16x1xf32>
    %155 = vector.broadcast %154 : vector<16x1xf32> to vector<16x16xf32>
    %156 = arith.mulf %151, %155 : vector<16x16xf32>
    %157 = vector.extract_strided_slice %121 {offsets = [0, 8], sizes = [16, 8], strides = [1, 1]} : vector<16x32xf32> to vector<16x8xf32>
    %cst_94 = arith.constant dense<0.000000e+00> : vector<16x8xf32>
    %158 = tpu.matmul %156, %157, %cst_94 {dimension_numbers = #tpu.dot_dimension_numbers<[1], [0], [0], [1], [0, 0, 1, 1], [], []>} : vector<16x16xf32>, vector<16x8xf32>, vector<16x8xf32> -> vector<16x8xf32>
    %159 = vector.extract_strided_slice %119 {offsets = [0, 16], sizes = [16, 8], strides = [1, 1]} : vector<16x32xf32> to vector<16x8xf32>
    %160 = vector.extract_strided_slice %120 {offsets = [0, 16], sizes = [16, 8], strides = [1, 1]} : vector<16x32xf32> to vector<16x8xf32>
    %161 = tpu.transpose %160, [1, 0] : vector<16x8xf32> -> vector<8x16xf32>
    %cst_95 = arith.constant dense<0.000000e+00> : vector<16x16xf32>
    %162 = tpu.matmul %159, %161, %cst_95 {dimension_numbers = #tpu.dot_dimension_numbers<[1], [0], [0], [1], [0, 0, 1, 1], [], []>} : vector<16x8xf32>, vector<8x16xf32>, vector<16x16xf32> -> vector<16x16xf32>
    %163 = vector.broadcast %122 : vector<1x16xf32> to vector<16x16xf32>
    %164 = arith.addf %162, %163 : vector<16x16xf32>
    %cst_96 = arith.constant dense<0xFF800000> : vector<16xf32>
    %165 = vector.multi_reduction <maximumf>, %164, %cst_96 [1] : vector<16x16xf32> to vector<16xf32>
    %166 = vector.shape_cast %165 : vector<16xf32> to vector<16x1xf32>
    %167 = vector.broadcast %166 : vector<16x1xf32> to vector<16x16xf32>
    %168 = arith.subf %164, %167 : vector<16x16xf32>
    %169 = math.exp %168 : vector<16x16xf32>
    %cst_97 = arith.constant dense<0.000000e+00> : vector<16xf32>
    %170 = vector.multi_reduction <add>, %169, %cst_97 [1] : vector<16x16xf32> to vector<16xf32>
    %171 = vector.shape_cast %170 : vector<16xf32> to vector<16x1xf32>
    %172 = tpu.reciprocal %171 {approx = true} : vector<16x1xf32> -> vector<16x1xf32>
    %173 = vector.broadcast %172 : vector<16x1xf32> to vector<16x16xf32>
    %174 = arith.mulf %169, %173 : vector<16x16xf32>
    %175 = vector.extract_strided_slice %121 {offsets = [0, 16], sizes = [16, 8], strides = [1, 1]} : vector<16x32xf32> to vector<16x8xf32>
    %cst_98 = arith.constant dense<0.000000e+00> : vector<16x8xf32>
    %176 = tpu.matmul %174, %175, %cst_98 {dimension_numbers = #tpu.dot_dimension_numbers<[1], [0], [0], [1], [0, 0, 1, 1], [], []>} : vector<16x16xf32>, vector<16x8xf32>, vector<16x8xf32> -> vector<16x8xf32>
    %177 = vector.extract_strided_slice %119 {offsets = [0, 24], sizes = [16, 8], strides = [1, 1]} : vector<16x32xf32> to vector<16x8xf32>
    %178 = vector.extract_strided_slice %120 {offsets = [0, 24], sizes = [16, 8], strides = [1, 1]} : vector<16x32xf32> to vector<16x8xf32>
    %179 = tpu.transpose %178, [1, 0] : vector<16x8xf32> -> vector<8x16xf32>
    %cst_99 = arith.constant dense<0.000000e+00> : vector<16x16xf32>
    %180 = tpu.matmul %177, %179, %cst_99 {dimension_numbers = #tpu.dot_dimension_numbers<[1], [0], [0], [1], [0, 0, 1, 1], [], []>} : vector<16x8xf32>, vector<8x16xf32>, vector<16x16xf32> -> vector<16x16xf32>
    %181 = vector.broadcast %122 : vector<1x16xf32> to vector<16x16xf32>
    %182 = arith.addf %180, %181 : vector<16x16xf32>
    %cst_100 = arith.constant dense<0xFF800000> : vector<16xf32>
    %183 = vector.multi_reduction <maximumf>, %182, %cst_100 [1] : vector<16x16xf32> to vector<16xf32>
    %184 = vector.shape_cast %183 : vector<16xf32> to vector<16x1xf32>
    %185 = vector.broadcast %184 : vector<16x1xf32> to vector<16x16xf32>
    %186 = arith.subf %182, %185 : vector<16x16xf32>
    %187 = math.exp %186 : vector<16x16xf32>
    %cst_101 = arith.constant dense<0.000000e+00> : vector<16xf32>
    %188 = vector.multi_reduction <add>, %187, %cst_101 [1] : vector<16x16xf32> to vector<16xf32>
    %189 = vector.shape_cast %188 : vector<16xf32> to vector<16x1xf32>
    %190 = tpu.reciprocal %189 {approx = true} : vector<16x1xf32> -> vector<16x1xf32>
    %191 = vector.broadcast %190 : vector<16x1xf32> to vector<16x16xf32>
    %192 = arith.mulf %187, %191 : vector<16x16xf32>
    %193 = vector.extract_strided_slice %121 {offsets = [0, 24], sizes = [16, 8], strides = [1, 1]} : vector<16x32xf32> to vector<16x8xf32>
    %cst_102 = arith.constant dense<0.000000e+00> : vector<16x8xf32>
    %194 = tpu.matmul %192, %193, %cst_102 {dimension_numbers = #tpu.dot_dimension_numbers<[1], [0], [0], [1], [0, 0, 1, 1], [], []>} : vector<16x16xf32>, vector<16x8xf32>, vector<16x8xf32> -> vector<16x8xf32>
    %195 = tpu.concatenate %140, %158, %176, %194 in 1 : vector<16x8xf32>, vector<16x8xf32>, vector<16x8xf32>, vector<16x8xf32> -> vector<16x32xf32>
    %196 = vector.extract_strided_slice %116 {offsets = [16, 0], sizes = [16, 32], strides = [1, 1]} : vector<32x32xf32> to vector<16x32xf32>
    %197 = vector.extract_strided_slice %117 {offsets = [16, 0], sizes = [16, 32], strides = [1, 1]} : vector<32x32xf32> to vector<16x32xf32>
    %198 = vector.extract_strided_slice %118 {offsets = [16, 0], sizes = [16, 32], strides = [1, 1]} : vector<32x32xf32> to vector<16x32xf32>
    %199 = vector.extract_strided_slice %49 {offsets = [1, 0], sizes = [1, 16], strides = [1, 1]} : vector<2x16xf32> to vector<1x16xf32>
    %200 = vector.extract_strided_slice %196 {offsets = [0, 0], sizes = [16, 8], strides = [1, 1]} : vector<16x32xf32> to vector<16x8xf32>
    %201 = vector.extract_strided_slice %197 {offsets = [0, 0], sizes = [16, 8], strides = [1, 1]} : vector<16x32xf32> to vector<16x8xf32>
    %202 = tpu.transpose %201, [1, 0] : vector<16x8xf32> -> vector<8x16xf32>
    %cst_103 = arith.constant dense<0.000000e+00> : vector<16x16xf32>
    %203 = tpu.matmul %200, %202, %cst_103 {dimension_numbers = #tpu.dot_dimension_numbers<[1], [0], [0], [1], [0, 0, 1, 1], [], []>} : vector<16x8xf32>, vector<8x16xf32>, vector<16x16xf32> -> vector<16x16xf32>
    %204 = vector.broadcast %199 : vector<1x16xf32> to vector<16x16xf32>
    %205 = arith.addf %203, %204 : vector<16x16xf32>
    %cst_104 = arith.constant dense<0xFF800000> : vector<16xf32>
    %206 = vector.multi_reduction <maximumf>, %205, %cst_104 [1] : vector<16x16xf32> to vector<16xf32>
    %207 = vector.shape_cast %206 : vector<16xf32> to vector<16x1xf32>
    %208 = vector.broadcast %207 : vector<16x1xf32> to vector<16x16xf32>
    %209 = arith.subf %205, %208 : vector<16x16xf32>
    %210 = math.exp %209 : vector<16x16xf32>
    %cst_105 = arith.constant dense<0.000000e+00> : vector<16xf32>
    %211 = vector.multi_reduction <add>, %210, %cst_105 [1] : vector<16x16xf32> to vector<16xf32>
    %212 = vector.shape_cast %211 : vector<16xf32> to vector<16x1xf32>
    %213 = tpu.reciprocal %212 {approx = true} : vector<16x1xf32> -> vector<16x1xf32>
    %214 = vector.broadcast %213 : vector<16x1xf32> to vector<16x16xf32>
    %215 = arith.mulf %210, %214 : vector<16x16xf32>
    %216 = vector.extract_strided_slice %198 {offsets = [0, 0], sizes = [16, 8], strides = [1, 1]} : vector<16x32xf32> to vector<16x8xf32>
    %cst_106 = arith.constant dense<0.000000e+00> : vector<16x8xf32>
    %217 = tpu.matmul %215, %216, %cst_106 {dimension_numbers = #tpu.dot_dimension_numbers<[1], [0], [0], [1], [0, 0, 1, 1], [], []>} : vector<16x16xf32>, vector<16x8xf32>, vector<16x8xf32> -> vector<16x8xf32>
    %218 = vector.extract_strided_slice %196 {offsets = [0, 8], sizes = [16, 8], strides = [1, 1]} : vector<16x32xf32> to vector<16x8xf32>
    %219 = vector.extract_strided_slice %197 {offsets = [0, 8], sizes = [16, 8], strides = [1, 1]} : vector<16x32xf32> to vector<16x8xf32>
    %220 = tpu.transpose %219, [1, 0] : vector<16x8xf32> -> vector<8x16xf32>
    %cst_107 = arith.constant dense<0.000000e+00> : vector<16x16xf32>
    %221 = tpu.matmul %218, %220, %cst_107 {dimension_numbers = #tpu.dot_dimension_numbers<[1], [0], [0], [1], [0, 0, 1, 1], [], []>} : vector<16x8xf32>, vector<8x16xf32>, vector<16x16xf32> -> vector<16x16xf32>
    %222 = vector.broadcast %199 : vector<1x16xf32> to vector<16x16xf32>
    %223 = arith.addf %221, %222 : vector<16x16xf32>
    %cst_108 = arith.constant dense<0xFF800000> : vector<16xf32>
    %224 = vector.multi_reduction <maximumf>, %223, %cst_108 [1] : vector<16x16xf32> to vector<16xf32>
    %225 = vector.shape_cast %224 : vector<16xf32> to vector<16x1xf32>
    %226 = vector.broadcast %225 : vector<16x1xf32> to vector<16x16xf32>
    %227 = arith.subf %223, %226 : vector<16x16xf32>
    %228 = math.exp %227 : vector<16x16xf32>
    %cst_109 = arith.constant dense<0.000000e+00> : vector<16xf32>
    %229 = vector.multi_reduction <add>, %228, %cst_109 [1] : vector<16x16xf32> to vector<16xf32>
    %230 = vector.shape_cast %229 : vector<16xf32> to vector<16x1xf32>
    %231 = tpu.reciprocal %230 {approx = true} : vector<16x1xf32> -> vector<16x1xf32>
    %232 = vector.broadcast %231 : vector<16x1xf32> to vector<16x16xf32>
    %233 = arith.mulf %228, %232 : vector<16x16xf32>
    %234 = vector.extract_strided_slice %198 {offsets = [0, 8], sizes = [16, 8], strides = [1, 1]} : vector<16x32xf32> to vector<16x8xf32>
    %cst_110 = arith.constant dense<0.000000e+00> : vector<16x8xf32>
    %235 = tpu.matmul %233, %234, %cst_110 {dimension_numbers = #tpu.dot_dimension_numbers<[1], [0], [0], [1], [0, 0, 1, 1], [], []>} : vector<16x16xf32>, vector<16x8xf32>, vector<16x8xf32> -> vector<16x8xf32>
    %236 = vector.extract_strided_slice %196 {offsets = [0, 16], sizes = [16, 8], strides = [1, 1]} : vector<16x32xf32> to vector<16x8xf32>
    %237 = vector.extract_strided_slice %197 {offsets = [0, 16], sizes = [16, 8], strides = [1, 1]} : vector<16x32xf32> to vector<16x8xf32>
    %238 = tpu.transpose %237, [1, 0] : vector<16x8xf32> -> vector<8x16xf32>
    %cst_111 = arith.constant dense<0.000000e+00> : vector<16x16xf32>
    %239 = tpu.matmul %236, %238, %cst_111 {dimension_numbers = #tpu.dot_dimension_numbers<[1], [0], [0], [1], [0, 0, 1, 1], [], []>} : vector<16x8xf32>, vector<8x16xf32>, vector<16x16xf32> -> vector<16x16xf32>
    %240 = vector.broadcast %199 : vector<1x16xf32> to vector<16x16xf32>
    %241 = arith.addf %239, %240 : vector<16x16xf32>
    %cst_112 = arith.constant dense<0xFF800000> : vector<16xf32>
    %242 = vector.multi_reduction <maximumf>, %241, %cst_112 [1] : vector<16x16xf32> to vector<16xf32>
    %243 = vector.shape_cast %242 : vector<16xf32> to vector<16x1xf32>
    %244 = vector.broadcast %243 : vector<16x1xf32> to vector<16x16xf32>
    %245 = arith.subf %241, %244 : vector<16x16xf32>
    %246 = math.exp %245 : vector<16x16xf32>
    %cst_113 = arith.constant dense<0.000000e+00> : vector<16xf32>
    %247 = vector.multi_reduction <add>, %246, %cst_113 [1] : vector<16x16xf32> to vector<16xf32>
    %248 = vector.shape_cast %247 : vector<16xf32> to vector<16x1xf32>
    %249 = tpu.reciprocal %248 {approx = true} : vector<16x1xf32> -> vector<16x1xf32>
    %250 = vector.broadcast %249 : vector<16x1xf32> to vector<16x16xf32>
    %251 = arith.mulf %246, %250 : vector<16x16xf32>
    %252 = vector.extract_strided_slice %198 {offsets = [0, 16], sizes = [16, 8], strides = [1, 1]} : vector<16x32xf32> to vector<16x8xf32>
    %cst_114 = arith.constant dense<0.000000e+00> : vector<16x8xf32>
    %253 = tpu.matmul %251, %252, %cst_114 {dimension_numbers = #tpu.dot_dimension_numbers<[1], [0], [0], [1], [0, 0, 1, 1], [], []>} : vector<16x16xf32>, vector<16x8xf32>, vector<16x8xf32> -> vector<16x8xf32>
    %254 = vector.extract_strided_slice %196 {offsets = [0, 24], sizes = [16, 8], strides = [1, 1]} : vector<16x32xf32> to vector<16x8xf32>
    %255 = vector.extract_strided_slice %197 {offsets = [0, 24], sizes = [16, 8], strides = [1, 1]} : vector<16x32xf32> to vector<16x8xf32>
    %256 = tpu.transpose %255, [1, 0] : vector<16x8xf32> -> vector<8x16xf32>
    %cst_115 = arith.constant dense<0.000000e+00> : vector<16x16xf32>
    %257 = tpu.matmul %254, %256, %cst_115 {dimension_numbers = #tpu.dot_dimension_numbers<[1], [0], [0], [1], [0, 0, 1, 1], [], []>} : vector<16x8xf32>, vector<8x16xf32>, vector<16x16xf32> -> vector<16x16xf32>
    %258 = vector.broadcast %199 : vector<1x16xf32> to vector<16x16xf32>
    %259 = arith.addf %257, %258 : vector<16x16xf32>
    %cst_116 = arith.constant dense<0xFF800000> : vector<16xf32>
    %260 = vector.multi_reduction <maximumf>, %259, %cst_116 [1] : vector<16x16xf32> to vector<16xf32>
    %261 = vector.shape_cast %260 : vector<16xf32> to vector<16x1xf32>
    %262 = vector.broadcast %261 : vector<16x1xf32> to vector<16x16xf32>
    %263 = arith.subf %259, %262 : vector<16x16xf32>
    %264 = math.exp %263 : vector<16x16xf32>
    %cst_117 = arith.constant dense<0.000000e+00> : vector<16xf32>
    %265 = vector.multi_reduction <add>, %264, %cst_117 [1] : vector<16x16xf32> to vector<16xf32>
    %266 = vector.shape_cast %265 : vector<16xf32> to vector<16x1xf32>
    %267 = tpu.reciprocal %266 {approx = true} : vector<16x1xf32> -> vector<16x1xf32>
    %268 = vector.broadcast %267 : vector<16x1xf32> to vector<16x16xf32>
    %269 = arith.mulf %264, %268 : vector<16x16xf32>
    %270 = vector.extract_strided_slice %198 {offsets = [0, 24], sizes = [16, 8], strides = [1, 1]} : vector<16x32xf32> to vector<16x8xf32>
    %cst_118 = arith.constant dense<0.000000e+00> : vector<16x8xf32>
    %271 = tpu.matmul %269, %270, %cst_118 {dimension_numbers = #tpu.dot_dimension_numbers<[1], [0], [0], [1], [0, 0, 1, 1], [], []>} : vector<16x16xf32>, vector<16x8xf32>, vector<16x8xf32> -> vector<16x8xf32>
    %272 = tpu.concatenate %217, %235, %253, %271 in 1 : vector<16x8xf32>, vector<16x8xf32>, vector<16x8xf32>, vector<16x8xf32> -> vector<16x32xf32>
    %273 = tpu.concatenate %195, %272 in 0 : vector<16x32xf32>, vector<16x32xf32> -> vector<32x32xf32>
    %cst_119 = arith.constant dense<0.000000e+00> : vector<32x32xf32>
    %274 = tpu.matmul %273, %17, %cst_119 {dimension_numbers = #tpu.dot_dimension_numbers<[1], [0], [0], [1], [0, 0, 1, 1], [], []>} : vector<32x32xf32>, vector<32x32xf32>, vector<32x32xf32> -> vector<32x32xf32>
    %275 = vector.broadcast %19 : vector<1x32xf32> to vector<32x32xf32>
    %276 = arith.addf %274, %275 : vector<32x32xf32>
    %277 = arith.addf %88, %276 : vector<32x32xf32>
    %cst_120 = arith.constant dense<0.000000e+00> : vector<32xf32>
    %278 = vector.multi_reduction <add>, %277, %cst_120 [1] : vector<32x32xf32> to vector<32xf32>
    %279 = vector.shape_cast %278 : vector<32xf32> to vector<32x1xf32>
    %cst_121 = arith.constant 3.200000e+01 : f32
    %280 = vector.broadcast %cst_121 : f32 to vector<32x1xf32>
    %281 = arith.divf %279, %280 : vector<32x1xf32>
    %282 = vector.broadcast %281 : vector<32x1xf32> to vector<32x32xf32>
    %283 = arith.subf %277, %282 : vector<32x32xf32>
    %284 = arith.mulf %283, %283 : vector<32x32xf32>
    %cst_122 = arith.constant dense<0.000000e+00> : vector<32xf32>
    %285 = vector.multi_reduction <add>, %284, %cst_122 [1] : vector<32x32xf32> to vector<32xf32>
    %286 = vector.shape_cast %285 : vector<32xf32> to vector<32x1xf32>
    %cst_123 = arith.constant 3.200000e+01 : f32
    %287 = vector.broadcast %cst_123 : f32 to vector<32x1xf32>
    %288 = arith.divf %286, %287 : vector<32x1xf32>
    %289 = vector.broadcast %281 : vector<32x1xf32> to vector<32x32xf32>
    %290 = arith.subf %277, %289 : vector<32x32xf32>
    %cst_124 = arith.constant 9.99999974E-6 : f32
    %291 = vector.broadcast %cst_124 : f32 to vector<32x1xf32>
    %292 = arith.addf %288, %291 : vector<32x1xf32>
    %293 = math.rsqrt %292 : vector<32x1xf32>
    %294 = vector.broadcast %293 : vector<32x1xf32> to vector<32x32xf32>
    %295 = arith.mulf %290, %294 : vector<32x32xf32>
    %296 = vector.extract_strided_slice %21 {offsets = [0, 0], sizes = [1, 32], strides = [1, 1]} : vector<2x32xf32> to vector<1x32xf32>
    %297 = vector.broadcast %296 : vector<1x32xf32> to vector<32x32xf32>
    %298 = arith.mulf %295, %297 : vector<32x32xf32>
    %299 = vector.extract_strided_slice %21 {offsets = [1, 0], sizes = [1, 32], strides = [1, 1]} : vector<2x32xf32> to vector<1x32xf32>
    %300 = vector.broadcast %299 : vector<1x32xf32> to vector<32x32xf32>
    %301 = arith.addf %298, %300 : vector<32x32xf32>
    %cst_125 = arith.constant dense<0.000000e+00> : vector<32x64xf32>
    %302 = tpu.matmul %301, %23, %cst_125 {dimension_numbers = #tpu.dot_dimension_numbers<[1], [0], [0], [1], [0, 0, 1, 1], [], []>} : vector<32x32xf32>, vector<32x64xf32>, vector<32x64xf32> -> vector<32x64xf32>
    %303 = vector.broadcast %25 : vector<1x64xf32> to vector<32x64xf32>
    %304 = arith.addf %302, %303 : vector<32x64xf32>
    %305 = vector.extract_strided_slice %304 {offsets = [0, 0], sizes = [32, 32], strides = [1, 1]} : vector<32x64xf32> to vector<32x32xf32>
    %306 = vector.extract_strided_slice %304 {offsets = [0, 32], sizes = [32, 32], strides = [1, 1]} : vector<32x64xf32> to vector<32x32xf32>
    %cst_126 = arith.constant 0.000000e+00 : f32
    %307 = vector.broadcast %cst_126 : f32 to vector<32x32xf32>
    %308 = arith.subf %307, %306 : vector<32x32xf32>
    %309 = math.exp %308 : vector<32x32xf32>
    %cst_127 = arith.constant 1.000000e+00 : f32
    %310 = vector.broadcast %cst_127 : f32 to vector<32x32xf32>
    %311 = arith.addf %310, %309 : vector<32x32xf32>
    %312 = tpu.reciprocal %311 {approx = true} : vector<32x32xf32> -> vector<32x32xf32>
    %313 = arith.mulf %305, %312 : vector<32x32xf32>
    %314 = vector.extract_strided_slice %313 {offsets = [0, 0], sizes = [16, 32], strides = [1, 1]} : vector<32x32xf32> to vector<16x32xf32>
    %cst_128 = arith.constant 0.000000e+00 : f32
    %315 = vector.broadcast %cst_128 : f32 to vector<16x32xf32>
    %c3_i32 = arith.constant 3 : i32
    %316 = tpu.dynamic_rotate %314 by %c3_i32 dim 0 : vector<16x32xf32>, i32 -> vector<16x32xf32>
    %317 = tpu.iota {dimensions = array<i32: 0>} : vector<16x1xi32>
    %c-3_i32 = arith.constant -3 : i32
    %318 = vector.broadcast %c-3_i32 : i32 to vector<16x1xi32>
    %319 = arith.addi %317, %318 : vector<16x1xi32>
    %c0_i32_129 = arith.constant 0 : i32
    %320 = vector.broadcast %c0_i32_129 : i32 to vector<16x1xi32>
    %321 = arith.cmpi sge, %319, %320 : vector<16x1xi32>
    %c-3_i32_130 = arith.constant -3 : i32
    %322 = vector.broadcast %c-3_i32_130 : i32 to vector<16x1xi32>
    %323 = arith.addi %317, %322 : vector<16x1xi32>
    %c16_i32 = arith.constant 16 : i32
    %324 = vector.broadcast %c16_i32 : i32 to vector<16x1xi32>
    %325 = arith.cmpi slt, %323, %324 : vector<16x1xi32>
    %326 = arith.andi %321, %325 : vector<16x1xi1>
    %cst_131 = arith.constant 0.000000e+00 : f32
    %327 = vector.shape_cast %326 : vector<16x1xi1> to vector<16x1xi1>
    %328 = vector.broadcast %327 : vector<16x1xi1> to vector<16x32xi1>
    %329 = vector.broadcast %cst_131 : f32 to vector<16x32xf32>
    %330 = arith.select %328, %316, %329 : vector<16x32xi1>, vector<16x32xf32>
    %331 = vector.extract_strided_slice %27 {offsets = [0, 0], sizes = [1, 32], strides = [1, 1]} : vector<7x32xf32> to vector<1x32xf32>
    %332 = vector.broadcast %331 : vector<1x32xf32> to vector<16x32xf32>
    %333 = arith.mulf %330, %332 : vector<16x32xf32>
    %334 = arith.addf %315, %333 : vector<16x32xf32>
    %c2_i32 = arith.constant 2 : i32
    %335 = tpu.dynamic_rotate %314 by %c2_i32 dim 0 : vector<16x32xf32>, i32 -> vector<16x32xf32>
    %336 = tpu.iota {dimensions = array<i32: 0>} : vector<16x1xi32>
    %c-2_i32 = arith.constant -2 : i32
    %337 = vector.broadcast %c-2_i32 : i32 to vector<16x1xi32>
    %338 = arith.addi %336, %337 : vector<16x1xi32>
    %c0_i32_132 = arith.constant 0 : i32
    %339 = vector.broadcast %c0_i32_132 : i32 to vector<16x1xi32>
    %340 = arith.cmpi sge, %338, %339 : vector<16x1xi32>
    %c-2_i32_133 = arith.constant -2 : i32
    %341 = vector.broadcast %c-2_i32_133 : i32 to vector<16x1xi32>
    %342 = arith.addi %336, %341 : vector<16x1xi32>
    %c16_i32_134 = arith.constant 16 : i32
    %343 = vector.broadcast %c16_i32_134 : i32 to vector<16x1xi32>
    %344 = arith.cmpi slt, %342, %343 : vector<16x1xi32>
    %345 = arith.andi %340, %344 : vector<16x1xi1>
    %cst_135 = arith.constant 0.000000e+00 : f32
    %346 = vector.shape_cast %345 : vector<16x1xi1> to vector<16x1xi1>
    %347 = vector.broadcast %346 : vector<16x1xi1> to vector<16x32xi1>
    %348 = vector.broadcast %cst_135 : f32 to vector<16x32xf32>
    %349 = arith.select %347, %335, %348 : vector<16x32xi1>, vector<16x32xf32>
    %350 = vector.extract_strided_slice %27 {offsets = [1, 0], sizes = [1, 32], strides = [1, 1]} : vector<7x32xf32> to vector<1x32xf32>
    %351 = vector.broadcast %350 : vector<1x32xf32> to vector<16x32xf32>
    %352 = arith.mulf %349, %351 : vector<16x32xf32>
    %353 = arith.addf %334, %352 : vector<16x32xf32>
    %c1_i32 = arith.constant 1 : i32
    %354 = tpu.dynamic_rotate %314 by %c1_i32 dim 0 : vector<16x32xf32>, i32 -> vector<16x32xf32>
    %355 = tpu.iota {dimensions = array<i32: 0>} : vector<16x1xi32>
    %c-1_i32 = arith.constant -1 : i32
    %356 = vector.broadcast %c-1_i32 : i32 to vector<16x1xi32>
    %357 = arith.addi %355, %356 : vector<16x1xi32>
    %c0_i32_136 = arith.constant 0 : i32
    %358 = vector.broadcast %c0_i32_136 : i32 to vector<16x1xi32>
    %359 = arith.cmpi sge, %357, %358 : vector<16x1xi32>
    %c-1_i32_137 = arith.constant -1 : i32
    %360 = vector.broadcast %c-1_i32_137 : i32 to vector<16x1xi32>
    %361 = arith.addi %355, %360 : vector<16x1xi32>
    %c16_i32_138 = arith.constant 16 : i32
    %362 = vector.broadcast %c16_i32_138 : i32 to vector<16x1xi32>
    %363 = arith.cmpi slt, %361, %362 : vector<16x1xi32>
    %364 = arith.andi %359, %363 : vector<16x1xi1>
    %cst_139 = arith.constant 0.000000e+00 : f32
    %365 = vector.shape_cast %364 : vector<16x1xi1> to vector<16x1xi1>
    %366 = vector.broadcast %365 : vector<16x1xi1> to vector<16x32xi1>
    %367 = vector.broadcast %cst_139 : f32 to vector<16x32xf32>
    %368 = arith.select %366, %354, %367 : vector<16x32xi1>, vector<16x32xf32>
    %369 = vector.extract_strided_slice %27 {offsets = [2, 0], sizes = [1, 32], strides = [1, 1]} : vector<7x32xf32> to vector<1x32xf32>
    %370 = vector.broadcast %369 : vector<1x32xf32> to vector<16x32xf32>
    %371 = arith.mulf %368, %370 : vector<16x32xf32>
    %372 = arith.addf %353, %371 : vector<16x32xf32>
    %373 = vector.extract_strided_slice %27 {offsets = [3, 0], sizes = [1, 32], strides = [1, 1]} : vector<7x32xf32> to vector<1x32xf32>
    %374 = vector.broadcast %373 : vector<1x32xf32> to vector<16x32xf32>
    %375 = arith.mulf %314, %374 : vector<16x32xf32>
    %376 = arith.addf %372, %375 : vector<16x32xf32>
    %c15_i32 = arith.constant 15 : i32
    %377 = tpu.dynamic_rotate %314 by %c15_i32 dim 0 : vector<16x32xf32>, i32 -> vector<16x32xf32>
    %378 = tpu.iota {dimensions = array<i32: 0>} : vector<16x1xi32>
    %c1_i32_140 = arith.constant 1 : i32
    %379 = vector.broadcast %c1_i32_140 : i32 to vector<16x1xi32>
    %380 = arith.addi %378, %379 : vector<16x1xi32>
    %c0_i32_141 = arith.constant 0 : i32
    %381 = vector.broadcast %c0_i32_141 : i32 to vector<16x1xi32>
    %382 = arith.cmpi sge, %380, %381 : vector<16x1xi32>
    %c1_i32_142 = arith.constant 1 : i32
    %383 = vector.broadcast %c1_i32_142 : i32 to vector<16x1xi32>
    %384 = arith.addi %378, %383 : vector<16x1xi32>
    %c16_i32_143 = arith.constant 16 : i32
    %385 = vector.broadcast %c16_i32_143 : i32 to vector<16x1xi32>
    %386 = arith.cmpi slt, %384, %385 : vector<16x1xi32>
    %387 = arith.andi %382, %386 : vector<16x1xi1>
    %cst_144 = arith.constant 0.000000e+00 : f32
    %388 = vector.shape_cast %387 : vector<16x1xi1> to vector<16x1xi1>
    %389 = vector.broadcast %388 : vector<16x1xi1> to vector<16x32xi1>
    %390 = vector.broadcast %cst_144 : f32 to vector<16x32xf32>
    %391 = arith.select %389, %377, %390 : vector<16x32xi1>, vector<16x32xf32>
    %392 = vector.extract_strided_slice %27 {offsets = [4, 0], sizes = [1, 32], strides = [1, 1]} : vector<7x32xf32> to vector<1x32xf32>
    %393 = vector.broadcast %392 : vector<1x32xf32> to vector<16x32xf32>
    %394 = arith.mulf %391, %393 : vector<16x32xf32>
    %395 = arith.addf %376, %394 : vector<16x32xf32>
    %c14_i32 = arith.constant 14 : i32
    %396 = tpu.dynamic_rotate %314 by %c14_i32 dim 0 : vector<16x32xf32>, i32 -> vector<16x32xf32>
    %397 = tpu.iota {dimensions = array<i32: 0>} : vector<16x1xi32>
    %c2_i32_145 = arith.constant 2 : i32
    %398 = vector.broadcast %c2_i32_145 : i32 to vector<16x1xi32>
    %399 = arith.addi %397, %398 : vector<16x1xi32>
    %c0_i32_146 = arith.constant 0 : i32
    %400 = vector.broadcast %c0_i32_146 : i32 to vector<16x1xi32>
    %401 = arith.cmpi sge, %399, %400 : vector<16x1xi32>
    %c2_i32_147 = arith.constant 2 : i32
    %402 = vector.broadcast %c2_i32_147 : i32 to vector<16x1xi32>
    %403 = arith.addi %397, %402 : vector<16x1xi32>
    %c16_i32_148 = arith.constant 16 : i32
    %404 = vector.broadcast %c16_i32_148 : i32 to vector<16x1xi32>
    %405 = arith.cmpi slt, %403, %404 : vector<16x1xi32>
    %406 = arith.andi %401, %405 : vector<16x1xi1>
    %cst_149 = arith.constant 0.000000e+00 : f32
    %407 = vector.shape_cast %406 : vector<16x1xi1> to vector<16x1xi1>
    %408 = vector.broadcast %407 : vector<16x1xi1> to vector<16x32xi1>
    %409 = vector.broadcast %cst_149 : f32 to vector<16x32xf32>
    %410 = arith.select %408, %396, %409 : vector<16x32xi1>, vector<16x32xf32>
    %411 = vector.extract_strided_slice %27 {offsets = [5, 0], sizes = [1, 32], strides = [1, 1]} : vector<7x32xf32> to vector<1x32xf32>
    %412 = vector.broadcast %411 : vector<1x32xf32> to vector<16x32xf32>
    %413 = arith.mulf %410, %412 : vector<16x32xf32>
    %414 = arith.addf %395, %413 : vector<16x32xf32>
    %c13_i32 = arith.constant 13 : i32
    %415 = tpu.dynamic_rotate %314 by %c13_i32 dim 0 : vector<16x32xf32>, i32 -> vector<16x32xf32>
    %416 = tpu.iota {dimensions = array<i32: 0>} : vector<16x1xi32>
    %c3_i32_150 = arith.constant 3 : i32
    %417 = vector.broadcast %c3_i32_150 : i32 to vector<16x1xi32>
    %418 = arith.addi %416, %417 : vector<16x1xi32>
    %c0_i32_151 = arith.constant 0 : i32
    %419 = vector.broadcast %c0_i32_151 : i32 to vector<16x1xi32>
    %420 = arith.cmpi sge, %418, %419 : vector<16x1xi32>
    %c3_i32_152 = arith.constant 3 : i32
    %421 = vector.broadcast %c3_i32_152 : i32 to vector<16x1xi32>
    %422 = arith.addi %416, %421 : vector<16x1xi32>
    %c16_i32_153 = arith.constant 16 : i32
    %423 = vector.broadcast %c16_i32_153 : i32 to vector<16x1xi32>
    %424 = arith.cmpi slt, %422, %423 : vector<16x1xi32>
    %425 = arith.andi %420, %424 : vector<16x1xi1>
    %cst_154 = arith.constant 0.000000e+00 : f32
    %426 = vector.shape_cast %425 : vector<16x1xi1> to vector<16x1xi1>
    %427 = vector.broadcast %426 : vector<16x1xi1> to vector<16x32xi1>
    %428 = vector.broadcast %cst_154 : f32 to vector<16x32xf32>
    %429 = arith.select %427, %415, %428 : vector<16x32xi1>, vector<16x32xf32>
    %430 = vector.extract_strided_slice %27 {offsets = [6, 0], sizes = [1, 32], strides = [1, 1]} : vector<7x32xf32> to vector<1x32xf32>
    %431 = vector.broadcast %430 : vector<1x32xf32> to vector<16x32xf32>
    %432 = arith.mulf %429, %431 : vector<16x32xf32>
    %433 = arith.addf %414, %432 : vector<16x32xf32>
    %434 = vector.extract_strided_slice %313 {offsets = [16, 0], sizes = [16, 32], strides = [1, 1]} : vector<32x32xf32> to vector<16x32xf32>
    %cst_155 = arith.constant 0.000000e+00 : f32
    %435 = vector.broadcast %cst_155 : f32 to vector<16x32xf32>
    %c3_i32_156 = arith.constant 3 : i32
    %436 = tpu.dynamic_rotate %434 by %c3_i32_156 dim 0 : vector<16x32xf32>, i32 -> vector<16x32xf32>
    %437 = tpu.iota {dimensions = array<i32: 0>} : vector<16x1xi32>
    %c-3_i32_157 = arith.constant -3 : i32
    %438 = vector.broadcast %c-3_i32_157 : i32 to vector<16x1xi32>
    %439 = arith.addi %437, %438 : vector<16x1xi32>
    %c0_i32_158 = arith.constant 0 : i32
    %440 = vector.broadcast %c0_i32_158 : i32 to vector<16x1xi32>
    %441 = arith.cmpi sge, %439, %440 : vector<16x1xi32>
    %c-3_i32_159 = arith.constant -3 : i32
    %442 = vector.broadcast %c-3_i32_159 : i32 to vector<16x1xi32>
    %443 = arith.addi %437, %442 : vector<16x1xi32>
    %c16_i32_160 = arith.constant 16 : i32
    %444 = vector.broadcast %c16_i32_160 : i32 to vector<16x1xi32>
    %445 = arith.cmpi slt, %443, %444 : vector<16x1xi32>
    %446 = arith.andi %441, %445 : vector<16x1xi1>
    %cst_161 = arith.constant 0.000000e+00 : f32
    %447 = vector.shape_cast %446 : vector<16x1xi1> to vector<16x1xi1>
    %448 = vector.broadcast %447 : vector<16x1xi1> to vector<16x32xi1>
    %449 = vector.broadcast %cst_161 : f32 to vector<16x32xf32>
    %450 = arith.select %448, %436, %449 : vector<16x32xi1>, vector<16x32xf32>
    %451 = vector.extract_strided_slice %27 {offsets = [0, 0], sizes = [1, 32], strides = [1, 1]} : vector<7x32xf32> to vector<1x32xf32>
    %452 = vector.broadcast %451 : vector<1x32xf32> to vector<16x32xf32>
    %453 = arith.mulf %450, %452 : vector<16x32xf32>
    %454 = arith.addf %435, %453 : vector<16x32xf32>
    %c2_i32_162 = arith.constant 2 : i32
    %455 = tpu.dynamic_rotate %434 by %c2_i32_162 dim 0 : vector<16x32xf32>, i32 -> vector<16x32xf32>
    %456 = tpu.iota {dimensions = array<i32: 0>} : vector<16x1xi32>
    %c-2_i32_163 = arith.constant -2 : i32
    %457 = vector.broadcast %c-2_i32_163 : i32 to vector<16x1xi32>
    %458 = arith.addi %456, %457 : vector<16x1xi32>
    %c0_i32_164 = arith.constant 0 : i32
    %459 = vector.broadcast %c0_i32_164 : i32 to vector<16x1xi32>
    %460 = arith.cmpi sge, %458, %459 : vector<16x1xi32>
    %c-2_i32_165 = arith.constant -2 : i32
    %461 = vector.broadcast %c-2_i32_165 : i32 to vector<16x1xi32>
    %462 = arith.addi %456, %461 : vector<16x1xi32>
    %c16_i32_166 = arith.constant 16 : i32
    %463 = vector.broadcast %c16_i32_166 : i32 to vector<16x1xi32>
    %464 = arith.cmpi slt, %462, %463 : vector<16x1xi32>
    %465 = arith.andi %460, %464 : vector<16x1xi1>
    %cst_167 = arith.constant 0.000000e+00 : f32
    %466 = vector.shape_cast %465 : vector<16x1xi1> to vector<16x1xi1>
    %467 = vector.broadcast %466 : vector<16x1xi1> to vector<16x32xi1>
    %468 = vector.broadcast %cst_167 : f32 to vector<16x32xf32>
    %469 = arith.select %467, %455, %468 : vector<16x32xi1>, vector<16x32xf32>
    %470 = vector.extract_strided_slice %27 {offsets = [1, 0], sizes = [1, 32], strides = [1, 1]} : vector<7x32xf32> to vector<1x32xf32>
    %471 = vector.broadcast %470 : vector<1x32xf32> to vector<16x32xf32>
    %472 = arith.mulf %469, %471 : vector<16x32xf32>
    %473 = arith.addf %454, %472 : vector<16x32xf32>
    %c1_i32_168 = arith.constant 1 : i32
    %474 = tpu.dynamic_rotate %434 by %c1_i32_168 dim 0 : vector<16x32xf32>, i32 -> vector<16x32xf32>
    %475 = tpu.iota {dimensions = array<i32: 0>} : vector<16x1xi32>
    %c-1_i32_169 = arith.constant -1 : i32
    %476 = vector.broadcast %c-1_i32_169 : i32 to vector<16x1xi32>
    %477 = arith.addi %475, %476 : vector<16x1xi32>
    %c0_i32_170 = arith.constant 0 : i32
    %478 = vector.broadcast %c0_i32_170 : i32 to vector<16x1xi32>
    %479 = arith.cmpi sge, %477, %478 : vector<16x1xi32>
    %c-1_i32_171 = arith.constant -1 : i32
    %480 = vector.broadcast %c-1_i32_171 : i32 to vector<16x1xi32>
    %481 = arith.addi %475, %480 : vector<16x1xi32>
    %c16_i32_172 = arith.constant 16 : i32
    %482 = vector.broadcast %c16_i32_172 : i32 to vector<16x1xi32>
    %483 = arith.cmpi slt, %481, %482 : vector<16x1xi32>
    %484 = arith.andi %479, %483 : vector<16x1xi1>
    %cst_173 = arith.constant 0.000000e+00 : f32
    %485 = vector.shape_cast %484 : vector<16x1xi1> to vector<16x1xi1>
    %486 = vector.broadcast %485 : vector<16x1xi1> to vector<16x32xi1>
    %487 = vector.broadcast %cst_173 : f32 to vector<16x32xf32>
    %488 = arith.select %486, %474, %487 : vector<16x32xi1>, vector<16x32xf32>
    %489 = vector.extract_strided_slice %27 {offsets = [2, 0], sizes = [1, 32], strides = [1, 1]} : vector<7x32xf32> to vector<1x32xf32>
    %490 = vector.broadcast %489 : vector<1x32xf32> to vector<16x32xf32>
    %491 = arith.mulf %488, %490 : vector<16x32xf32>
    %492 = arith.addf %473, %491 : vector<16x32xf32>
    %493 = vector.extract_strided_slice %27 {offsets = [3, 0], sizes = [1, 32], strides = [1, 1]} : vector<7x32xf32> to vector<1x32xf32>
    %494 = vector.broadcast %493 : vector<1x32xf32> to vector<16x32xf32>
    %495 = arith.mulf %434, %494 : vector<16x32xf32>
    %496 = arith.addf %492, %495 : vector<16x32xf32>
    %c15_i32_174 = arith.constant 15 : i32
    %497 = tpu.dynamic_rotate %434 by %c15_i32_174 dim 0 : vector<16x32xf32>, i32 -> vector<16x32xf32>
    %498 = tpu.iota {dimensions = array<i32: 0>} : vector<16x1xi32>
    %c1_i32_175 = arith.constant 1 : i32
    %499 = vector.broadcast %c1_i32_175 : i32 to vector<16x1xi32>
    %500 = arith.addi %498, %499 : vector<16x1xi32>
    %c0_i32_176 = arith.constant 0 : i32
    %501 = vector.broadcast %c0_i32_176 : i32 to vector<16x1xi32>
    %502 = arith.cmpi sge, %500, %501 : vector<16x1xi32>
    %c1_i32_177 = arith.constant 1 : i32
    %503 = vector.broadcast %c1_i32_177 : i32 to vector<16x1xi32>
    %504 = arith.addi %498, %503 : vector<16x1xi32>
    %c16_i32_178 = arith.constant 16 : i32
    %505 = vector.broadcast %c16_i32_178 : i32 to vector<16x1xi32>
    %506 = arith.cmpi slt, %504, %505 : vector<16x1xi32>
    %507 = arith.andi %502, %506 : vector<16x1xi1>
    %cst_179 = arith.constant 0.000000e+00 : f32
    %508 = vector.shape_cast %507 : vector<16x1xi1> to vector<16x1xi1>
    %509 = vector.broadcast %508 : vector<16x1xi1> to vector<16x32xi1>
    %510 = vector.broadcast %cst_179 : f32 to vector<16x32xf32>
    %511 = arith.select %509, %497, %510 : vector<16x32xi1>, vector<16x32xf32>
    %512 = vector.extract_strided_slice %27 {offsets = [4, 0], sizes = [1, 32], strides = [1, 1]} : vector<7x32xf32> to vector<1x32xf32>
    %513 = vector.broadcast %512 : vector<1x32xf32> to vector<16x32xf32>
    %514 = arith.mulf %511, %513 : vector<16x32xf32>
    %515 = arith.addf %496, %514 : vector<16x32xf32>
    %c14_i32_180 = arith.constant 14 : i32
    %516 = tpu.dynamic_rotate %434 by %c14_i32_180 dim 0 : vector<16x32xf32>, i32 -> vector<16x32xf32>
    %517 = tpu.iota {dimensions = array<i32: 0>} : vector<16x1xi32>
    %c2_i32_181 = arith.constant 2 : i32
    %518 = vector.broadcast %c2_i32_181 : i32 to vector<16x1xi32>
    %519 = arith.addi %517, %518 : vector<16x1xi32>
    %c0_i32_182 = arith.constant 0 : i32
    %520 = vector.broadcast %c0_i32_182 : i32 to vector<16x1xi32>
    %521 = arith.cmpi sge, %519, %520 : vector<16x1xi32>
    %c2_i32_183 = arith.constant 2 : i32
    %522 = vector.broadcast %c2_i32_183 : i32 to vector<16x1xi32>
    %523 = arith.addi %517, %522 : vector<16x1xi32>
    %c16_i32_184 = arith.constant 16 : i32
    %524 = vector.broadcast %c16_i32_184 : i32 to vector<16x1xi32>
    %525 = arith.cmpi slt, %523, %524 : vector<16x1xi32>
    %526 = arith.andi %521, %525 : vector<16x1xi1>
    %cst_185 = arith.constant 0.000000e+00 : f32
    %527 = vector.shape_cast %526 : vector<16x1xi1> to vector<16x1xi1>
    %528 = vector.broadcast %527 : vector<16x1xi1> to vector<16x32xi1>
    %529 = vector.broadcast %cst_185 : f32 to vector<16x32xf32>
    %530 = arith.select %528, %516, %529 : vector<16x32xi1>, vector<16x32xf32>
    %531 = vector.extract_strided_slice %27 {offsets = [5, 0], sizes = [1, 32], strides = [1, 1]} : vector<7x32xf32> to vector<1x32xf32>
    %532 = vector.broadcast %531 : vector<1x32xf32> to vector<16x32xf32>
    %533 = arith.mulf %530, %532 : vector<16x32xf32>
    %534 = arith.addf %515, %533 : vector<16x32xf32>
    %c13_i32_186 = arith.constant 13 : i32
    %535 = tpu.dynamic_rotate %434 by %c13_i32_186 dim 0 : vector<16x32xf32>, i32 -> vector<16x32xf32>
    %536 = tpu.iota {dimensions = array<i32: 0>} : vector<16x1xi32>
    %c3_i32_187 = arith.constant 3 : i32
    %537 = vector.broadcast %c3_i32_187 : i32 to vector<16x1xi32>
    %538 = arith.addi %536, %537 : vector<16x1xi32>
    %c0_i32_188 = arith.constant 0 : i32
    %539 = vector.broadcast %c0_i32_188 : i32 to vector<16x1xi32>
    %540 = arith.cmpi sge, %538, %539 : vector<16x1xi32>
    %c3_i32_189 = arith.constant 3 : i32
    %541 = vector.broadcast %c3_i32_189 : i32 to vector<16x1xi32>
    %542 = arith.addi %536, %541 : vector<16x1xi32>
    %c16_i32_190 = arith.constant 16 : i32
    %543 = vector.broadcast %c16_i32_190 : i32 to vector<16x1xi32>
    %544 = arith.cmpi slt, %542, %543 : vector<16x1xi32>
    %545 = arith.andi %540, %544 : vector<16x1xi1>
    %cst_191 = arith.constant 0.000000e+00 : f32
    %546 = vector.shape_cast %545 : vector<16x1xi1> to vector<16x1xi1>
    %547 = vector.broadcast %546 : vector<16x1xi1> to vector<16x32xi1>
    %548 = vector.broadcast %cst_191 : f32 to vector<16x32xf32>
    %549 = arith.select %547, %535, %548 : vector<16x32xi1>, vector<16x32xf32>
    %550 = vector.extract_strided_slice %27 {offsets = [6, 0], sizes = [1, 32], strides = [1, 1]} : vector<7x32xf32> to vector<1x32xf32>
    %551 = vector.broadcast %550 : vector<1x32xf32> to vector<16x32xf32>
    %552 = arith.mulf %549, %551 : vector<16x32xf32>
    %553 = arith.addf %534, %552 : vector<16x32xf32>
    %554 = tpu.concatenate %433, %553 in 0 : vector<16x32xf32>, vector<16x32xf32> -> vector<32x32xf32>
    %555 = vector.broadcast %29 : vector<1x32xf32> to vector<32x32xf32>
    %556 = arith.addf %554, %555 : vector<32x32xf32>
    %cst_192 = arith.constant 0.000000e+00 : f32
    %557 = vector.broadcast %cst_192 : f32 to vector<32x32xf32>
    %558 = arith.subf %557, %556 : vector<32x32xf32>
    %559 = math.exp %558 : vector<32x32xf32>
    %cst_193 = arith.constant 1.000000e+00 : f32
    %560 = vector.broadcast %cst_193 : f32 to vector<32x32xf32>
    %561 = arith.addf %560, %559 : vector<32x32xf32>
    %562 = tpu.reciprocal %561 {approx = true} : vector<32x32xf32> -> vector<32x32xf32>
    %563 = arith.mulf %556, %562 : vector<32x32xf32>
    %cst_194 = arith.constant dense<0.000000e+00> : vector<32x32xf32>
    %564 = tpu.matmul %563, %31, %cst_194 {dimension_numbers = #tpu.dot_dimension_numbers<[1], [0], [0], [1], [0, 0, 1, 1], [], []>} : vector<32x32xf32>, vector<32x32xf32>, vector<32x32xf32> -> vector<32x32xf32>
    %565 = vector.broadcast %33 : vector<1x32xf32> to vector<32x32xf32>
    %566 = arith.addf %564, %565 : vector<32x32xf32>
    %567 = arith.addf %277, %566 : vector<32x32xf32>
    %cst_195 = arith.constant dense<0.000000e+00> : vector<32xf32>
    %568 = vector.multi_reduction <add>, %567, %cst_195 [1] : vector<32x32xf32> to vector<32xf32>
    %569 = vector.shape_cast %568 : vector<32xf32> to vector<32x1xf32>
    %cst_196 = arith.constant 3.200000e+01 : f32
    %570 = vector.broadcast %cst_196 : f32 to vector<32x1xf32>
    %571 = arith.divf %569, %570 : vector<32x1xf32>
    %572 = vector.broadcast %571 : vector<32x1xf32> to vector<32x32xf32>
    %573 = arith.subf %567, %572 : vector<32x32xf32>
    %574 = arith.mulf %573, %573 : vector<32x32xf32>
    %cst_197 = arith.constant dense<0.000000e+00> : vector<32xf32>
    %575 = vector.multi_reduction <add>, %574, %cst_197 [1] : vector<32x32xf32> to vector<32xf32>
    %576 = vector.shape_cast %575 : vector<32xf32> to vector<32x1xf32>
    %cst_198 = arith.constant 3.200000e+01 : f32
    %577 = vector.broadcast %cst_198 : f32 to vector<32x1xf32>
    %578 = arith.divf %576, %577 : vector<32x1xf32>
    %579 = vector.broadcast %571 : vector<32x1xf32> to vector<32x32xf32>
    %580 = arith.subf %567, %579 : vector<32x32xf32>
    %cst_199 = arith.constant 9.99999974E-6 : f32
    %581 = vector.broadcast %cst_199 : f32 to vector<32x1xf32>
    %582 = arith.addf %578, %581 : vector<32x1xf32>
    %583 = math.rsqrt %582 : vector<32x1xf32>
    %584 = vector.broadcast %583 : vector<32x1xf32> to vector<32x32xf32>
    %585 = arith.mulf %580, %584 : vector<32x32xf32>
    %586 = vector.extract_strided_slice %35 {offsets = [0, 0], sizes = [1, 32], strides = [1, 1]} : vector<2x32xf32> to vector<1x32xf32>
    %587 = vector.broadcast %586 : vector<1x32xf32> to vector<32x32xf32>
    %588 = arith.mulf %585, %587 : vector<32x32xf32>
    %589 = vector.extract_strided_slice %35 {offsets = [1, 0], sizes = [1, 32], strides = [1, 1]} : vector<2x32xf32> to vector<1x32xf32>
    %590 = vector.broadcast %589 : vector<1x32xf32> to vector<32x32xf32>
    %591 = arith.addf %588, %590 : vector<32x32xf32>
    %cst_200 = arith.constant dense<0.000000e+00> : vector<32x64xf32>
    %592 = tpu.matmul %591, %37, %cst_200 {dimension_numbers = #tpu.dot_dimension_numbers<[1], [0], [0], [1], [0, 0, 1, 1], [], []>} : vector<32x32xf32>, vector<32x64xf32>, vector<32x64xf32> -> vector<32x64xf32>
    %593 = vector.broadcast %39 : vector<1x64xf32> to vector<32x64xf32>
    %594 = arith.addf %592, %593 : vector<32x64xf32>
    %cst_201 = arith.constant 0.000000e+00 : f32
    %595 = vector.broadcast %cst_201 : f32 to vector<32x64xf32>
    %596 = arith.subf %595, %594 : vector<32x64xf32>
    %597 = math.exp %596 : vector<32x64xf32>
    %cst_202 = arith.constant 1.000000e+00 : f32
    %598 = vector.broadcast %cst_202 : f32 to vector<32x64xf32>
    %599 = arith.addf %598, %597 : vector<32x64xf32>
    %600 = tpu.reciprocal %599 {approx = true} : vector<32x64xf32> -> vector<32x64xf32>
    %601 = arith.mulf %594, %600 : vector<32x64xf32>
    %cst_203 = arith.constant dense<0.000000e+00> : vector<32x32xf32>
    %602 = tpu.matmul %601, %41, %cst_203 {dimension_numbers = #tpu.dot_dimension_numbers<[1], [0], [0], [1], [0, 0, 1, 1], [], []>} : vector<32x64xf32>, vector<64x32xf32>, vector<32x32xf32> -> vector<32x32xf32>
    %603 = vector.broadcast %43 : vector<1x32xf32> to vector<32x32xf32>
    %604 = arith.addf %602, %603 : vector<32x32xf32>
    %605 = arith.addf %567, %604 : vector<32x32xf32>
    %cst_204 = arith.constant dense<0.000000e+00> : vector<32xf32>
    %606 = vector.multi_reduction <add>, %605, %cst_204 [1] : vector<32x32xf32> to vector<32xf32>
    %607 = vector.shape_cast %606 : vector<32xf32> to vector<32x1xf32>
    %cst_205 = arith.constant 3.200000e+01 : f32
    %608 = vector.broadcast %cst_205 : f32 to vector<32x1xf32>
    %609 = arith.divf %607, %608 : vector<32x1xf32>
    %610 = vector.broadcast %609 : vector<32x1xf32> to vector<32x32xf32>
    %611 = arith.subf %605, %610 : vector<32x32xf32>
    %612 = arith.mulf %611, %611 : vector<32x32xf32>
    %cst_206 = arith.constant dense<0.000000e+00> : vector<32xf32>
    %613 = vector.multi_reduction <add>, %612, %cst_206 [1] : vector<32x32xf32> to vector<32xf32>
    %614 = vector.shape_cast %613 : vector<32xf32> to vector<32x1xf32>
    %cst_207 = arith.constant 3.200000e+01 : f32
    %615 = vector.broadcast %cst_207 : f32 to vector<32x1xf32>
    %616 = arith.divf %614, %615 : vector<32x1xf32>
    %617 = vector.broadcast %609 : vector<32x1xf32> to vector<32x32xf32>
    %618 = arith.subf %605, %617 : vector<32x32xf32>
    %cst_208 = arith.constant 9.99999974E-6 : f32
    %619 = vector.broadcast %cst_208 : f32 to vector<32x1xf32>
    %620 = arith.addf %616, %619 : vector<32x1xf32>
    %621 = math.rsqrt %620 : vector<32x1xf32>
    %622 = vector.broadcast %621 : vector<32x1xf32> to vector<32x32xf32>
    %623 = arith.mulf %618, %622 : vector<32x32xf32>
    %624 = vector.extract_strided_slice %45 {offsets = [0, 0], sizes = [1, 32], strides = [1, 1]} : vector<2x32xf32> to vector<1x32xf32>
    %625 = vector.broadcast %624 : vector<1x32xf32> to vector<32x32xf32>
    %626 = arith.mulf %623, %625 : vector<32x32xf32>
    %627 = vector.extract_strided_slice %45 {offsets = [1, 0], sizes = [1, 32], strides = [1, 1]} : vector<2x32xf32> to vector<1x32xf32>
    %628 = vector.broadcast %627 : vector<1x32xf32> to vector<32x32xf32>
    %629 = arith.addf %626, %628 : vector<32x32xf32>
    %c0_209 = arith.constant 0 : index
    %c0_210 = arith.constant 0 : index
    %630 = vector.load %arg32[%c0_209, %c0_210] : memref<32x32xf32, #tpu.memory_space<vmem>>, vector<32x32xf32>
    tpu.vector_store %arg32[%c0_209, %c0_210], %629 {strides = array<i32>} : memref<32x32xf32, #tpu.memory_space<vmem>>, vector<32x32xf32>,
    %c1_i32_211 = arith.constant 1 : i32
    %631 = arith.cmpi eq, %arg0, %c1_i32_211 : i32
    %632 = arith.extui %631 : i1 to i32
    %c0_i32_212 = arith.constant 0 : i32
    %633 = arith.cmpi ne, %632, %c0_i32_212 : i32
    scf.if %633 {
      %c0_213 = arith.constant 0 : index
      %c0_214 = arith.constant 0 : index
      %634 = vector.load %arg29[%c0_213, %c0_214] : memref<32x48xf32, #tpu.memory_space<vmem>>, vector<32x48xf32>
      %cst_215 = arith.constant dense<0.000000e+00> : vector<32x48xf32>
      %635 = tpu.matmul %629, %634, %cst_215 {dimension_numbers = #tpu.dot_dimension_numbers<[1], [0], [0], [1], [0, 0, 1, 1], [], []>} : vector<32x32xf32>, vector<32x48xf32>, vector<32x48xf32> -> vector<32x48xf32>
      %c0_216 = arith.constant 0 : index
      %c0_217 = arith.constant 0 : index
      %636 = vector.load %arg30[%c0_216, %c0_217] : memref<1x48xf32, #tpu.memory_space<vmem>>, vector<1x48xf32>
      %637 = vector.broadcast %636 : vector<1x48xf32> to vector<32x48xf32>
      %638 = arith.addf %635, %637 : vector<32x48xf32>
      %c0_218 = arith.constant 0 : index
      %c0_219 = arith.constant 0 : index
      %639 = vector.load %arg31[%c0_218, %c0_219] : memref<32x48xf32, #tpu.memory_space<vmem>>, vector<32x48xf32>
      tpu.vector_store %arg31[%c0_218, %c0_219], %638 {strides = array<i32>} : memref<32x48xf32, #tpu.memory_space<vmem>>, vector<32x48xf32>,
    } else {
    }
    return
  }
  func.func @transform_0(%arg0: i32) -> (i32, i32) {
    %c0_i32 = arith.constant 0 : i32
    %c0_i32_0 = arith.constant 0 : i32
    %c0_i32_1 = arith.constant 0 : i32
    return %c0_i32, %c0_i32_0 : i32, i32
  }
  func.func @transform_1(%arg0: i32) -> (i32, i32) {
    %c0_i32 = arith.constant 0 : i32
    %c0_i32_0 = arith.constant 0 : i32
    %c0_i32_1 = arith.constant 0 : i32
    return %c0_i32, %c0_i32_0 : i32, i32
  }
  func.func @transform_2(%arg0: i32) -> (i32, i32) {
    %c0_i32 = arith.constant 0 : i32
    %c0_i32_0 = arith.constant 0 : i32
    %c0_i32_1 = arith.constant 0 : i32
    return %c0_i32, %c0_i32_0 : i32, i32
  }
  func.func @transform_3(%arg0: i32) -> (i32, i32) {
    %c0_i32 = arith.constant 0 : i32
    %c0_i32_0 = arith.constant 0 : i32
    %c0_i32_1 = arith.constant 0 : i32
    return %c0_i32, %c0_i32_0 : i32, i32
  }
  func.func @transform_4(%arg0: i32) -> (i32, i32) {
    %c0_i32 = arith.constant 0 : i32
    %c0_i32_0 = arith.constant 0 : i32
    %c0_i32_1 = arith.constant 0 : i32
    return %c0_i32, %c0_i32_0 : i32, i32
  }
  func.func @transform_5(%arg0: i32) -> (i32, i32, i32) {
    %c0_i32 = arith.constant 0 : i32
    %c0_i32_0 = arith.constant 0 : i32
    %c0_i32_1 = arith.constant 0 : i32
    return %arg0, %c0_i32, %c0_i32_0 : i32, i32, i32
  }
  func.func @transform_6(%arg0: i32) -> (i32, i32, i32) {
    %c0_i32 = arith.constant 0 : i32
    %c0_i32_0 = arith.constant 0 : i32
    %c0_i32_1 = arith.constant 0 : i32
    return %arg0, %c0_i32, %c0_i32_0 : i32, i32, i32
  }
  func.func @transform_7(%arg0: i32) -> (i32, i32, i32) {
    %c0_i32 = arith.constant 0 : i32
    %c0_i32_0 = arith.constant 0 : i32
    %c0_i32_1 = arith.constant 0 : i32
    return %arg0, %c0_i32, %c0_i32_0 : i32, i32, i32
  }
  func.func @transform_8(%arg0: i32) -> (i32, i32, i32) {
    %c0_i32 = arith.constant 0 : i32
    %c0_i32_0 = arith.constant 0 : i32
    %c0_i32_1 = arith.constant 0 : i32
    return %arg0, %c0_i32, %c0_i32_0 : i32, i32, i32
  }
  func.func @transform_9(%arg0: i32) -> (i32, i32, i32) {
    %c0_i32 = arith.constant 0 : i32
    %c0_i32_0 = arith.constant 0 : i32
    %c0_i32_1 = arith.constant 0 : i32
    return %arg0, %c0_i32, %c0_i32_0 : i32, i32, i32
  }
  func.func @transform_10(%arg0: i32) -> (i32, i32, i32) {
    %c0_i32 = arith.constant 0 : i32
    %c0_i32_0 = arith.constant 0 : i32
    %c0_i32_1 = arith.constant 0 : i32
    return %arg0, %c0_i32, %c0_i32_0 : i32, i32, i32
  }
  func.func @transform_11(%arg0: i32) -> (i32, i32, i32) {
    %c0_i32 = arith.constant 0 : i32
    %c0_i32_0 = arith.constant 0 : i32
    %c0_i32_1 = arith.constant 0 : i32
    return %arg0, %c0_i32, %c0_i32_0 : i32, i32, i32
  }
  func.func @transform_12(%arg0: i32) -> (i32, i32, i32) {
    %c0_i32 = arith.constant 0 : i32
    %c0_i32_0 = arith.constant 0 : i32
    %c0_i32_1 = arith.constant 0 : i32
    return %arg0, %c0_i32, %c0_i32_0 : i32, i32, i32
  }
  func.func @transform_13(%arg0: i32) -> (i32, i32, i32) {
    %c0_i32 = arith.constant 0 : i32
    %c0_i32_0 = arith.constant 0 : i32
    %c0_i32_1 = arith.constant 0 : i32
    return %arg0, %c0_i32, %c0_i32_0 : i32, i32, i32
  }
  func.func @transform_14(%arg0: i32) -> (i32, i32, i32) {
    %c0_i32 = arith.constant 0 : i32
    %c0_i32_0 = arith.constant 0 : i32
    %c0_i32_1 = arith.constant 0 : i32
    return %arg0, %c0_i32, %c0_i32_0 : i32, i32, i32
  }
  func.func @transform_15(%arg0: i32) -> (i32, i32, i32) {
    %c0_i32 = arith.constant 0 : i32
    %c0_i32_0 = arith.constant 0 : i32
    %c0_i32_1 = arith.constant 0 : i32
    return %arg0, %c0_i32, %c0_i32_0 : i32, i32, i32
  }
  func.func @transform_16(%arg0: i32) -> (i32, i32, i32) {
    %c0_i32 = arith.constant 0 : i32
    %c0_i32_0 = arith.constant 0 : i32
    %c0_i32_1 = arith.constant 0 : i32
    return %arg0, %c0_i32, %c0_i32_0 : i32, i32, i32
  }
  func.func @transform_17(%arg0: i32) -> (i32, i32, i32) {
    %c0_i32 = arith.constant 0 : i32
    %c0_i32_0 = arith.constant 0 : i32
    %c0_i32_1 = arith.constant 0 : i32
    return %arg0, %c0_i32, %c0_i32_0 : i32, i32, i32
  }
  func.func @transform_18(%arg0: i32) -> (i32, i32, i32) {
    %c0_i32 = arith.constant 0 : i32
    %c0_i32_0 = arith.constant 0 : i32
    %c0_i32_1 = arith.constant 0 : i32
    return %arg0, %c0_i32, %c0_i32_0 : i32, i32, i32
  }
  func.func @transform_19(%arg0: i32) -> (i32, i32, i32) {
    %c0_i32 = arith.constant 0 : i32
    %c0_i32_0 = arith.constant 0 : i32
    %c0_i32_1 = arith.constant 0 : i32
    return %arg0, %c0_i32, %c0_i32_0 : i32, i32, i32
  }
  func.func @transform_20(%arg0: i32) -> (i32, i32, i32) {
    %c0_i32 = arith.constant 0 : i32
    %c0_i32_0 = arith.constant 0 : i32
    %c0_i32_1 = arith.constant 0 : i32
    return %arg0, %c0_i32, %c0_i32_0 : i32, i32, i32
  }
  func.func @transform_21(%arg0: i32) -> (i32, i32, i32) {
    %c0_i32 = arith.constant 0 : i32
    %c0_i32_0 = arith.constant 0 : i32
    %c0_i32_1 = arith.constant 0 : i32
    return %arg0, %c0_i32, %c0_i32_0 : i32, i32, i32
  }
  func.func @transform_22(%arg0: i32) -> (i32, i32, i32) {
    %c0_i32 = arith.constant 0 : i32
    %c0_i32_0 = arith.constant 0 : i32
    %c0_i32_1 = arith.constant 0 : i32
    return %arg0, %c0_i32, %c0_i32_0 : i32, i32, i32
  }
  func.func @transform_23(%arg0: i32) -> (i32, i32, i32) {
    %c0_i32 = arith.constant 0 : i32
    %c0_i32_0 = arith.constant 0 : i32
    %c0_i32_1 = arith.constant 0 : i32
    return %arg0, %c0_i32, %c0_i32_0 : i32, i32, i32
  }
  func.func @transform_24(%arg0: i32) -> (i32, i32, i32) {
    %c0_i32 = arith.constant 0 : i32
    %c0_i32_0 = arith.constant 0 : i32
    %c0_i32_1 = arith.constant 0 : i32
    return %arg0, %c0_i32, %c0_i32_0 : i32, i32, i32
  }
  func.func @transform_25(%arg0: i32) -> (i32, i32, i32) {
    %c0_i32 = arith.constant 0 : i32
    %c0_i32_0 = arith.constant 0 : i32
    %c0_i32_1 = arith.constant 0 : i32
    return %arg0, %c0_i32, %c0_i32_0 : i32, i32, i32
  }
  func.func @transform_26(%arg0: i32) -> (i32, i32, i32) {
    %c0_i32 = arith.constant 0 : i32
    %c0_i32_0 = arith.constant 0 : i32
    %c0_i32_1 = arith.constant 0 : i32
    return %arg0, %c0_i32, %c0_i32_0 : i32, i32, i32
  }
  func.func @transform_27(%arg0: i32) -> (i32, i32, i32) {
    %c0_i32 = arith.constant 0 : i32
    %c0_i32_0 = arith.constant 0 : i32
    %c0_i32_1 = arith.constant 0 : i32
    return %arg0, %c0_i32, %c0_i32_0 : i32, i32, i32
  }
  func.func @transform_28(%arg0: i32) -> (i32, i32) {
    %c0_i32 = arith.constant 0 : i32
    %c0_i32_0 = arith.constant 0 : i32
    %c0_i32_1 = arith.constant 0 : i32
    return %c0_i32, %c0_i32_0 : i32, i32
  }
  func.func @transform_29(%arg0: i32) -> (i32, i32) {
    %c0_i32 = arith.constant 0 : i32
    %c0_i32_0 = arith.constant 0 : i32
    %c0_i32_1 = arith.constant 0 : i32
    return %c0_i32, %c0_i32_0 : i32, i32
  }
  func.func @transform_30(%arg0: i32) -> (i32, i32) {
    %c0_i32 = arith.constant 0 : i32
    %c0_i32_0 = arith.constant 0 : i32
    %c0_i32_1 = arith.constant 0 : i32
    return %c0_i32, %c0_i32_0 : i32, i32
  }
}

</mosaic_0001>

<bundles_post_ra>
// kernel: conformer_forward.1
= control target key start
LH: loop header
LB: loop body
LE: loop exit
PB: predicated region body
PF: predicated region fallthrough
CT: control target
= control target key end

     0   :  { %s5118_s6 = smov 1   ;;  %s5119_s10 = smov 2   ;;  %s6706_s0 = inlined_call_operand.smem [shape: u32[31], index: -1, kind: input, shape index: {}] }
   0x1   :  { %s5179_s5 = sld [smem:[%s6706_s0]]   ;;  %s5120_s14 = smov 3  }
   0x2   :  { %s5184_s9 = sld [smem:[%s6706_s0 + %s5118_s6]]   ;;  %s5121_s18 = smov 4  }
   0x3   :  { %s5189_s13 = sld [smem:[%s6706_s0 + %s5119_s10]]   ;;  %s5122_s22 = smov 5  }
   0x4   :  { %s5194_s17 = sld [smem:[%s6706_s0 + %s5120_s14]]   ;;  %s5123_s26 = smov 6  }
   0x5   :  { %s5199_s21 = sld [smem:[%s6706_s0 + %s5121_s18]]   ;;  %s5124_s30 = smov 7  }
   0x6   :  { %s5204_s25 = sld [smem:[%s6706_s0 + %s5122_s22]]   ;;  %s5125_s4 = smov 8  }
   0x7   :  { %6725 = sst [smem:[#allocation26_spill]] %s5179_s5  ;;  %s5126_s10 = smov 9  }
   0x8   :  { %6726 = sst [smem:[#allocation27_spill]] %s5184_s9  ;;  %s5127_s15 = smov 10  }
   0x9   :  { %s5209_s29 = sld [smem:[%s6706_s0 + %s5123_s26]]   ;;  %s5128_s20 = smov 11  }
   0xa   :  { %6727 = sst [smem:[#allocation28_spill]] %s5194_s17  ;;  %s5129_s26 = smov 12  }
   0xb   :  { %6728 = sst [smem:[#allocation29_spill]] %s5199_s21  ;;  %s5130_s1 = smov 13  }
   0xc   :  { %s5214_s3 = sld [smem:[%s6706_s0 + %s5124_s30]]   ;;  %s5131_s7 = smov 14  }
   0xd   :  { %s5219_s8 = sld [smem:[%s6706_s0 + %s5125_s4]]   ;;  %s5133_s22 = smov 16  }
   0xe   :  { %s5224_s14 = sld [smem:[%s6706_s0 + %s5126_s10]]   ;;  %s5134_s28 = smov 17  }
   0xf   :  { %s5229_s19 = sld [smem:[%s6706_s0 + %s5127_s15]]   ;;  %s5132_s15 = smov 15  }
  0x10   :  { %s5234_s24 = sld [smem:[%s6706_s0 + %s5128_s20]]  }
  0x11   :  { %s5239_s30 = sld [smem:[%s6706_s0 + %s5129_s26]]  }
  0x12   :  { %s5244_s6 = sld [smem:[%s6706_s0 + %s5130_s1]]  }
  0x13   :  { %6729 = sst [smem:[#allocation30_spill]] %s5219_s8 }
  0x14   :  { %6730 = sst [smem:[#allocation31_spill]] %s5224_s14 }
  0x15   :  { %6731 = sst [smem:[#allocation32_spill]] %s5229_s19 }
  0x16   :  { %6732 = sst [smem:[#allocation33_spill]] %s5234_s24 }
  0x17   :  { %s5249_s12 = sld [smem:[%s6706_s0 + %s5131_s7]]   ;;  %s5135_s7 = smov 18  }
  0x18   :  { %6733 = sst [smem:[#allocation34_spill]] %s5244_s6 }
  0x19   :  { %s5254_s20 = sld [smem:[%s6706_s0 + %s5132_s15]]   ;;  %s5136_s15 = smov 19  }
  0x1a   :  { %s5259_s27 = sld [smem:[%s6706_s0 + %s5133_s22]]   ;;  %s5137_s22 = smov 20  }
  0x1b   :  { %s5264_s4 = sld [smem:[%s6706_s0 + %s5134_s28]]   ;;  %s5138_s28 = smov 21  }
  0x1c   :  { %s5269_s9 = sld [smem:[%s6706_s0 + %s5135_s7]]   ;;  %s5139_s7 = smov 22  }
  0x1d   :  { %6734 = sst [smem:[#allocation35_spill]] %s5249_s12 }
  0x1e   :  { %s5274_s21 = sld [smem:[%s6706_s0 + %s5136_s15]]   ;;  %s5140_s15 = smov 23  }
  0x1f   :  { %6735 = sst [smem:[#allocation36_spill]] %s5254_s20 }
  0x20   :  { %6736 = sst [smem:[#allocation37_spill]] %s5259_s27 }
  0x21   :  { %s5279_s17 = sld [smem:[%s6706_s0 + %s5137_s22]]   ;;  %s5141_s22 = smov 24  }
  0x22   :  { %6737 = sst [smem:[#allocation38_spill]] %s5269_s9 }
  0x23   :  { %s5284_s5 = sld [smem:[%s6706_s0 + %s5138_s28]]   ;;  %s5142_s28 = smov 25  }
  0x24   :  { %s5289_s9 = sld [smem:[%s6706_s0 + %s5139_s7]]   ;;  %s5143_s7 = smov 26  }
  0x25   :  { %s5294_s27 = sld [smem:[%s6706_s0 + %s5140_s15]]   ;;  %s5144_s15 = smov 27  }
  0x26   :  { %s5304_s20 = sld [smem:[%s6706_s0 + %s5142_s28]]   ;;  %s5146_s28 = smov 29  }
  0x27   :  { %6738 = sst [smem:[#allocation39_spill]] %s5279_s17 }
  0x28   :  { %s5299_s17 = sld [smem:[%s6706_s0 + %s5141_s22]]   ;;  %s5145_s22 = smov 28  }
  0x29   :  { %s5314_s6 = sld [smem:[%s6706_s0 + %s5144_s15]]  }
  0x2a   :  { %6739 = sst [smem:[#allocation40_spill]] %s5289_s9 }
  0x2b   :  { %s5309_s9 = sld [smem:[%s6706_s0 + %s5143_s7]]   ;;  %s5147_s7 = smov 30  }
  0x2c   :  { %6741 = sst [smem:[#allocation42_spill]] %s5304_s20 }
  0x2d   :  { %s5324_s20 = sld [smem:[%s6706_s0 + %s5146_s28]]  }
  0x2e   :  { %6740 = sst [smem:[#allocation41_spill]] %s5299_s17 }
  0x2f   :  { %6743 = sst [smem:[#allocation44_spill]] %s5314_s6 }
  0x30   :  { %s5319_s17 = sld [smem:[%s6706_s0 + %s5145_s22]]  }
  0x31   :  { %6742 = sst [smem:[#allocation43_spill]] %s5309_s9 }
  0x32   :  { %s5329_s9 = sld [smem:[%s6706_s0 + %s5147_s7]]  }
  0x33   :  { %6745 = sst [smem:[#allocation46_spill]] %s5324_s20 }
  0x36   :  { %6744 = sst [smem:[#allocation45_spill]] %s5319_s17 }
  0x38   :  { %6746 = sst [smem:[#allocation47_spill]] %s5329_s9 }
  0x39   :  { %66 = vsyncpa [#allocation4], 0 }
  0x3a   :  { %67 = vsyncpa [#allocation7], 0 }
  0x3b   :  { %69 = vsyncpa [#allocation7 + $0x1], 0 }
  0x3c   :  { %70 = vsyncpa [#allocation10], 0 }
  0x3d   :  { %72 = vsyncpa [#allocation10 + $0x1], 0 }
  0x3e   :  { %73 = vsyncpa [#allocation13], 0 }
  0x3f   :  { %75 = vsyncpa [#allocation13 + $0x1], 0 }
  0x40   :  { %76 = vsyncpa [#allocation16], 0 }
  0x41   :  { %78 = vsyncpa [#allocation16 + $0x1], 0 }
  0x42   :  { %79 = vsyncpa [#allocation5], 0  ;;  %s5331_s15 = smov 0   ;;  %s5333_s16 = smov 0  }
  0x43   :  { %s5335_s18 = smov 0   ;;  %s5337_s22 = smov 0  }
  0x44 LB: > { %s6747_s12 = sld [smem:[#allocation35_spill]]  ;;  %s5350_s0 = sadd.s32 4294967295, %s5116_s22   ;;  %s5112_s18 = sphi %s5335_s18, %s6822_s18   ;;  %s5108_s16 = sphi %s5333_s16, %s6824_s16   ;;  %s5104_s15 = sphi %s5331_s15, %s6823_s15   ;;  %s5116_s22 = sphi %s5337_s22, %s6820_s22  }
  0x45   : > { %s6748_s14 = sld [smem:[#allocation31_spill]]  ;;  %s5353_s23 = sadd.s32 1, %s5116_s22  }
  0x46   : > { %s6749_s17 = sld [smem:[#allocation45_spill]]  ;;  %s298_s26 = ssub.s32 %s5116_s22, %s5353_s23 }
  0x47   : > { %6750 = sst [smem:[#allocation48_spill]] %s5112_s18  ;;  %s301_s28 = sadd.s32 1, %s5112_s18 }
  0x48   : > { %6751 = sst [smem:[#allocation49_spill]] %s5353_s23  ;;  %p299_p0 = scmp.eq.s32.totalorder %s298_s26, 0 }
  0x49   : > { %p308_p1 = scmp.ne.s32.totalorder %s5112_s18, %s5108_s16  ;;  %p309_p2 = scmp.eq.s32.totalorder %s5116_s22, 0 }
  0x4a   : > { %p314_p3 = scmp.ne.s32.totalorder %s5108_s16, %s5104_s15  ;;  %p315_p5 = scmp.eq.s32.totalorder %s5350_s0, 0 }
  0x4b   : > { %s5363_s1 = scalar_select %p299_p0, %s5112_s18, %s301_s28  }
  0x4c   : > { %p5365_p4 = por %p309_p2, %p308_p1  ;;  %p4219_p6 = scmp.ge.s32.totalorder %s5116_s22, 1 }
  0x4d   : > { %6752 = sst [smem:[#allocation50_spill]] %s5363_s1  ;;  %p856_p7 = scmp.lt.s32.totalorder %s5116_s22, 3 }
  0x4e   : > { %p5374_p8 = por %p315_p5, %p314_p3  ;;  %s891_s11 = sshll.u32 %s6749_s17, 4  ;;  %s892_s11 = int_to_ptr.hbm [resolvable:$true] %s891_s11 }
  0x4f   : > { %p5379_p10 = pnand %p4219_p6, %p856_p7  ;;  %s5148_s15 = smov [#allocation17]  }
  0x50   : > { %s893_s26 = sshll.u32 %s5148_s15, 4  ;;  %p4450_p13 = scmp.lt.s32.totalorder %s5116_s22, 2  ;;  %s894_s26 = int_to_ptr.vmem [resolvable:$true] %s893_s26 }
  0x51   : > { %p4419_p11 = pneg %p5379_p10  ;;  %s5394_s1 = sand.u32 1, %s5116_s22  }
  0x52   : > { %s4760_s23 = sshra.s32 %s892_s11, 4  ;;  %s4767_s15 = scalar_lea.hbm %s6749_s17, 32  ;;  %s4761_s23 = int_to_ptr.hbm [resolvable:$true] %s4760_s23 }
  0x53   : > { %p5388_p12 = pnand %p4419_p11, %p315_p5  ;;  %s4762_s9 = scalar_lea.hbm %s4761_s23, 32 }
  0x54   : > { %p4763_p0 = scmp.ne.s32.totalorder %s4761_s23, %s4762_s9  ;;  %p4768_p6 = scmp.lt.s32.totalorder %s4761_s23, %s6749_s17 }
  0x55   : > { %p4764_p1 = pneg %p5388_p12  ;;  %p4769_p7 = scmp.lt.s32.totalorder %s4767_s15, %s4762_s9 }
  0x57   : > { %p4765_p2 = pnand %p4764_p1, %p4763_p0  ;;  %p4770_p11 = por %p4769_p7, %p4768_p6 }
  0x59   : > { %p4766_p3 = pneg %p4765_p2 }
  0x5b   : > { %p4771_p9 = pnand %p4770_p11, %p4766_p3 }
  0x5d   : > { %4774 = shalt.err (!%p4771_p9)
}
  0x5e   : > { %s6713_s20 = smov 128   ;;  %s6714_s6 = smov 8  }
  0x5f   : > { %4425 = dma.hbm_to_vmem [thread:$0]  (!%p5388_p12), %s892_s11, 512, %s894_s26, [#allocation16], %s6713_s20, %s6713_s20, %s6714_s6  }
  0x60   : > { %p5412_p0 = pnand %p4450_p13, %p5365_p4  ;;  %s5417_s23 = sand.u32 1, %s5112_s18  }
  0x61   : > { %s945_s15 = scalar_lea.hbm %s6748_s14, %s5116_s22  ;;  %s942_s24 = scalar_lea.vmem [#allocation6], %s5417_s23 }
  0x62   : > { %s947_s17 = sshll.u32 %s945_s15, 4  ;;  %s949_s19 = sshll.u32 %s942_s24, 4  ;;  %s948_s17 = int_to_ptr.hbm [resolvable:$true] %s947_s17  ;;  %s950_s19 = int_to_ptr.vmem [resolvable:$true] %s949_s19 }
  0x63   : > { %s6717_s8 = scalar_lea.sflag [#allocation7], %s5394_s1  ;;  %s4790_s11 = sshra.s32 %s948_s17, 4  ;;  %s4791_s11 = int_to_ptr.hbm [resolvable:$true] %s4790_s11 }
  0x64   : > { %s4792_s2 = scalar_lea.hbm %s4791_s11, 1  ;;  %p5425_p9 = pneg %p5412_p0 }
  0x65   : > { %p4793_p4 = scmp.ne.s32.totalorder %s4791_s11, %s4792_s2  ;;  %s4797_s20 = scalar_lea.hbm %s6748_s14, 2 }
  0x66   : > { %p4798_p3 = scmp.lt.s32.totalorder %s4791_s11, %s6748_s14  ;;  %p4799_p6 = scmp.lt.s32.totalorder %s4797_s20, %s4792_s2 }
  0x67   : > { %p4795_p13 = pnand %p5425_p9, %p4793_p4 }
  0x68   : > { %p4800_p7 = por %p4799_p6, %p4798_p3 }
  0x69   : > { %p4796_p2 = pneg %p4795_p13 }
  0x6b   : > { %p4801_p11 = pnand %p4800_p7, %p4796_p2 }
  0x6d   : > { %4804 = shalt.err (!%p4801_p11)
}
  0x6e   : > { %4429 = dma.hbm_to_vmem [thread:$0]  (!%p5412_p0), %s948_s17, 16, %s950_s19, %s6717_s8  }
  0x6f   : > { %s1002_s24 = scalar_lea.hbm %s6747_s12, %s5116_s22  ;;  %s999_s6 = scalar_lea.vmem [#allocation9], %s5417_s23 }
  0x70   : > { %s1004_s15 = sshll.u32 %s1002_s24, 4  ;;  %s1006_s11 = sshll.u32 %s999_s6, 4  ;;  %s1005_s15 = int_to_ptr.hbm [resolvable:$true] %s1004_s15  ;;  %s1007_s11 = int_to_ptr.vmem [resolvable:$true] %s1006_s11 }
  0x71   : > { %s997_s20 = scalar_lea.sflag [#allocation10], %s5394_s1  ;;  %s4820_s2 = sshra.s32 %s1005_s15, 4  ;;  %s4821_s2 = int_to_ptr.hbm [resolvable:$true] %s4820_s2 }
  0x72   : > { %s4822_s14 = scalar_lea.hbm %s4821_s2, 1  ;;  %s4827_s18 = scalar_lea.hbm %s6747_s12, 2 }
  0x73   : > { %p4823_p4 = scmp.ne.s32.totalorder %s4821_s2, %s4822_s14  ;;  %p4828_p3 = scmp.lt.s32.totalorder %s4821_s2, %s6747_s12 }
  0x74   : > { %p4829_p6 = scmp.lt.s32.totalorder %s4827_s18, %s4822_s14 }
  0x75   : > { %p4825_p13 = pnand %p4823_p4, %p5425_p9 }
  0x76   : > { %p4830_p7 = por %p4829_p6, %p4828_p3 }
  0x77   : > { %p4826_p2 = pneg %p4825_p13 }
  0x79   : > { %p4831_p11 = pnand %p4830_p7, %p4826_p2 }
  0x7b   : > { %4834 = shalt.err (!%p4831_p11)
}
  0x7c   : > { %4435 = dma.hbm_to_vmem [thread:$0]  (!%p5412_p0), %s1005_s15, 16, %s1007_s11, %s997_s20  }
  0x7d   : > { %s1058_s17 = scalar_lea.hbm %s5274_s21, %s5116_s22  ;;  %s1055_s19 = scalar_lea.vmem [#allocation12], %s5417_s23 }
  0x7e   : > { %s1062_s6 = sshll.u32 %s1055_s19, 4  ;;  %s1060_s14 = sshll.u32 %s1058_s17, 4  ;;  %s1063_s6 = int_to_ptr.vmem [resolvable:$true] %s1062_s6  ;;  %s1061_s14 = int_to_ptr.hbm [resolvable:$true] %s1060_s14 }
  0x7f   : > { %s874_s18 = sshll.u32 %s5189_s13, 4  ;;  %s6719_s24 = scalar_lea.sflag [#allocation13], %s5394_s1  ;;  %s875_s18 = int_to_ptr.hbm [resolvable:$true] %s874_s18 }
  0x80   : > { %s4850_s2 = sshra.s32 %s1061_s14, 4  ;;  %s4857_s12 = scalar_lea.hbm %s5274_s21, 2  ;;  %s4851_s2 = int_to_ptr.hbm [resolvable:$true] %s4850_s2 }
  0x81   : > { %s4852_s8 = scalar_lea.hbm %s4851_s2, 1  ;;  %p4858_p3 = scmp.lt.s32.totalorder %s4851_s2, %s5274_s21 }
  0x82   : > { %p4853_p4 = scmp.ne.s32.totalorder %s4851_s2, %s4852_s8  ;;  %p4859_p6 = scmp.lt.s32.totalorder %s4857_s12, %s4852_s8 }
  0x84   : > { %p4855_p13 = pnand %p4853_p4, %p5425_p9  ;;  %p4860_p7 = por %p4859_p6, %p4858_p3 }
  0x86   : > { %p4856_p2 = pneg %p4855_p13 }
  0x88   : > { %p4861_p11 = pnand %p4860_p7, %p4856_p2 }
  0x8a   : > { %4864 = shalt.err (!%p4861_p11)
}
  0x8b   : > { %4441 = dma.hbm_to_vmem [thread:$0]  (!%p5412_p0), %s1061_s14, 16, %s1063_s6, %s6719_s24  }
  0x8c   : > { %s5151_s15 = smov [#allocation3]   ;;  %s977_s17 = scalar_lea.hbm %s5239_s30, %s5116_s22 }
  0x8d   : > { %s876_s11 = sshll.u32 %s5151_s15, 4  ;;  %s4880_s19 = sshra.s32 %s875_s18, 4  ;;  %s877_s11 = int_to_ptr.vmem [resolvable:$true] %s876_s11  ;;  %s4881_s19 = int_to_ptr.hbm [resolvable:$true] %s4880_s19 }
  0x8e   : > { %s4882_s8 = scalar_lea.hbm %s4881_s19, 2  ;;  %s4887_s12 = scalar_lea.hbm %s5189_s13, 2 }
  0x8f   : > { %p4883_p4 = scmp.ne.s32.totalorder %s4881_s19, %s4882_s8  ;;  %p4888_p3 = scmp.lt.s32.totalorder %s4881_s19, %s5189_s13 }
  0x90   : > { %p4889_p6 = scmp.lt.s32.totalorder %s4887_s12, %s4882_s8 }
  0x91   : > { %p4885_p13 = pnand %p4883_p4, %p4764_p1 }
  0x92   : > { %p4890_p7 = por %p4889_p6, %p4888_p3 }
  0x93   : > { %p4886_p2 = pneg %p4885_p13 }
  0x95   : > { %p4891_p11 = pnand %p4890_p7, %p4886_p2 }
  0x97   : > { %4894 = shalt.err (!%p4891_p11)
}
  0x98   : > { %4422 = dma.hbm_to_vmem [thread:$0]  (!%p5388_p12), %s875_s18, 32, %s877_s11, [#allocation4]  }
  0x99   : > { %s979_s6 = sshll.u32 %s977_s17, 4  ;;  %s974_s14 = scalar_lea.vmem [#allocation8], %s5417_s23  ;;  %s980_s6 = int_to_ptr.hbm [resolvable:$true] %s979_s6 }
  0x9a   : > { %s981_s2 = sshll.u32 %s974_s14, 4  ;;  %s4910_s15 = sshra.s32 %s980_s6, 4  ;;  %s982_s2 = int_to_ptr.vmem [resolvable:$true] %s981_s2  ;;  %s4911_s15 = int_to_ptr.hbm [resolvable:$true] %s4910_s15 }
  0x9b   : > { %s4912_s24 = scalar_lea.hbm %s4911_s15, 1  ;;  %s4917_s19 = scalar_lea.hbm %s5239_s30, 2 }
  0x9c   : > { %p4913_p1 = scmp.ne.s32.totalorder %s4911_s15, %s4912_s24  ;;  %p4918_p2 = scmp.lt.s32.totalorder %s4911_s15, %s5239_s30 }
  0x9d   : > { %p4919_p3 = scmp.lt.s32.totalorder %s4917_s19, %s4912_s24 }
  0x9e   : > { %p4915_p4 = pnand %p4913_p1, %p5425_p9 }
  0x9f   : > { %p4920_p6 = por %p4919_p3, %p4918_p2 }
  0xa0   : > { %p4916_p13 = pneg %p4915_p4 }
  0xa2   : > { %p4921_p7 = pnand %p4920_p6, %p4916_p13 }
  0xa4   : > { %4924 = shalt.err (!%p4921_p7)
}
  0xa5   : > { %s6759_s28 = scalar_lea.sflag [#allocation7], %s5394_s1  ;;  %s1034_s18 = scalar_lea.hbm %s5264_s4, %s5116_s22 }
  0xa6   : > { %4432 = dma.hbm_to_vmem [thread:$0]  (!%p5412_p0), %s980_s6, 16, %s982_s2, %s6759_s28  }
  0xa7   : > { %s1036_s11 = sshll.u32 %s1034_s18, 4  ;;  %s1031_s17 = scalar_lea.vmem [#allocation11], %s5417_s23  ;;  %s1037_s11 = int_to_ptr.hbm [resolvable:$true] %s1036_s11 }
  0xa8   : > { %s1038_s8 = sshll.u32 %s1031_s17, 4  ;;  %s4940_s24 = sshra.s32 %s1037_s11, 4  ;;  %s1039_s8 = int_to_ptr.vmem [resolvable:$true] %s1038_s8  ;;  %s4941_s24 = int_to_ptr.hbm [resolvable:$true] %s4940_s24 }
  0xa9   : > { %s4942_s12 = scalar_lea.hbm %s4941_s24, 1  ;;  %s4947_s14 = scalar_lea.hbm %s5264_s4, 2 }
  0xaa   : > { %p4943_p12 = scmp.ne.s32.totalorder %s4941_s24, %s4942_s12  ;;  %p4948_p4 = scmp.lt.s32.totalorder %s4941_s24, %s5264_s4 }
  0xab   : > { %p4949_p13 = scmp.lt.s32.totalorder %s4947_s14, %s4942_s12 }
  0xac   : > { %p4945_p11 = pnand %p4943_p12, %p5425_p9 }
  0xad   : > { %p4950_p2 = por %p4949_p13, %p4948_p4 }
  0xae   : > { %p4946_p1 = pneg %p4945_p11 }
  0xb0   : > { %p4951_p3 = pnand %p4950_p2, %p4946_p1 }
  0xb2   : > { %4954 = shalt.err (!%p4951_p3)
}
  0xb3   : > { %4438 = dma.hbm_to_vmem [thread:$0]  (!%p5412_p0), %s1037_s11, 16, %s1039_s8, %s997_s20  }
  0xb4   : > { %s1083_s6 = scalar_lea.hbm %s5284_s5, %s5116_s22  ;;  %s1080_s15 = scalar_lea.vmem [#allocation14], %s5417_s23 }
  0xb5   : > { %s1085_s2 = sshll.u32 %s1083_s6, 4  ;;  %s1087_s19 = sshll.u32 %s1080_s15, 4  ;;  %s1086_s2 = int_to_ptr.hbm [resolvable:$true] %s1085_s2  ;;  %s1088_s19 = int_to_ptr.vmem [resolvable:$true] %s1087_s19 }
  0xb6   : > { %s4970_s28 = sshra.s32 %s1086_s2, 4  ;;  %s4977_s17 = scalar_lea.hbm %s5284_s5, 2  ;;  %s4971_s28 = int_to_ptr.hbm [resolvable:$true] %s4970_s28 }
  0xb7   : > { %s4972_s18 = scalar_lea.hbm %s4971_s28, 1  ;;  %p4978_p11 = scmp.lt.s32.totalorder %s4971_s28, %s5284_s5 }
  0xb8   : > { %p4973_p6 = scmp.ne.s32.totalorder %s4971_s28, %s4972_s18  ;;  %p4979_p1 = scmp.lt.s32.totalorder %s4977_s17, %s4972_s18 }
  0xba   : > { %p4975_p7 = pnand %p4973_p6, %p5425_p9  ;;  %p4980_p4 = por %p4979_p1, %p4978_p11 }
  0xbc   : > { %p4976_p12 = pneg %p4975_p7 }
  0xbe   : > { %p4981_p13 = pnand %p4980_p4, %p4976_p12 }
  0xc0   : > { %4984 = shalt.err (!%p4981_p13)
}
  0xc1   : > { %s6760_s20 = scalar_lea.sflag [#allocation13], %s5394_s1  ;;  %s4223_s11 = sshll.u32 %s5417_s23, 5 }
  0xc2   : > { %4444 = dma.hbm_to_vmem [thread:$0]  (!%p5412_p0), %s1086_s2, 16, %s1088_s19, %s6760_s20  }
  0xc3   : > { %s4344_s8 = sshll.u32 %s5116_s22, 5  ;;  %s1105_s14 = scalar_lea.vmem [#allocation15], %s4223_s11 }
  0xc4   : > { %s1110_s24 = scalar_lea.hbm %s5294_s27, %s4344_s8  ;;  %s1113_s6 = sshll.u32 %s1105_s14, 4  ;;  %s1114_s6 = int_to_ptr.vmem [resolvable:$true] %s1113_s6 }
  0xc5   : > { %s1111_s12 = sshll.u32 %s1110_s24, 4  ;;  %s1102_s15 = scalar_lea.sflag [#allocation16], %s5394_s1  ;;  %s1112_s12 = int_to_ptr.hbm [resolvable:$true] %s1111_s12 }
  0xc6   : > { %s5000_s28 = sshra.s32 %s1112_s12, 4  ;;  %s5007_s17 = scalar_lea.hbm %s5294_s27, 64  ;;  %s5001_s28 = int_to_ptr.hbm [resolvable:$true] %s5000_s28 }
  0xc7   : > { %s5002_s18 = scalar_lea.hbm %s5001_s28, 32  ;;  %p5008_p7 = scmp.lt.s32.totalorder %s5001_s28, %s5294_s27 }
  0xc8   : > { %p5003_p2 = scmp.ne.s32.totalorder %s5001_s28, %s5002_s18  ;;  %p5009_p12 = scmp.lt.s32.totalorder %s5007_s17, %s5002_s18 }
  0xca   : > { %p5005_p3 = pnand %p5003_p2, %p5425_p9  ;;  %p5010_p11 = por %p5009_p12, %p5008_p7 }
  0xcc   : > { %p5006_p6 = pneg %p5005_p3 }
  0xce   : > { %p5011_p1 = pnand %p5010_p11, %p5006_p6 }
  0xd0   : > { %5014 = shalt.err (!%p5011_p1)
}
  0xd1   : > { %s6761_s22 = smov 8   ;;  %s6762_s23 = smov 128  }
  0xd2   : > { %4447 = dma.hbm_to_vmem [thread:$0]  (!%p5412_p0), %s1112_s12, 512, %s1114_s6, %s1102_s15, %s6762_s23, %s6762_s23, %s6761_s22  }
  0xd3   : > { %1152 = sbr.rel (%p5379_p10) target bundleno = 5051 (0x13bb), region = 140 }
  0xd8   : > { %5075 = dma.done.wait (%p315_p5), [#allocation4], 32  }
  0xd9   : > { %5077 = vsyncadd (%p315_p5), [#allocation4], 4294967264  ;;  %s1159_s1 = sand.u32 1, %s5350_s0   ;;  %s5523_s26 = sand.u32 1, %s5108_s16  }
  0xda   : > { %s1160_s9 = scalar_lea.sflag [#allocation7], %s1159_s1  ;;  %s1162_s2 = scalar_lea.vmem [#allocation6], %s5523_s26 }
  0xdb   : > { %5079 = dma.done.wait (%p5374_p8), %s1160_s9, 32  }
  0xdc   : > { %5081 = vsyncadd (%p5374_p8), %s1160_s9, 4294967264  ;;  %s1171_s10 = scalar_lea.vmem [#allocation8], %s5523_s26  ;;  %s1178_s19 = scalar_lea.sflag [#allocation10], %s1159_s1 }
  0xdd   : > { %s1180_s20 = scalar_lea.vmem [#allocation9], %s5523_s26 }
  0xde   : > { %5083 = dma.done.wait (%p5374_p8), %s1178_s19, 32  }
  0xdf   : > { %5085 = vsyncadd (%p5374_p8), %s1178_s19, 4294967264  ;;  %s1196_s8 = scalar_lea.sflag [#allocation13], %s1159_s1 }
  0xe0   : > { %5087 = dma.done.wait (%p5374_p8), %s1196_s8, 32  }
  0xe1   : > { %5089 = vsyncadd (%p5374_p8), %s1196_s8, 4294967264  ;;  %s4228_s12 = sshll.u32 %s5523_s26, 5  ;;  %s1214_s6 = scalar_lea.sflag [#allocation16], %s1159_s1 }
  0xe2   : > { %s5544_s15 = scalar_lea.vmem [#allocation15], %s4228_s12 }
  0xe3   : > { %5091 = dma.done.wait (%p5374_p8), %s1214_s6, 512  }
  0xe4   : > { %5093 = vsyncadd (%p5374_p8), %s1214_s6, 4294966784 }
  0xe5   : > { %5095 = dma.done.wait (%p315_p5), [#allocation16], 512  }
  0xe6   : > { %5097 = vsyncadd (%p315_p5), [#allocation16], 4294966784  ;;  %s6763_s28 = sld [smem:[#allocation30_spill]]  ;;  %p1387_p10 = scmp.lt.s32.totalorder %s5350_s0, 1  ;;  %v5611_v14 = vld [vmem:[%s1162_s2] sm:$0x1] }
  0xe7   : > { %s6764_s18 = sld [smem:[#allocation32_spill]]  ;;  %v5629_v20 = vld [vmem:[%s1171_s10] sm:$0x1]  ;;  %v5688_v40 = vld [vmem:[%s5544_s15] sm:$0xff]  ;;  %v5691_v41 = vld [vmem:[%s5544_s15 + $0x8] sm:$0xff]  ;;  %p6796_p5 = scmp.ne.s32.totalorder %s5350_s0, 0 }
  0xe8   : > { %s6765_s17 = sld [smem:[#allocation33_spill]]  ;;  %v5644_v25 = vld [vmem:[%s1180_s20] sm:$0x1]  ;;  %6789 = vst [vmem:[#allocation60_spill] sm:$0xff] %v5688_v40  ;;  %v5699_v43 = vld [vmem:[%s5544_s15 + $0x18] sm:$0xff] }
  0xe9   : > { %s5556_s22 = scalar_select %p1387_p10, %s5350_s0, 1  ;;  %6774 = vst [vmem:[#allocation51_spill] sm:$0xff] %v5644_v25  ;;  %v5696_v42 = vld [vmem:[%s5544_s15 + $0x10] sm:$0xff] }
  0xea   : > { %s6766_s12 = sld [smem:[#allocation34_spill]]  ;;  %6790 = vst [vmem:[#allocation61_spill] sm:$0xff] %v5691_v41 }
  0xeb   : > { %s5559_s7 = sshll.u32 %s5556_s22, 1  ;;  %s5562_s23 = sshll.u32 %s5556_s22, 5  ;;  %6791 = vst [vmem:[#allocation62_spill] sm:$0xff] %v5696_v42 }
  0xec   : > { %s1390_s1 = scalar_lea.vmem %s5204_s25, %s5559_s7  ;;  %s1395_s9 = scalar_lea.vmem %s5209_s29, %s5562_s23  ;;  %6792 = vst [vmem:[#allocation63_spill] sm:$0xff] %v5699_v43 }
  0xed   : > { %s1398_s19 = scalar_lea.vmem %s5214_s3, %s5556_s22  ;;  %s6720_s8 = sshll.u32 %s5556_s22, 6  ;;  %v5574_v0 = vld [vmem:[%s1390_s1] sm:$0x3]  ;;  %v5578_v2 = vld [vmem:[%s1395_s9 + $0x8] sm:$0xff]  ;;  %v5580_v3 = vld [vmem:[%s1395_s9 + $0x10] sm:$0xff] }
  0xee   : > { %s1403_s6 = scalar_lea.vmem %s6763_s28, %s6720_s8  ;;  %v5576_v1 = vld [vmem:[%s1395_s9] sm:$0xff]  ;;  %s6767_s14 = sld [smem:[#allocation36_spill]]  ;;  %v5582_v4 = vld [vmem:[%s1395_s9 + $0x18] sm:$0xff] }
  0xef   : > { %v5584_v5 = vld [vmem:[%s1398_s19] sm:$0x1]  ;;  %s1407_s24 = scalar_lea.vmem %s6764_s18, %s5559_s7  ;;  %s1412_s11 = scalar_lea.vmem %s6765_s17, %s5562_s23  ;;  %v5592_v7 = vld [vmem:[%s1403_s6 + $0x8] sm:$0xff]  ;;  %v5594_v8 = vld [vmem:[%s1403_s6 + $0x10] sm:$0xff] }
  0xf0   : > { %s6768_s28 = sld [smem:[#allocation37_spill]]  ;;  %v5590_v6 = vld [vmem:[%s1403_s6] sm:$0xff]  ;;  %v5596_v9 = vld [vmem:[%s1403_s6 + $0x18] sm:$0xff]  ;;  %v5600_v11 = vld [vmem:[%s1403_s6 + $0x28] sm:$0xff]  ;;  %s1417_s9 = scalar_lea.vmem %s6766_s12, %s5562_s23 }
  0xf1   : > { %s6769_s1 = sld [smem:[#allocation38_spill]]  ;;  %v5598_v10 = vld [vmem:[%s1403_s6 + $0x20] sm:$0xff]  ;;  %s4243_s19 = sshll.u32 %s5556_s22, 3  ;;  %v5605_v12 = vld [vmem:[%s1403_s6 + $0x30] sm:$0xff]  ;;  %v5607_v13 = vld [vmem:[%s1403_s6 + $0x38] sm:$0xff] }
  0xf2   : > { %s6770_s18 = sld [smem:[#allocation39_spill]]  ;;  %v5615_v15 = vld [vmem:[%s1407_s24] sm:$0x3]  ;;  %v5619_v17 = vld [vmem:[%s1412_s11 + $0x8] sm:$0xff]  ;;  %v5623_v18 = vld [vmem:[%s1412_s11 + $0x10] sm:$0xff] }
  0xf3   : > { %v5617_v16 = vld [vmem:[%s1412_s11] sm:$0xff]  ;;  %s6771_s12 = sld [smem:[#allocation40_spill]]  ;;  %v5625_v19 = vld [vmem:[%s1412_s11 + $0x18] sm:$0xff]  ;;  %v5634_v22 = vld [vmem:[%s1417_s9 + $0x8] sm:$0xff] }
  0xf4   : > { %s1421_s17 = scalar_lea.vmem %s6767_s14, %s5559_s7  ;;  %s6772_s2 = sld [smem:[#allocation41_spill]]  ;;  %v5632_v21 = vld [vmem:[%s1417_s9] sm:$0xff]  ;;  %v5636_v23 = vld [vmem:[%s1417_s9 + $0x10] sm:$0xff]  ;;  %v5640_v24 = vld [vmem:[%s1417_s9 + $0x18] sm:$0xff] }
  0xf5   : > { %s6773_s24 = sld [smem:[#allocation42_spill]]  ;;  %v5646_v26 = vld [vmem:[%s1421_s17] sm:$0x3]  ;;  %s6785_s9 = sshll.u32 %s5556_s22, 6 }
  0xf6   : > { %s1426_s8 = scalar_lea.vmem %s6768_s28, %s5562_s23  ;;  %6775 = vst [vmem:[#allocation52_spill] sm:$0xff] %v5646_v26  ;;  %s6778_s10 = sld [smem:[#allocation43_spill]] }
  0xf7   : > { %s1430_s14 = scalar_lea.vmem %s6769_s1, %s4243_s19  ;;  %v5648_v27 = vld [vmem:[%s1426_s8] sm:$0xff]  ;;  %v5650_v28 = vld [vmem:[%s1426_s8 + $0x8] sm:$0xff]  ;;  %v5652_v29 = vld [vmem:[%s1426_s8 + $0x10] sm:$0xff]  ;;  %s6782_s20 = sld [smem:[#allocation44_spill]] }
  0xf8   : > { %s1435_s6 = scalar_lea.vmem %s6770_s18, %s5562_s23  ;;  %6776 = vst [vmem:[#allocation53_spill] sm:$0xff] %v5648_v27  ;;  %v5656_v30 = vld [vmem:[%s1426_s8 + $0x18] sm:$0xff]  ;;  %s6779_s23 = scalar_lea.vmem [#allocation11], %s5523_s26  ;;  %v5662_v32 = vld [vmem:[%s1430_s14] sm:$0x7f] }
  0xf9   : > { %6777 = vst [vmem:[#allocation54_spill] sm:$0xff] %v5650_v28  ;;  %s1439_s11 = scalar_lea.vmem %s6771_s12, %s5559_s7  ;;  %v5660_v31 = vld [vmem:[%s6779_s23] sm:$0x1]  ;;  %s6783_s1 = scalar_lea.vmem [#allocation12], %s5523_s26  ;;  %v5672_v35 = vld [vmem:[%s1435_s6 + $0x8] sm:$0xff]  ;;  %v5677_v36 = vld [vmem:[%s1435_s6 + $0x10] sm:$0xff] }
  0xfa   : > { %6780 = vst [vmem:[#allocation55_spill] sm:$0xff] %v5660_v31  ;;  %s1442_s28 = scalar_lea.vmem %s6772_s2, %s5556_s22  ;;  %v5668_v33 = vld [vmem:[%s6783_s1] sm:$0x1]  ;;  %v5679_v37 = vld [vmem:[%s1435_s6 + $0x18] sm:$0xff]  ;;  %s6786_s8 = scalar_lea.vmem [#allocation14], %s5523_s26 }
  0xfb   : > { %6781 = vst [vmem:[#allocation56_spill] sm:$0xff] %v5662_v32  ;;  %v5670_v34 = vld [vmem:[%s1435_s6] sm:$0xff]  ;;  %s1447_s19 = scalar_lea.vmem %s6773_s24, %s6785_s9  ;;  %s6797_s26 = sld [smem:[#allocation26_spill]] (!%p6796_p5) }
  0xfc   : > { %6784 = vst [vmem:[#allocation57_spill] sm:$0xff] %v5668_v33  ;;  %v5683_v38 = vld [vmem:[%s6786_s8] sm:$0x1]  ;;  %s1450_s18 = scalar_lea.vmem %s6778_s10, %s5556_s22  ;;  %v5707_v46 = vld [vmem:[%s1447_s19 + $0x8] sm:$0xff]  ;;  %v5709_v47 = vld [vmem:[%s1447_s19 + $0x10] sm:$0xff]  ;;  %s6798_s15 = sld [smem:[#allocation28_spill]] (!%p6796_p5) }
  0xfd   : > { %6787 = vst [vmem:[#allocation58_spill] sm:$0xff] %v5683_v38  ;;  %v5685_v39 = vld [vmem:[%s1439_s11] sm:$0x3]  ;;  %s1454_s17 = scalar_lea.vmem %s6782_s20, %s5559_s7  ;;  %v5711_v48 = vld [vmem:[%s1447_s19 + $0x18] sm:$0xff]  ;;  %v5715_v50 = vld [vmem:[%s1447_s19 + $0x28] sm:$0xff]  ;;  %s5152_s22 = smov (!%p6796_p5), 24  }
  0xfe   : > { %6788 = vst [vmem:[#allocation59_spill] sm:$0xff] %v5685_v39  ;;  %v5701_v44 = vld [vmem:[%s1442_s28] sm:$0x1]  ;;  %v5717_v51 = vld [vmem:[%s1447_s19 + $0x30] sm:$0xff]  ;;  %v5719_v52 = vld [vmem:[%s1447_s19 + $0x38] sm:$0xff]  ;;  %s5153_s12 = smov (!%p6796_p5), 48  }
  0xff   : > { %6793 = vst [vmem:[#allocation64_spill] sm:$0xff] %v5701_v44  ;;  %v5705_v45 = vld [vmem:[%s1447_s19] sm:$0xff]  ;;  %1513 = sbr.rel (%p6796_p5) target bundleno = 552 (0x228), region = 180  ;;  %s6800_s2 = sld [smem:[#allocation29_spill]] (!%p6796_p5) }
 0x100   : > { %v5713_v49 = vld [vmem:[%s1447_s19 + $0x20] sm:$0xff] }
 0x101   : > { %v5721_v53 = vld [vmem:[%s1450_s18] sm:$0x1] }
 0x102   : > { %6794 = vst [vmem:[#allocation65_spill] sm:$0xff] %v5721_v53  ;;  %v5723_v54 = vld [vmem:[%s1454_s17] sm:$0x3]  ;;  %s6799_s7 = smov (!%p6796_p5), %s6798_s15 }
 0x103   : > { %6795 = vst [vmem:[#allocation66_spill] sm:$0xff] %v5723_v54 }
 0x104   : > { %v1516_v55 = vld [vmem:[%s6797_s26 + $0x10] sm:$0xff]  ;;  %v1518_v56 = vld [vmem:[#allocation3] sm:$0x3]  ;;  %v1517_v57 = vld [vmem:[%s6797_s26 + $0x18] sm:$0xff]  ;;  %v1531_v58 = vlaneseq  ;;  %vm1586_vm4 = vcmask 195584   ;;  %vm1589_vm5 = vcmask 392192  }
 0x105   : > { %v1519_v59 = vperm.slane %v1518_v56, 0  ;;  %v1524_v60 = vperm.slane %v1518_v56, 1  ;;  %v1514_v61 = vld [vmem:[%s6797_s26] sm:$0xff]  ;;  %v1631_v54 = vld [vmem:[%s6799_s7 + $0x38] sm:$0xff]  ;;  %v1630_v38 = vld [vmem:[%s6799_s7 + $0x30] sm:$0xff]  ;;  %vm1637_vm6 = vcmask 588800  }
 0x106   : > { %v1632_v62 = vld [vmem:[%s6798_s15 + $0x40] sm:$0xff]  ;;  %v5731_v63 = vshrl.u32 %v1531_v58, 7  ;;  %v1515_v58 = vld [vmem:[%s6797_s26 + $0x8] sm:$0xff]  ;;  %v1627_v25 = vld [vmem:[%s6799_s7 + $0x18] sm:$0xff]  ;;  %vm1715_vm7 = vcmask 261120  }
 0x107   : > { %4353 = vmatpush.msra.mxu2 %v1632_v62  ;;  %4354 = vmatpush.msra.mxu3 %v1632_v62  ;;  %v1522_v53 = vmul.f32 %v1519_v59, %v1516_v55  ;;  %v1523_v44 = vmul.f32 %v1519_v59, %v1517_v57  ;;  %v1520_v39 = vmul.f32 %v1519_v59, %v1514_v61  ;;  %v1629_v26 = vld [vmem:[%s6799_s7 + $0x28] sm:$0xff]  ;;  %v1626_v40 = vld [vmem:[%s6799_s7 + $0x10] sm:$0xff] }
 0x108   : > { %1657 = vmatpush.msra.mxu0 %v1632_v62  ;;  %v1536_v33 = vadd.s32 8, %v5731_v63  ;;  %vm1553_vm0 = vcmp.lt.s32.totalorder %v5731_v63, 7  ;;  %v1521_v57 = vmul.f32 %v1519_v59, %v1515_v58  ;;  %4352 = vmatpush.msra.mxu1 %v1632_v62  ;;  %vm1533_vm2 = vcmp.lt.s32.totalorder %v5731_v63, 1 }
 0x109   : > { %4356 = vmatpush.msra.mxu2 %v1631_v54  ;;  %4357 = vmatpush.msra.mxu3 %v1631_v54  ;;  %v5736_v56 = vadd.f32 %v1524_v60, %v1522_v53  ;;  %v5738_v32 = vadd.f32 %v1524_v60, %v1523_v44  ;;  %v5741_v31 = vadd.f32 %v1524_v60, %v1520_v39  ;;  %v1628_v39 = vld [vmem:[%s6799_s7 + $0x20] sm:$0xff] }
 0x10a   : > { %1658 = vmatpush.msra.mxu0 %v1631_v54  ;;  %v1557_v55 = vadd.s32 1, %v1536_v33  ;;  %4355 = vmatpush.msra.mxu1 %v1631_v54  ;;  %v5759_v59 = vadd.f32 %v1524_v60, %v1521_v57 }
 0x10b   : > { %4359 = vmatpush.msra.mxu2 %v1630_v38  ;;  %4360 = vmatpush.msra.mxu3 %v1630_v38  ;;  %v1598_v53 = vrot.slane %v5736_v56, 1  ;;  %v1599_v44 = vrot.slane %v5738_v32, 1  ;;  %v1551_v54 = vrot.slane %v5741_v31, 1 }
 0x10c   : > { %1606 = vrot.lane.b32.xlu0 %v5736_v56, %s5152_s22  ;;  %1572 = vrot.lane.b32.xlu2 %v5741_v31, %s5152_s22  ;;  %vm1561_vm1 = vcmp.lt.s32.totalorder %v1557_v55, 16  ;;  %v1552_v58 = vrot.slane %v5759_v59, 1  ;;  %v1624_v55 = vld [vmem:[%s6799_s7] sm:$0xff] }
 0x10d   : > { %4362 = vmatpush.msra.mxu2 %v1629_v26  ;;  %4363 = vmatpush.msra.mxu3 %v1629_v26  ;;  %v1600_v61 = vsel %vm1553_vm0, %v1598_v53, %v1599_v44  ;;  %v1601_v33 = vsel %vm1553_vm0, %v1599_v44, %v1598_v53  ;;  %v1592_v44 = vrot.slane %v5736_v56, 7 }
 0x10e   : > { %1659 = vmatpush.msra.mxu0 %v1630_v38  ;;  %1614 = vrot.lane.b32.xlu1 %v1600_v61, %s5153_s12  ;;  %v1603_v62 = vsel %vm1561_vm1, %v1601_v33, 0.0  ;;  %v1555_v60 = vsel %vm1553_vm0, %v1552_v58, %v1551_v54 }
 0x10f   : > { %4365 = vmatpush.msra.mxu2 %v1628_v39  ;;  %4366 = vmatpush.msra.mxu3 %v1628_v39  ;;  %v1569_v53 = vsel %vm1561_vm1, %v1555_v60, 0.0 }
 0x110   : > { %1660 = vmatpush.msra.mxu0 %v1629_v26  ;;  %4358 = vmatpush.msra.mxu1 %v1630_v38  ;;  %v1554_v38 = vsel %vm1553_vm0, %v1551_v54, %v1552_v58  ;;  %v1530_v58 = vrot.slane %v5759_v59, 7 }
 0x111   : > { %4368 = vmatpush.msra.mxu2 %v1627_v25  ;;  %4369 = vmatpush.msra.mxu3 %v1627_v25 }
 0x112   : > { %1661 = vmatpush.msra.mxu0 %v1628_v39  ;;  %4361 = vmatpush.msra.mxu1 %v1629_v26  ;;  %v1537_v26 = vadd.s32 4294967295, %v5731_v63 }
 0x113   : > { %4371 = vmatpush.msra.mxu2 %v1626_v40  ;;  %4372 = vmatpush.msra.mxu3 %v1626_v40 }
 0x114   : > { %1608 = vrot.lane.b32.xlu0 %v5738_v32, %s5152_s22  ;;  %1574 = vrot.lane.b32.xlu2 %v5759_v59, %s5152_s22  ;;  %vm1539_vm3 = vcmp.ge.s32.totalorder %v1537_v26, 0  ;;  %v4540_v26 = vld [vmem:[%s6800_s2] ss:$0 sm:$0xff] }
 0x115   : > { %1662 = vmatpush.msra.mxu0 %v1627_v25  ;;  %4364 = vmatpush.msra.mxu1 %v1628_v39  ;;  %v1593_v39 = vrot.slane %v5738_v32, 7 }
 0x116   : > { %1616 = vrot.lane.b32.xlu1 %v1603_v62, %s5153_s12 }
 0x117   : > { %1663 = vmatpush.msra.mxu0 %v1626_v40  ;;  %4367 = vmatpush.msra.mxu1 %v1627_v25  ;;  %v1595_v57 = vsel %vm1533_vm2, %v1593_v39, %v1592_v44  ;;  %v1594_v32 = vsel %vm1533_vm2, %v1592_v44, %v1593_v39 }
 0x118   : > { %v1596_v25 = vsel %vm1539_vm3, %v1595_v57, 0.0 }
 0x119   : > { %4370 = vmatpush.msra.mxu1 %v1626_v40  ;;  %v1625_v40 = vld [vmem:[%s6799_s7 + $0x8] sm:$0xff] }
 0x11a   : > { %4374 = vmatpush.msra.mxu2 %v1625_v40  ;;  %4375 = vmatpush.msra.mxu3 %v1625_v40 }
 0x11b   : > { %1664 = vmatpush.msra.mxu0 %v1625_v40  ;;  %4373 = vmatpush.msra.mxu1 %v1625_v40 }
 0x11c   : > { %1580 = vrot.lane.b32.xlu0 %v1554_v38, %s5153_s12  ;;  %4377 = vmatpush.msra.mxu2 %v1624_v55  ;;  %v1529_v38 = vrot.slane %v5741_v31, 7 }
 0x11d   : > { %4378 = vmatpush.msra.mxu3 %v1624_v55  ;;  %1665 = vmatpush.msra.mxu0 %v1624_v55 }
 0x11e   : > { %1582 = vrot.lane.b32.xlu1 %v1569_v53, %s5153_s12  ;;  %4376 = vmatpush.msra.mxu1 %v1624_v55  ;;  %v1535_v44 = vsel %vm1533_vm2, %v1530_v58, %v1529_v38  ;;  %v1534_v59 = vsel %vm1533_vm2, %v1529_v38, %v1530_v58 }
 0x166   : > { %v1573_v54 = vpop.permute.xlu2 %1572 }
 0x16e   : > { %v1575_v40 = vpop.permute.xlu2 %1574 }
 0x17e   : > { %v1607_v56 = vpop.permute.xlu0 %1606 }
 0x17f   : > { %v1620_v61 = vsel %vm1586_vm4, %v1596_v25, %v1607_v56  ;;  %v1549_v25 = vsel %vm1539_vm3, %v1535_v44, 0.0 }
 0x180   : > { %v1615_v33 = vpop.permute.xlu1 %1614  ;;  %v1587_v31 = vsel %vm1586_vm4, %v1549_v25, %v1573_v54 }
 0x181   : > { %v1622_v62 = vsel %vm1589_vm5, %v1620_v61, %v1615_v33 }
 0x182   : > { %4253 = vmatmul.msk.f32.vlgmr.msra.gmra.mxu2 %vm1637_vm6, %v1622_v62 }
 0x186   : > { %v1609_v60 = vpop.permute.xlu0 %1608 }
 0x187   : > { %v1621_v53 = vsel %vm1586_vm4, %v1594_v32, %v1609_v60  ;;  %v1588_v32 = vsel %vm1586_vm4, %v1534_v59, %v1575_v40 }
 0x188   : > { %v1617_v39 = vpop.permute.xlu1 %1616 }
 0x189   : > { %v1623_v57 = vsel %vm1589_vm5, %v1621_v53, %v1617_v39 }
 0x18a   : > { %4254 = vmatmul.msk.f32.vlgmr.msra.gmra.mxu3 %vm1637_vm6, %v1623_v57 }
 0x18e   : > { %v1581_v55 = vpop.permute.xlu0 %1580 }
 0x18f   : > { %v1590_v56 = vsel %vm1589_vm5, %v1587_v31, %v1581_v55 }
 0x190   : > { %4251 = vmatmul.msk.f32.vlgmr.msra.gmra.mxu0 %vm1637_vm6, %v1590_v56  ;;  %v1583_v61 = vpop.permute.xlu1 %1582 }
 0x191   : > { %v1591_v33 = vsel %vm1589_vm5, %v1588_v32, %v1583_v61 }
 0x192   : > { %4252 = vmatmul.msk.f32.vlgmr.msra.gmra.mxu1 %vm1637_vm6, %v1591_v33 }
 0x205   : > { %v1673_v62 = vpop.f32.mrf.mxu2 }
 0x206   : > { %v1674_v60 = vadd.f32 %v4540_v26, %v1673_v62 }
 0x208   : > { %v1685_v53 = vmul.f32 0.044715, %v1674_v60 }
 0x20a   : > { %v1689_v63 = vmul.f32 %v1685_v53, %v1674_v60 }
 0x20c   : > { %v1693_v58 = vmul.f32 %v1689_v63, %v1674_v60 }
 0x20d   : > { %v1667_v38 = vpop.f32.mrf.mxu0  ;;  %v1676_v44 = vpop.f32.mrf.mxu3 }
 0x20e   : > { %v1668_v54 = vadd.f32 %v4540_v26, %v1667_v38  ;;  %v1697_v39 = vadd.f32 %v1693_v58, %v1674_v60  ;;  %v1677_v57 = vadd.f32 %v4540_v26, %v1676_v44  ;;  %v1681_v44 = vmul.f32 0.5, %v1674_v60 }
 0x20f   : > { %v1670_v40 = vpop.f32.mrf.mxu1 }
 0x210   : > { %v1683_v25 = vmul.f32 0.044715, %v1668_v54  ;;  %v1701_v59 = vmul.f32 0.7978846, %v1697_v39  ;;  %v1686_v31 = vmul.f32 0.044715, %v1677_v57  ;;  %v1671_v55 = vadd.f32 %v4540_v26, %v1670_v40 }
 0x212   : > { %v1687_v56 = vmul.f32 %v1683_v25, %v1668_v54  ;;  %4541 = vtanh.f32 %v1701_v59  ;;  %v1690_v32 = vmul.f32 %v1686_v31, %v1677_v57  ;;  %v1684_v61 = vmul.f32 0.044715, %v1671_v55 }
 0x213   : > { %v1679_v59 = vmul.f32 0.5, %v1668_v54 }
 0x214   : > { %v1691_v33 = vmul.f32 %v1687_v56, %v1668_v54  ;;  %v1694_v41 = vmul.f32 %v1690_v32, %v1677_v57  ;;  %v1688_v62 = vmul.f32 %v1684_v61, %v1671_v55 }
 0x216   : > { %v1695_v42 = vadd.f32 %v1691_v33, %v1668_v54  ;;  %v1698_v53 = vadd.f32 %v1694_v41, %v1677_v57  ;;  %v1692_v63 = vmul.f32 %v1688_v62, %v1671_v55  ;;  %v1682_v41 = vmul.f32 0.5, %v1677_v57 }
 0x217   : > { %v1680_v33 = vmul.f32 0.5, %v1671_v55 }
 0x218   : > { %v1699_v43 = vmul.f32 0.7978846, %v1695_v42  ;;  %v4542_v38 = vpop.eup %4541  ;;  %v1702_v27 = vmul.f32 0.7978846, %v1698_v53  ;;  %v1696_v58 = vadd.f32 %v1692_v63, %v1671_v55 }
 0x219   : > { %v1709_v28 = vadd.f32 1.0, %v4542_v38 }
 0x21a   : > { %4543 = vtanh.f32 %v1699_v43  ;;  %v1700_v26 = vmul.f32 0.7978846, %v1696_v58 }
 0x21b   : > { %4545 = vtanh.f32 %v1702_v27  ;;  %v1713_v39 = vmul.f32 %v1709_v28, %v1681_v44 }
 0x21c   : > { %4547 = vtanh.f32 %v1700_v26 }
 0x21d   : > { %1718 = vst.msk [vmem:[#allocation2 + $0x10] sm:$0xff] %vm1715_vm7, %v1713_v39 }
 0x220   : > { %v4544_v25 = vpop.eup %4543 }
 0x221   : > { %v4546_v40 = vpop.eup %4545  ;;  %v1707_v31 = vadd.f32 1.0, %v4544_v25 }
 0x222   : > { %v1710_v56 = vadd.f32 1.0, %v4546_v40  ;;  %v4548_v42 = vpop.eup %4547 }
 0x223   : > { %v1711_v32 = vmul.f32 %v1707_v31, %v1679_v59  ;;  %v1708_v60 = vadd.f32 1.0, %v4548_v42 }
 0x224   : > { %v1714_v61 = vmul.f32 %v1710_v56, %v1682_v41 }
 0x225   : > { %1716 = vst.msk [vmem:[#allocation2] sm:$0xff] %vm1715_vm7, %v1711_v32  ;;  %v1712_v27 = vmul.f32 %v1708_v60, %v1680_v33 }
 0x226   : > { %1719 = vst.msk [vmem:[#allocation2 + $0x18] sm:$0xff] %vm1715_vm7, %v1714_v61 }
 0x227   : > { %1717 = vst.msk [vmem:[#allocation2 + $0x8] sm:$0xff] %vm1715_vm7, %v1712_v27 }
 0x228 PF: > { %vm1725_vm8 = vcmask 261120   ;;  %1858 = vmatpush.msra.mxu0 %v5582_v4  ;;  %1923 = vmatpush.msra.mxu1 %v5607_v13  ;;  %v5846_v42 = vperm.slane %v5574_v0, 0  ;;  %v5849_v60 = vperm.slane %v5574_v0, 1  ;;  %v5858_v0 = vperm.slane %v5584_v5, 0  ;;  %s5155_s14 = smov 96   ;;  %s5156_s24 = smov 64  }
 0x229   : > { %2073 = vmatpush.msra.mxu2 %v5625_v19  ;;  %vm1902_vm0 = vcmask 523264   ;;  %s5157_s6 = smov 80   ;;  %s5158_s10 = smov 112  }
 0x22a   : > { %1859 = vmatpush.msra.mxu0 %v5580_v3  ;;  %1924 = vmatpush.msra.mxu1 %v5605_v12  ;;  %s5159_s11 = smov 88   ;;  %s5160_s23 = smov 120  }
 0x22b   : > { %2074 = vmatpush.msra.mxu2 %v5623_v18  ;;  %s5161_s20 = smov 72   ;;  %s6801_s28 = sld [smem:[#allocation27_spill]] }
 0x22c   : > { %v5811_v28 = vld [vmem:[#allocation2] sm:$0xff]  ;;  %1860 = vmatpush.msra.mxu0 %v5578_v2  ;;  %1925 = vmatpush.msra.mxu1 %v5600_v11  ;;  %v5154_v2 = vmov 32.0   ;;  %s5162_s1 = smov 48   ;;  %s5163_s9 = smov 104  }
 0x22d   : > { %v1726_v43 = vsel %vm1725_vm8, %v5811_v28, 0.0  ;;  %2075 = vmatpush.msra.mxu2 %v5619_v17  ;;  %4589 = vrcp.f32 %v5154_v2  ;;  %s5164_s19 = smov 56   ;;  %s5165_s8 = smov 40  }
 0x22e   : > { %1727 = vadd.xlane.f32.xlu0 %v1726_v43  ;;  %v5821_v54 = vld [vmem:[#allocation2 + $0x8] sm:$0xff]  ;;  %1861 = vmatpush.msra.mxu0 %v5576_v1  ;;  %s5166_s18 = smov 8   ;;  %s5167_s17 = smov 16  }
 0x22f   : > { %v1729_v4 = vsel %vm1725_vm8, %v5821_v54, 0.0  ;;  %1926 = vmatpush.msra.mxu1 %v5598_v10  ;;  %2076 = vmatpush.msra.mxu2 %v5617_v16  ;;  %s5168_s15 = smov 24   ;;  %p4335_p8 = scmp.ne.s32.totalorder %s5350_s0, 1 }
 0x230   : > { %s6818_s22 = sld [smem:[#allocation46_spill]] (!%p4335_p8) }
 0x231   : > { %1927 = vmatpush.msra.mxu1 %v5596_v9 }
 0x233   : > { %1928 = vmatpush.msra.mxu1 %v5594_v8  ;;  %v4590_v3 = vpop.eup %4589 }
 0x234   : > { %v1739_v1 = vmul.f32 32.0, %v4590_v3  ;;  %vm1743_vm9 = vweird.f32 %v4590_v3 }
 0x235   : > { %1929 = vmatpush.msra.mxu1 %v5592_v7 }
 0x236   : > { %1730 = vadd.xlane.f32.xlu0 %v1729_v4  ;;  %v1740_v11 = vsub.f32 1.0, %v1739_v1 }
 0x237   : > { %1930 = vmatpush.msra.mxu1 %v5590_v6 }
 0x238   : > { %v1741_v12 = vmul.f32 %v4590_v3, %v1740_v11 }
 0x23a   : > { %v1742_v13 = vadd.f32 %v4590_v3, %v1741_v12 }
 0x23c   : > { %v5835_v10 = vsel %vm1743_vm9, %v4590_v3, %v1742_v13 }
 0x2a1   : > { %v1728_v16 = vpop.xlane.xlu0 %1727 }
 0x2a2   : > { %v1745_v9 = vmul.f32 %v5835_v10, %v1728_v16 }
 0x2a4   : > { %v1749_v17 = vsub.f32 %v5811_v28, %v1745_v9 }
 0x2a6   : > { %v1753_v8 = vmul.f32 %v1749_v17, %v1749_v17 }
 0x2a8   : > { %v1757_v7 = vsel %vm1725_vm8, %v1753_v8, 0.0 }
 0x2a9   : > { %1758 = vadd.xlane.f32.xlu1 %v1757_v7  ;;  %v1731_v6 = vpop.xlane.xlu0 %1730 }
 0x2aa   : > { %v1746_v18 = vmul.f32 %v5835_v10, %v1731_v6 }
 0x2ac   : > { %v1750_v19 = vsub.f32 %v5821_v54, %v1746_v18 }
 0x2ae   : > { %v1754_v57 = vmul.f32 %v1750_v19, %v1750_v19 }
 0x2b0   : > { %v1760_v55 = vsel %vm1725_vm8, %v1754_v57, 0.0 }
 0x2b1   : > { %1761 = vadd.xlane.f32.xlu1 %v1760_v55 }
 0x31c   : > { %v1759_v62 = vpop.xlane.xlu1 %1758 }
 0x31d   : > { %v1769_v53 = vmul.f32 %v1759_v62, %v5835_v10 }
 0x31f   : > { %v1773_v63 = vadd.f32 1e-05, %v1769_v53 }
 0x321   : > { %4591 = vrsqrt.f32 %v1773_v63  ;;  %vm1783_vm11 = vweird.f32 %v1773_v63 }
 0x324   : > { %v1762_v38 = vpop.xlane.xlu1 %1761 }
 0x325   : > { %v1770_v58 = vmul.f32 %v1762_v38, %v5835_v10 }
 0x327   : > { %v4592_v44 = vpop.eup %4591  ;;  %v1774_v26 = vadd.f32 1e-05, %v1770_v58 }
 0x328   : > { %v1778_v39 = vmul.f32 %v4592_v44, %v1773_v63  ;;  %vm1784_vm10 = vweird.f32 %v4592_v44 }
 0x329   : > { %4593 = vrsqrt.f32 %v1774_v26  ;;  %vm1785_vm12 = vmor %vm1783_vm11, %vm1784_vm10  ;;  %vm1793_vm14 = vweird.f32 %v1774_v26 }
 0x32a   : > { %v1779_v25 = vmul.f32 %v4592_v44, %v1778_v39  ;;  %v5868_v39 = vld [vmem:[#allocation2 + $0x18] sm:$0xff] }
 0x32c   : > { %v1780_v40 = vmul.f32 0.5, %v1779_v25  ;;  %v1735_v25 = vsel %vm1725_vm8, %v5868_v39, 0.0 }
 0x32d   : > { %1736 = vadd.xlane.f32.xlu1 %v1735_v25 }
 0x32e   : > { %v1781_v59 = vsub.f32 1.5, %v1780_v40 }
 0x32f   : > { %v4594_v31 = vpop.eup %4593 }
 0x330   : > { %v1782_v41 = vmul.f32 %v4592_v44, %v1781_v59  ;;  %v1788_v56 = vmul.f32 %v4594_v31, %v1774_v26  ;;  %vm1794_vm13 = vweird.f32 %v4594_v31 }
 0x331   : > { %vm1795_vm15 = vmor %vm1793_vm14, %vm1794_vm13  ;;  %vm2097_vm14 = vcmask 64512  }
 0x332   : > { %v1786_v32 = vsel %vm1785_vm12, %v4592_v44, %v1782_v41  ;;  %v1789_v61 = vmul.f32 %v4594_v31, %v1788_v56 }
 0x333   : > { %v1817_v33 = vmul.f32 %v1786_v32, %v1749_v17  ;;  %v5861_v17 = vld [vmem:[#allocation2 + $0x10] sm:$0xff]  ;;  %v5876_v32 = vperm.slane %v5611_v14, 0 }
 0x334   : > { %v1790_v27 = vmul.f32 0.5, %v1789_v61  ;;  %v1732_v8 = vsel %vm1725_vm8, %v5861_v17, 0.0 }
 0x335   : > { %v1822_v43 = vmul.f32 %v5846_v42, %v1817_v33  ;;  %1733 = vadd.xlane.f32.xlu0 %v1732_v8 }
 0x336   : > { %v1791_v4 = vsub.f32 1.5, %v1790_v27 }
 0x337   : > { %v1827_v2 = vadd.f32 %v5849_v60, %v1822_v43 }
 0x338   : > { %v1792_v3 = vmul.f32 %v4594_v31, %v1791_v4 }
 0x339   : > { %4255 = vmatmul.msk.f32.vlgmr.msra.gmra.mxu0 %vm1725_vm8, %v1827_v2 }
 0x33a   : > { %v1796_v1 = vsel %vm1795_vm15, %v4594_v31, %v1792_v3  ;;  %vm2129_vm15 = vcmask 130048  }
 0x33b   : > { %v1818_v11 = vmul.f32 %v1796_v1, %v1750_v19 }
 0x33d   : > { %v1823_v12 = vmul.f32 %v5846_v42, %v1818_v11 }
 0x33f   : > { %v1828_v13 = vadd.f32 %v5849_v60, %v1823_v12 }
 0x341   : > { %4256 = vmatmul.msk.f32.gmra.mxu0 %vm1725_vm8, %v1828_v13 }
 0x3a0   : > { %v1737_v1 = vpop.xlane.xlu1 %1736 }
 0x3a8   : > { %v1734_v40 = vpop.xlane.xlu0 %1733 }
 0x3a9   : > { %v1747_v59 = vmul.f32 %v5835_v10, %v1734_v40 }
 0x3ab   : > { %v1751_v31 = vsub.f32 %v5861_v17, %v1747_v59 }
 0x3ad   : > { %v1755_v41 = vmul.f32 %v1751_v31, %v1751_v31 }
 0x3af   : > { %v1763_v56 = vsel %vm1725_vm8, %v1755_v41, 0.0 }
 0x3b0   : > { %1764 = vadd.xlane.f32.xlu1 %v1763_v56 }
 0x3b6   : > { %v1863_v16 = vpop.f32.mrf.mxu0 }
 0x3b7   : > { %v1864_v9 = vadd.f32 %v1863_v16, %v5858_v0 }
 0x3b9   : > { %v1875_v7 = vsub.f32 0.0, %v1864_v9 }
 0x3bb   : > { %v1879_v6 = vmul.f32 1.442695, %v1875_v7 }
 0x3bd   : > { %4595 = vpow2.f32 %v1879_v6  ;;  %v1748_v6 = vmul.f32 %v5835_v10, %v1737_v1 }
 0x3be   : > { %v1866_v18 = vpop.f32.mrf.mxu0 }
 0x3bf   : > { %v1867_v19 = vadd.f32 %v1866_v18, %v5858_v0 }
 0x3c1   : > { %v1876_v57 = vsub.f32 0.0, %v1867_v19 }
 0x3c3   : > { %v4596_v55 = vpop.eup %4595  ;;  %v1881_v62 = vmul.f32 1.442695, %v1876_v57 }
 0x3c4   : > { %v1887_v5 = vadd.f32 1.0, %v4596_v55 }
 0x3c5   : > { %4597 = vpow2.f32 %v1881_v62  ;;  %v5895_v62 = vsub.f32 %v5868_v39, %v1748_v6 }
 0x3c6   : > { %4599 = vrcp.f32 %v1887_v5 }
 0x3cb   : > { %v4598_v53 = vpop.eup %4597 }
 0x3cc   : > { %v4600_v63 = vpop.eup %4599  ;;  %v1888_v38 = vadd.f32 1.0, %v4598_v53 }
 0x3cd   : > { %v1895_v58 = vmul.f32 %v4600_v63, %v1864_v9 }
 0x3ce   : > { %4601 = vrcp.f32 %v1888_v38 }
 0x3cf   : > { %4259 = vmatmul.msk.f32.vlgmr.msra.gmra.mxu1 %vm1902_vm0, %v1895_v58 }
 0x3d4   : > { %v4602_v44 = vpop.eup %4601 }
 0x3d5   : > { %v1896_v26 = vmul.f32 %v4602_v44, %v1867_v19  ;;  %v1756_v44 = vmul.f32 %v5895_v62, %v5895_v62 }
 0x3d7   : > { %4260 = vmatmul.msk.f32.gmra.mxu1 %vm1902_vm0, %v1896_v26  ;;  %v1766_v41 = vsel %vm1725_vm8, %v1756_v44, 0.0 }
 0x423   : > { %v1765_v11 = vpop.xlane.xlu1 %1764 }
 0x424   : > { %v1771_v12 = vmul.f32 %v1765_v11, %v5835_v10 }
 0x44c   : > { %v1932_v61 = vpop.f32.mrf.mxu1 }
 0x44d   : > { %v1933_v33 = vadd.f32 %v1932_v61, %v5876_v32 }
 0x44f   : > { %v5880_v27 = vadd.f32 %v1933_v33, %v5811_v28  ;;  %v1775_v28 = vadd.f32 1e-05, %v1771_v12 }
 0x451   : > { %v1948_v43 = vsel %vm1725_vm8, %v5880_v27, 0.0  ;;  %4603 = vrsqrt.f32 %v1775_v28  ;;  %vm1803_vm1 = vweird.f32 %v1775_v28 }
 0x452   : > { %1949 = vadd.xlane.f32.xlu2 %v1948_v43 }
 0x454   : > { %v1935_v4 = vpop.f32.mrf.mxu1 }
 0x455   : > { %v1936_v2 = vadd.f32 %v1935_v4, %v5876_v32 }
 0x457   : > { %v5886_v3 = vadd.f32 %v1936_v2, %v5821_v54  ;;  %v4604_v13 = vpop.eup %4603 }
 0x458   : > { %v1798_v16 = vmul.f32 %v4604_v13, %v1775_v28  ;;  %vm1804_vm2 = vweird.f32 %v4604_v13 }
 0x459   : > { %v1951_v14 = vsel %vm1725_vm8, %v5886_v3, 0.0  ;;  %vm1805_vm3 = vmor %vm1803_vm1, %vm1804_vm2 }
 0x45a   : > { %1952 = vadd.xlane.f32.xlu2 %v1951_v14  ;;  %v1799_v9 = vmul.f32 %v4604_v13, %v1798_v16 }
 0x45c   : > { %v1800_v7 = vmul.f32 0.5, %v1799_v9 }
 0x45e   : > { %v1801_v18 = vsub.f32 1.5, %v1800_v7 }
 0x460   : > { %v1802_v57 = vmul.f32 %v4604_v13, %v1801_v18 }
 0x462   : > { %v1806_v5 = vsel %vm1805_vm3, %v4604_v13, %v1802_v57 }
 0x463   : > { %v1819_v63 = vmul.f32 %v1806_v5, %v1751_v31 }
 0x465   : > { %v1824_v26 = vmul.f32 %v5846_v42, %v1819_v63  ;;  %v5916_v63 = vperm.slane %v5615_v15, 0 }
 0x467   : > { %v1829_v40 = vadd.f32 %v5849_v60, %v1824_v26 }
 0x469   : > { %4257 = vmatmul.msk.f32.gmra.mxu0 %vm1725_vm8, %v1829_v40  ;;  %v5919_v40 = vperm.slane %v5615_v15, 1 }
 0x4c5   : > { %v1950_v8 = vpop.xlane.xlu2 %1949 }
 0x4c6   : > { %v1960_v54 = vmul.f32 %v1950_v8, %v5835_v10 }
 0x4c8   : > { %v1964_v19 = vsub.f32 %v5880_v27, %v1960_v54 }
 0x4ca   : > { %v1968_v55 = vmul.f32 %v1964_v19, %v1964_v19 }
 0x4cc   : > { %v1972_v53 = vsel %vm1725_vm8, %v1968_v55, 0.0 }
 0x4cd   : > { %1973 = vadd.xlane.f32.xlu2 %v1972_v53  ;;  %v1953_v38 = vpop.xlane.xlu2 %1952 }
 0x4ce   : > { %v1961_v58 = vmul.f32 %v1953_v38, %v5835_v10 }
 0x4d0   : > { %v5903_v25 = vsub.f32 %v5886_v3, %v1961_v58 }
 0x4d2   : > { %v1969_v59 = vmul.f32 %v5903_v25, %v5903_v25 }
 0x4d4   : > { %v1975_v31 = vsel %vm1725_vm8, %v1969_v59, 0.0 }
 0x4d5   : > { %1976 = vadd.xlane.f32.xlu0 %v1975_v31  ;;  %1767 = vadd.xlane.f32.xlu2 %v1766_v41 }
 0x4e6   : > { %v1869_v16 = vpop.f32.mrf.mxu0 }
 0x4e7   : > { %v1870_v8 = vadd.f32 %v1869_v16, %v5858_v0 }
 0x4e9   : > { %v1877_v54 = vsub.f32 0.0, %v1870_v8 }
 0x4eb   : > { %v1883_v5 = vmul.f32 1.442695, %v1877_v54 }
 0x540   : > { %v1974_v56 = vpop.xlane.xlu2 %1973 }
 0x541   : > { %v1984_v61 = vmul.f32 %v1974_v56, %v5835_v10 }
 0x543   : > { %v1988_v33 = vadd.f32 1e-05, %v1984_v61 }
 0x545   : > { %4605 = vrsqrt.f32 %v1988_v33  ;;  %vm1998_vm5 = vweird.f32 %v1988_v33 }
 0x548   : > { %v1768_v43 = vpop.xlane.xlu2 %1767  ;;  %v1977_v4 = vpop.xlane.xlu0 %1976 }
 0x549   : > { %v1772_v2 = vmul.f32 %v1768_v43, %v5835_v10  ;;  %v1985_v14 = vmul.f32 %v1977_v4, %v5835_v10 }
 0x54b   : > { %v4606_v1 = vpop.eup %4605  ;;  %v1776_v11 = vadd.f32 1e-05, %v1772_v2  ;;  %v1989_v12 = vadd.f32 1e-05, %v1985_v14 }
 0x54c   : > { %v1993_v28 = vmul.f32 %v4606_v1, %v1988_v33  ;;  %vm1999_vm4 = vweird.f32 %v4606_v1 }
 0x54d   : > { %4607 = vrsqrt.f32 %v1776_v11  ;;  %vm2000_vm6 = vmor %vm1998_vm5, %vm1999_vm4  ;;  %vm1813_vm7 = vweird.f32 %v1776_v11  ;;  %vm2008_vm12 = vweird.f32 %v1989_v12 }
 0x54e   : > { %v1994_v13 = vmul.f32 %v4606_v1, %v1993_v28  ;;  %4609 = vrsqrt.f32 %v1989_v12 }
 0x54f   : > { %4611 = vpow2.f32 %v1883_v5 }
 0x550   : > { %v1995_v9 = vmul.f32 0.5, %v1994_v13 }
 0x552   : > { %v1996_v7 = vsub.f32 1.5, %v1995_v9 }
 0x553   : > { %v4608_v6 = vpop.eup %4607 }
 0x554   : > { %v4610_v18 = vpop.eup %4609  ;;  %v1997_v57 = vmul.f32 %v4606_v1, %v1996_v7  ;;  %v1808_v55 = vmul.f32 %v4608_v6, %v1776_v11  ;;  %vm1814_vm9 = vweird.f32 %v4608_v6 }
 0x555   : > { %v2003_v53 = vmul.f32 %v4610_v18, %v1989_v12  ;;  %vm1815_vm10 = vmor %vm1813_vm7, %vm1814_vm9  ;;  %vm2009_vm11 = vweird.f32 %v4610_v18  ;;  %v4612_v43 = vpop.eup %4611  ;;  %vm2503_vm7 = vcmask 195584  }
 0x556   : > { %v2001_v38 = vsel %vm2000_vm6, %v4606_v1, %v1997_v57  ;;  %v1809_v58 = vmul.f32 %v4608_v6, %v1808_v55  ;;  %v1889_v15 = vadd.f32 1.0, %v4612_v43  ;;  %vm2010_vm13 = vmor %vm2008_vm12, %vm2009_vm11 }
 0x557   : > { %v2004_v44 = vmul.f32 %v4610_v18, %v2003_v53  ;;  %v2032_v26 = vmul.f32 %v2001_v38, %v1964_v19 }
 0x558   : > { %v1810_v59 = vmul.f32 0.5, %v1809_v58  ;;  %4613 = vrcp.f32 %v1889_v15 }
 0x559   : > { %v2005_v41 = vmul.f32 0.5, %v2004_v44  ;;  %v2037_v31 = vmul.f32 %v5916_v63, %v2032_v26 }
 0x55a   : > { %v1811_v56 = vsub.f32 1.5, %v1810_v59 }
 0x55b   : > { %v2006_v61 = vsub.f32 1.5, %v2005_v41  ;;  %v2042_v33 = vadd.f32 %v5919_v40, %v2037_v31 }
 0x55c   : > { %v1812_v4 = vmul.f32 %v4608_v6, %v1811_v56 }
 0x55d   : > { %v2007_v2 = vmul.f32 %v4610_v18, %v2006_v61  ;;  %4263 = vmatmul.msk.f32.vlgmr.msra.gmra.mxu2 %vm1725_vm8, %v2042_v33 }
 0x55e   : > { %v1816_v19 = vsel %vm1815_vm10, %v4608_v6, %v1812_v4  ;;  %v4614_v12 = vpop.eup %4613 }
 0x55f   : > { %v2011_v14 = vsel %vm2010_vm13, %v4610_v18, %v2007_v2  ;;  %v1820_v1 = vmul.f32 %v1816_v19, %v5895_v62  ;;  %v1897_v7 = vmul.f32 %v4614_v12, %v1870_v8  ;;  %v5934_v62 = vperm.slane %v5629_v20, 0 }
 0x560   : > { %v2033_v11 = vmul.f32 %v2011_v14, %v5903_v25 }
 0x561   : > { %v1825_v28 = vmul.f32 %v5846_v42, %v1820_v1  ;;  %4261 = vmatmul.msk.f32.gmra.mxu1 %vm1902_vm0, %v1897_v7 }
 0x562   : > { %v2038_v13 = vmul.f32 %v5916_v63, %v2033_v11  ;;  %v5989_v11 = vld [vmem:[%s6801_s28] sm:$0x3] }
 0x563   : > { %v1830_v16 = vadd.f32 %v5849_v60, %v1825_v28  ;;  %v5992_v28 = vperm.slane %v5989_v11, 0 }
 0x564   : > { %v2043_v9 = vadd.f32 %v5919_v40, %v2038_v13 }
 0x565   : > { %4258 = vmatmul.msk.f32.gmra.mxu0 %vm1725_vm8, %v1830_v16 }
 0x566   : > { %4264 = vmatmul.msk.f32.gmra.mxu2 %vm1725_vm8, %v2043_v9 }
 0x5de   : > { %v1938_v38 = vpop.f32.mrf.mxu1 }
 0x5df   : > { %v1939_v58 = vadd.f32 %v1938_v38, %v5876_v32 }
 0x5e0   : > { %v2078_v25 = vpop.f32.mrf.mxu2 }
 0x5e1   : > { %v5937_v42 = vadd.f32 %v2078_v25, %v5934_v62  ;;  %v5960_v44 = vadd.f32 %v1939_v58, %v5861_v17 }
 0x5e2   : > { %v1872_v54 = vpop.f32.mrf.mxu0 }
 0x5e3   : > { %v1873_v60 = vadd.f32 %v1872_v54, %v5858_v0  ;;  %2093 = vrot.lane.b32.xlu1 %v5937_v42, %s5155_s14  ;;  %v1954_v26 = vsel %vm1725_vm8, %v5960_v44, 0.0 }
 0x5e5   : > { %v1878_v6 = vsub.f32 0.0, %v1873_v60 }
 0x5e7   : > { %v1885_v18 = vmul.f32 1.442695, %v1878_v6 }
 0x5e9   : > { %4615 = vpow2.f32 %v1885_v18  ;;  %v2081_v8 = vpop.f32.mrf.mxu2 }
 0x5ea   : > { %v5943_v57 = vadd.f32 %v2081_v8, %v5934_v62 }
 0x5ec   : > { %2095 = vrot.lane.b32.xlu0 %v5943_v57, %s5155_s14  ;;  %v5949_v0 = vpack.i.bf16 %v5937_v42, %v5943_v57 }
 0x5ef   : > { %v4616_v20 = vpop.eup %4615 }
 0x5f0   : > { %v1890_v55 = vadd.f32 1.0, %v4616_v20 }
 0x5f2   : > { %4617 = vrcp.f32 %v1890_v55 }
 0x5f4   : > { %4550 = vrot.lane.b32.xlu0 %v5949_v0, %s5156_s24 }
 0x5f8   : > { %v4618_v5 = vpop.eup %4617 }
 0x5f9   : > { %v1898_v53 = vmul.f32 %v4618_v5, %v1873_v60 }
 0x5fb   : > { %4262 = vmatmul.msk.f32.gmra.mxu1 %vm1902_vm0, %v1898_v53 }
 0x5fc   : > { %2289 = vrot.lane.b32.xlu0 %v5943_v57, %s5157_s6 }
 0x604   : > { %2287 = vrot.lane.b32.xlu0 %v5937_v42, %s5157_s6 }
 0x60c   : > { %2285 = vrot.lane.b32.xlu0 %v5943_v57, %s5158_s10 }
 0x60d   : > { %1955 = vadd.xlane.f32.xlu1 %v1954_v26 }
 0x626   : > { %2193 = vrot.lane.b32.xlu1 %v5943_v57, %s5159_s11 }
 0x62e   : > { %2187 = vrot.lane.b32.xlu1 %v5937_v42, %s5160_s23 }
 0x636   : > { %2385 = vrot.lane.b32.xlu1 %v5943_v57, %s5161_s20 }
 0x63e   : > { %2383 = vrot.lane.b32.xlu1 %v5937_v42, %s5161_s20 }
 0x655   : > { %v2094_v59 = vpop.permute.xlu1 %2093 }
 0x65e   : > { %v2096_v17 = vpop.permute.xlu0 %2095 }
 0x65f   : > { %4267 = vmatpush.xpose.msk.msrb.mxu1 %vm2097_vm14, %v2096_v17 }
 0x663   : > { %4268 = vmatpush.xpose.msk.msrb.mxu1 %vm2097_vm14, %v2094_v59 }
 0x666   : > { %4269 = vmatmul.msk.f32.vlgmr.msrb.gmra.mxu1 %vm2097_vm14, %v5937_v42  ;;  %v4551_v41 = vpop.permute.xlu0 %4550 }
 0x667   : > { %v4552_v31 = vunpack.i.l.bf16 %v4551_v41  ;;  %v4553_v56 = vunpack.i.h.bf16 %v4551_v41 }
 0x669   : > { %2178 = vmatpush.msra.mxu3 %v4552_v31 }
 0x66b   : > { %2179 = vmatpush.msra.mxu3 %v4553_v56 }
 0x66e   : > { %4270 = vmatmul.msk.f32.gmra.mxu1 %vm2097_vm14, %v5943_v57  ;;  %v2290_v61 = vpop.permute.xlu0 %2289 }
 0x66f   : > { %4279 = vmatpush.xpose.msk.msrb.mxu3 %vm2097_vm14, %v2290_v61 }
 0x676   : > { %v2288_v33 = vpop.permute.xlu0 %2287 }
 0x677   : > { %4280 = vmatpush.xpose.msk.msrb.mxu3 %vm2097_vm14, %v2288_v33 }
 0x678   : > { %v1941_v1 = vpop.f32.mrf.mxu1 }
 0x679   : > { %v1942_v25 = vadd.f32 %v1941_v1, %v5876_v32 }
 0x67b   : > { %v6000_v60 = vadd.f32 %v1942_v25, %v5868_v39 }
 0x67d   : > { %v1957_v18 = vsel %vm1725_vm8, %v6000_v60, 0.0 }
 0x67e   : > { %v6002_v6 = vpop.permute.xlu0 %2285 }
 0x680   : > { %v1956_v43 = vpop.xlane.xlu1 %1955 }
 0x681   : > { %v1962_v4 = vmul.f32 %v1956_v43, %v5835_v10 }
 0x683   : > { %v1966_v2 = vsub.f32 %v5960_v44, %v1962_v4 }
 0x685   : > { %v1970_v15 = vmul.f32 %v1966_v2, %v1966_v2 }
 0x687   : > { %v1978_v19 = vsel %vm1725_vm8, %v1970_v15, 0.0 }
 0x688   : > { %1979 = vadd.xlane.f32.xlu0 %v1978_v19 }
 0x698   : > { %v2194_v14 = vpop.permute.xlu1 %2193 }
 0x699   : > { %4273 = vmatpush.xpose.msk.msrb.mxu0 %vm2097_vm14, %v2194_v14 }
 0x69c   : > { %2191 = vrot.lane.b32.xlu0 %v5937_v42, %s5159_s11 }
 0x6a0   : > { %v2188_v5 = vpop.permute.xlu1 %2187 }
 0x6a8   : > { %v2386_v38 = vpop.permute.xlu1 %2385 }
 0x6b0   : > { %v2384_v56 = vpop.permute.xlu1 %2383 }
 0x6e3   : > { %v2123_v13 = vpop.f32.mrf.mxu1 }
 0x6e4   : > { %v2124_v16 = vadd.f32 %v2123_v13, %v5992_v28 }
 0x6e6   : > { %v2130_v9 = vsel %vm2129_vm15, %v2124_v16, -inf }
 0x6e7   : > { %2131 = vmax.xlane.f32.xlu2 %v2130_v9 }
 0x6eb   : > { %v2126_v12 = vpop.f32.mrf.mxu1 }
 0x6ec   : > { %v2127_v7 = vadd.f32 %v2126_v12, %v5992_v28 }
 0x6ee   : > { %v2133_v54 = vsel %vm2129_vm15, %v2127_v7, -inf }
 0x6ef   : > { %2134 = vmax.xlane.f32.xlu2 %v2133_v54 }
 0x6f7   : > { %1958 = vadd.xlane.f32.xlu2 %v1957_v18 }
 0x6fb   : > { %v1980_v8 = vpop.xlane.xlu0 %1979 }
 0x6fc   : > { %v1986_v20 = vmul.f32 %v1980_v8, %v5835_v10 }
 0x6fe   : > { %v1990_v55 = vadd.f32 1e-05, %v1986_v20 }
 0x700   : > { %4619 = vrsqrt.f32 %v1990_v55  ;;  %vm2018_vm2 = vweird.f32 %v1990_v55 }
 0x706   : > { %v4620_v53 = vpop.eup %4619 }
 0x707   : > { %v2013_v32 = vmul.f32 %v4620_v53, %v1990_v55  ;;  %vm2019_vm1 = vweird.f32 %v4620_v53 }
 0x708   : > { %vm2020_vm3 = vmor %vm2018_vm2, %vm2019_vm1 }
 0x709   : > { %v2014_v58 = vmul.f32 %v4620_v53, %v2013_v32 }
 0x70b   : > { %v2015_v26 = vmul.f32 0.5, %v2014_v58 }
 0x70d   : > { %v2016_v17 = vsub.f32 1.5, %v2015_v26 }
 0x70e   : > { %v2192_v39 = vpop.permute.xlu0 %2191 }
 0x70f   : > { %v2017_v59 = vmul.f32 %v4620_v53, %v2016_v17  ;;  %4274 = vmatpush.xpose.msk.msrb.mxu0 %vm2097_vm14, %v2192_v39 }
 0x711   : > { %v2021_v41 = vsel %vm2020_vm3, %v4620_v53, %v2017_v59 }
 0x712   : > { %4275 = vmatmul.msk.f32.vlgmr.msrb.gmra.mxu0 %vm2097_vm14, %v2188_v5  ;;  %v2034_v31 = vmul.f32 %v2021_v41, %v1966_v2 }
 0x713   : > { %4285 = vmatpush.xpose.msk.msra.mxu0 %vm2097_vm14, %v2386_v38 }
 0x714   : > { %v2039_v61 = vmul.f32 %v5916_v63, %v2034_v31 }
 0x716   : > { %v2044_v33 = vadd.f32 %v5919_v40, %v2039_v61 }
 0x717   : > { %4286 = vmatpush.xpose.msk.msra.mxu0 %vm2097_vm14, %v2384_v56 }
 0x718   : > { %4265 = vmatmul.msk.f32.gmra.mxu2 %vm1725_vm8, %v2044_v33 }
 0x75a   : > { %v2132_v43 = vpop.xlane.xlu2 %2131 }
 0x75b   : > { %v2136_v4 = vsub.f32 %v2124_v16, %v2132_v43 }
 0x75d   : > { %v2138_v15 = vmul.f32 1.442695, %v2136_v4 }
 0x75f   : > { %4621 = vpow2.f32 %v2138_v15 }
 0x762   : > { %v2135_v19 = vpop.xlane.xlu2 %2134 }
 0x763   : > { %v2137_v14 = vsub.f32 %v2127_v7, %v2135_v19 }
 0x765   : > { %v4622_v1 = vpop.eup %4621  ;;  %v2140_v13 = vmul.f32 1.442695, %v2137_v14 }
 0x766   : > { %v2142_v9 = vsel %vm2129_vm15, %v4622_v1, 0.0 }
 0x767   : > { %4623 = vpow2.f32 %v2140_v13  ;;  %2143 = vadd.xlane.f32.xlu2 %v2142_v9 }
 0x76a   : > { %v1959_v25 = vpop.xlane.xlu2 %1958 }
 0x76b   : > { %v1963_v16 = vmul.f32 %v1959_v25, %v5835_v10 }
 0x76d   : > { %v4624_v2 = vpop.eup %4623  ;;  %v1967_v54 = vsub.f32 %v6000_v60, %v1963_v16 }
 0x76e   : > { %v2145_v12 = vsel %vm2129_vm15, %v4624_v2, 0.0 }
 0x76f   : > { %2146 = vadd.xlane.f32.xlu2 %v2145_v12  ;;  %v1971_v18 = vmul.f32 %v1967_v54, %v1967_v54 }
 0x771   : > { %v1981_v7 = vsel %vm1725_vm8, %v1971_v18, 0.0 }
 0x787   : > { %2283 = vrot.lane.b32.xlu2 %v5937_v42, %s5158_s10 }
 0x7b0   : > { %1982 = vadd.xlane.f32.xlu2 %v1981_v7 }
 0x7c8   : > { %2189 = vrot.lane.b32.xlu2 %v5943_v57, %s5160_s23 }
 0x7d0   : > { %4555 = vrot.lane.b32.xlu2 %v5949_v0, %s5162_s1 }
 0x7da   : > { %v2144_v8 = vpop.xlane.xlu2 %2143 }
 0x7db   : > { %4625 = vrcp.f32 %v2144_v8 }
 0x7e1   : > { %v4626_v20 = vpop.eup %4625 }
 0x7e2   : > { %v2147_v55 = vpop.xlane.xlu2 %2146  ;;  %v2150_v5 = vmul.f32 %v4626_v20, %v4622_v1  ;;  %v2220_v20 = vpop.f32.mrf.mxu0 }
 0x7e3   : > { %4627 = vrcp.f32 %v2147_v55 }
 0x7e4   : > { %4271 = vmatmul.msk.f32.vlgmr.msra.gmra.mxu3 %vm2129_vm15, %v2150_v5 }
 0x7e9   : > { %v4628_v53 = vpop.eup %4627 }
 0x7ea   : > { %v2151_v32 = vmul.f32 %v4628_v53, %v4624_v2  ;;  %v2284_v38 = vpop.permute.xlu2 %2283 }
 0x7ec   : > { %4272 = vmatmul.msk.f32.gmra.mxu3 %vm2129_vm15, %v2151_v32 }
 0x7f4   : > { %4281 = vmatmul.msk.f32.vlgmr.msrb.gmra.mxu3 %vm2097_vm14, %v2284_v38 }
 0x7fc   : > { %4282 = vmatmul.msk.f32.gmra.mxu3 %vm2097_vm14, %v6002_v6 }
 0x823   : > { %v1983_v58 = vpop.xlane.xlu2 %1982 }
 0x824   : > { %v1987_v26 = vmul.f32 %v1983_v58, %v5835_v10 }
 0x826   : > { %v1991_v17 = vadd.f32 1e-05, %v1987_v26 }
 0x828   : > { %4629 = vrsqrt.f32 %v1991_v17  ;;  %vm2028_vm5 = vweird.f32 %v1991_v17 }
 0x82b   : > { %v2190_v39 = vpop.permute.xlu2 %2189 }
 0x82c   : > { %4276 = vmatmul.msk.f32.gmra.mxu0 %vm2097_vm14, %v2190_v39 }
 0x82e   : > { %v4630_v59 = vpop.eup %4629 }
 0x82f   : > { %v2023_v41 = vmul.f32 %v4630_v59, %v1991_v17  ;;  %vm2029_vm4 = vweird.f32 %v4630_v59 }
 0x830   : > { %vm2030_vm6 = vmor %vm2028_vm5, %vm2029_vm4 }
 0x831   : > { %v2024_v31 = vmul.f32 %v4630_v59, %v2023_v41 }
 0x833   : > { %v2025_v56 = vmul.f32 0.5, %v2024_v31  ;;  %v4556_v61 = vpop.permute.xlu2 %4555 }
 0x834   : > { %v4557_v33 = vunpack.i.l.bf16 %v4556_v61  ;;  %v4558_v4 = vunpack.i.h.bf16 %v4556_v61 }
 0x835   : > { %v2026_v43 = vsub.f32 1.5, %v2025_v56  ;;  %v6096_v56 = vadd.f32 %v2220_v20, %v5992_v28 }
 0x836   : > { %2370 = vmatpush.msra.mxu1 %v4557_v33  ;;  %4379 = vmatpush.msra.mxu3 %v4557_v33 }
 0x837   : > { %v2027_v6 = vmul.f32 %v4630_v59, %v2026_v43  ;;  %v2226_v33 = vsel %vm2129_vm15, %v6096_v56, -inf }
 0x838   : > { %2371 = vmatpush.msra.mxu1 %v4558_v4  ;;  %4380 = vmatpush.msra.mxu3 %v4558_v4 }
 0x839   : > { %v2031_v15 = vsel %vm2030_vm6, %v4630_v59, %v2027_v6 }
 0x83a   : > { %v2035_v19 = vmul.f32 %v2031_v15, %v1967_v54 }
 0x83c   : > { %v2040_v14 = vmul.f32 %v5916_v63, %v2035_v19  ;;  %v2084_v63 = vpop.f32.mrf.mxu2 }
 0x83d   : > { %v6055_v18 = vadd.f32 %v2084_v63, %v5934_v62 }
 0x83e   : > { %v2045_v1 = vadd.f32 %v5919_v40, %v2040_v14 }
 0x840   : > { %4266 = vmatmul.msk.f32.gmra.mxu2 %vm1725_vm8, %v2045_v1 }
 0x867   : > { %v6035_v13 = vpop.f32.mrf.mxu3 }
 0x86f   : > { %v6037_v9 = vpop.f32.mrf.mxu3 }
 0x877   : > { %v2316_v2 = vpop.f32.mrf.mxu3 }
 0x878   : > { %v6088_v58 = vadd.f32 %v2316_v2, %v5992_v28 }
 0x87a   : > { %v2322_v26 = vsel %vm2129_vm15, %v6088_v58, -inf }
 0x87f   : > { %v2319_v12 = vpop.f32.mrf.mxu3 }
 0x880   : > { %v2320_v25 = vadd.f32 %v2319_v12, %v5992_v28 }
 0x882   : > { %v2325_v16 = vsel %vm2129_vm15, %v2320_v25, -inf }
 0x883   : > { %2326 = vmax.xlane.f32.xlu1 %v2325_v16 }
 0x89c   : > { %2379 = vrot.lane.b32.xlu1 %v5937_v42, %s5163_s9 }
 0x8a4   : > { %2381 = vrot.lane.b32.xlu1 %v5943_v57, %s5163_s9 }
 0x8a9   : > { %v2223_v5 = vpop.f32.mrf.mxu0 }
 0x8aa   : > { %v6080_v53 = vadd.f32 %v2223_v5, %v5992_v28 }
 0x8ac   : > { %v2229_v38 = vsel %vm2129_vm15, %v6080_v53, -inf }
 0x8c3   : > { %v2087_v40 = vpop.f32.mrf.mxu2 }
 0x8c4   : > { %v6046_v54 = vadd.f32 %v2087_v40, %v5934_v62 }
 0x8c6   : > { %2603 = vrot.lane.b32.xlu0 %v6046_v54, %s5160_s23  ;;  %2607 = vrot.lane.b32.xlu1 %v6046_v54, %s5159_s11 }
 0x8c7   : > { %2511 = vrot.lane.b32.xlu2 %v6046_v54, %s5155_s14 }
 0x8ce   : > { %2605 = vrot.lane.b32.xlu1 %v6055_v18, %s5159_s11 }
 0x8cf   : > { %2509 = vrot.lane.b32.xlu2 %v6055_v18, %s5155_s14 }
 0x8d6   : > { %2703 = vrot.lane.b32.xlu1 %v6046_v54, %s5157_s6 }
 0x8d7   : > { %2601 = vrot.lane.b32.xlu2 %v6055_v18, %s5160_s23 }
 0x8de   : > { %2701 = vrot.lane.b32.xlu1 %v6055_v18, %s5157_s6 }
 0x8df   : > { %2799 = vrot.lane.b32.xlu2 %v6046_v54, %s5161_s20 }
 0x8e6   : > { %2697 = vrot.lane.b32.xlu1 %v6055_v18, %s5158_s10 }
 0x8e7   : > { %2797 = vrot.lane.b32.xlu2 %v6055_v18, %s5161_s20 }
 0x8ee   : > { %2795 = vrot.lane.b32.xlu1 %v6046_v54, %s5163_s9 }
 0x8ef   : > { %2699 = vrot.lane.b32.xlu2 %v6046_v54, %s5158_s10 }
 0x8f6   : > { %v2327_v62 = vpop.xlane.xlu1 %2326 }
 0x8f7   : > { %v2329_v42 = vsub.f32 %v2320_v25, %v2327_v62 }
 0x8f9   : > { %v2332_v57 = vmul.f32 1.442695, %v2329_v42 }
 0x8fb   : > { %4631 = vpow2.f32 %v2332_v57 }
 0x901   : > { %v4632_v7 = vpop.eup %4631 }
 0x902   : > { %v2337_v8 = vsel %vm2129_vm15, %v4632_v7, 0.0 }
 0x903   : > { %2338 = vadd.xlane.f32.xlu0 %v2337_v8 }
 0x90e   : > { %v2380_v55 = vpop.permute.xlu1 %2379 }
 0x90f   : > { %4287 = vmatmul.msk.f32.vlgmr.msra.gmra.mxu0 %vm2097_vm14, %v2380_v55 }
 0x916   : > { %v2382_v32 = vpop.permute.xlu1 %2381 }
 0x917   : > { %2793 = vrot.lane.b32.xlu0 %v6055_v18, %s5163_s9  ;;  %4288 = vmatmul.msk.f32.gmra.mxu0 %vm2097_vm14, %v2382_v32 }
 0x918   : > { %2230 = vmax.xlane.f32.xlu2 %v2229_v38 }
 0x920   : > { %2323 = vmax.xlane.f32.xlu2 %v2322_v26 }
 0x921   : > { %v2512_v17 = vpop.permute.xlu2 %2511 }
 0x922   : > { %4291 = vmatpush.xpose.msk.msrb.mxu3 %vm2097_vm14, %v2512_v17 }
 0x929   : > { %v2510_v39 = vpop.permute.xlu2 %2509 }
 0x92a   : > { %4292 = vmatpush.xpose.msk.msrb.mxu3 %vm2097_vm14, %v2510_v39 }
 0x931   : > { %v2602_v59 = vpop.permute.xlu2 %2601 }
 0x938   : > { %v2608_v41 = vpop.permute.xlu1 %2607  ;;  %v2604_v4 = vpop.permute.xlu0 %2603 }
 0x939   : > { %4297 = vmatpush.xpose.msk.msrb.mxu0 %vm2097_vm14, %v2608_v41  ;;  %v2800_v31 = vpop.permute.xlu2 %2799 }
 0x940   : > { %v2606_v61 = vpop.permute.xlu1 %2605 }
 0x941   : > { %2227 = vmax.xlane.f32.xlu0 %v2226_v33  ;;  %4298 = vmatpush.xpose.msk.msrb.mxu0 %vm2097_vm14, %v2606_v61  ;;  %v2798_v43 = vpop.permute.xlu2 %2797 }
 0x944   : > { %4299 = vmatmul.msk.f32.vlgmr.msrb.gmra.mxu0 %vm2097_vm14, %v2602_v59 }
 0x945   : > { %4309 = vmatpush.xpose.msk.msra.mxu0 %vm2097_vm14, %v2800_v31 }
 0x948   : > { %v2704_v6 = vpop.permute.xlu1 %2703 }
 0x949   : > { %4310 = vmatpush.xpose.msk.msra.mxu0 %vm2097_vm14, %v2798_v43 }
 0x94c   : > { %4300 = vmatmul.msk.f32.gmra.mxu0 %vm2097_vm14, %v2604_v4 }
 0x94d   : > { %3423 = vmatpush.msrb.mxu0 %v5679_v37 }
 0x94f   : > { %3424 = vmatpush.msrb.mxu0 %v5677_v36 }
 0x950   : > { %v2702_v14 = vpop.permute.xlu1 %2701 }
 0x951   : > { %3425 = vmatpush.msrb.mxu0 %v5672_v35 }
 0x953   : > { %3426 = vmatpush.msrb.mxu0 %v5670_v34 }
 0x958   : > { %v2698_v36 = vpop.permute.xlu1 %2697 }
 0x960   : > { %v2796_v12 = vpop.permute.xlu1 %2795 }
 0x976   : > { %v2339_v15 = vpop.xlane.xlu0 %2338 }
 0x977   : > { %4633 = vrcp.f32 %v2339_v15  ;;  %v6185_v15 = vpack.i.bf16 %v6055_v18, %v6046_v54 }
 0x97d   : > { %v4634_v19 = vpop.eup %4633 }
 0x97e   : > { %v2343_v1 = vmul.f32 %v4634_v19, %v4632_v7 }
 0x980   : > { %4284 = vmatmul.msk.f32.vlgmr.msra.gmra.mxu3 %vm2129_vm15, %v2343_v1 }
 0x981   : > { %4303 = vmatpush.xpose.msk.msra.mxu3 %vm2097_vm14, %v2704_v6 }
 0x985   : > { %4304 = vmatpush.xpose.msk.msra.mxu3 %vm2097_vm14, %v2702_v14 }
 0x988   : > { %4293 = vmatmul.msk.f32.vlgmr.msrb.gmra.mxu3 %vm2097_vm14, %v6055_v18 }
 0x989   : > { %v2794_v35 = vpop.permute.xlu0 %2793  ;;  %2946 = vmatpush.msrb.mxu3 %v5640_v24 }
 0x98a   : > { %4311 = vmatmul.msk.f32.vlgmr.msra.gmra.mxu0 %vm2097_vm14, %v2794_v35 }
 0x98b   : > { %2947 = vmatpush.msrb.mxu3 %v5636_v23 }
 0x98c   : > { %v2412_v34 = vpop.f32.mrf.mxu0 }
 0x98d   : > { %v2413_v37 = vadd.f32 %v2412_v34, %v5992_v28  ;;  %2948 = vmatpush.msrb.mxu3 %v5634_v22 }
 0x98f   : > { %v2418_v2 = vsel %vm2129_vm15, %v2413_v37, -inf  ;;  %2949 = vmatpush.msrb.mxu3 %v5632_v21  ;;  %v2700_v21 = vpop.permute.xlu2 %2699 }
 0x990   : > { %2419 = vmax.xlane.f32.xlu1 %v2418_v2  ;;  %4294 = vmatmul.msk.f32.gmra.mxu3 %vm2097_vm14, %v6046_v54 }
 0x992   : > { %4312 = vmatmul.msk.f32.gmra.mxu0 %vm2097_vm14, %v2796_v12 }
 0x994   : > { %v2415_v24 = vpop.f32.mrf.mxu0 }
 0x995   : > { %v2416_v25 = vadd.f32 %v2415_v24, %v5992_v28 }
 0x997   : > { %v2421_v23 = vsel %vm2129_vm15, %v2416_v25, -inf  ;;  %v2231_v22 = vpop.xlane.xlu2 %2230 }
 0x998   : > { %2422 = vmax.xlane.f32.xlu0 %v2421_v23  ;;  %4305 = vmatmul.msk.f32.vlgmr.msra.gmra.mxu3 %vm2097_vm14, %v2698_v36 }
 0x999   : > { %3633 = vmatpush.msra.mxu3 %v5719_v52  ;;  %v2233_v52 = vsub.f32 %v6080_v53, %v2231_v22 }
 0x99b   : > { %3634 = vmatpush.msra.mxu3 %v5717_v51  ;;  %v6138_v51 = vperm.slane %v5989_v11, 1 }
 0x99d   : > { %3635 = vmatpush.msra.mxu3 %v5715_v50  ;;  %v2236_v50 = vmul.f32 1.442695, %v2233_v52 }
 0x99f   : > { %3636 = vmatpush.msra.mxu3 %v5713_v49  ;;  %4635 = vpow2.f32 %v2236_v50  ;;  %v2324_v7 = vpop.xlane.xlu2 %2323 }
 0x9a0   : > { %4306 = vmatmul.msk.f32.gmra.mxu3 %vm2097_vm14, %v2700_v21  ;;  %v2328_v20 = vsub.f32 %v6088_v58, %v2324_v7 }
 0x9a1   : > { %3637 = vmatpush.msra.mxu3 %v5711_v48 }
 0x9a2   : > { %v2330_v32 = vmul.f32 1.442695, %v2328_v20 }
 0x9a3   : > { %3638 = vmatpush.msra.mxu3 %v5709_v47 }
 0x9a5   : > { %3639 = vmatpush.msra.mxu3 %v5707_v46  ;;  %v6143_v63 = vpop.eup %4635 }
 0x9a6   : > { %v2241_v62 = vsel %vm2129_vm15, %v6143_v63, 0.0 }
 0x9a7   : > { %3640 = vmatpush.msra.mxu3 %v5705_v45 }
 0x9b4   : > { %v2228_v28 = vpop.xlane.xlu0 %2227 }
 0x9b5   : > { %v2232_v48 = vsub.f32 %v6096_v56, %v2228_v28 }
 0x9b7   : > { %v2234_v46 = vmul.f32 1.442695, %v2232_v48 }
 0x9b9   : > { %4637 = vpow2.f32 %v2234_v46 }
 0x9bf   : > { %v6152_v42 = vpop.eup %4637 }
 0x9c0   : > { %v2238_v57 = vsel %vm2129_vm15, %v6152_v42, 0.0 }
 0x9c1   : > { %v2634_v16 = vpop.f32.mrf.mxu0 }
 0x9c2   : > { %v2635_v49 = vadd.f32 %v2634_v16, %v6138_v51 }
 0x9c4   : > { %v2640_v47 = vsel %vm2129_vm15, %v2635_v49, -inf }
 0x9c5   : > { %2641 = vmax.xlane.f32.xlu1 %v2640_v47 }
 0x9c9   : > { %v2637_v45 = vpop.f32.mrf.mxu0 }
 0x9ca   : > { %v6146_v40 = vadd.f32 %v2637_v45, %v6138_v51 }
 0x9cc   : > { %v2643_v11 = vsel %vm2129_vm15, %v6146_v40, -inf }
 0x9cd   : > { %2644 = vmax.xlane.f32.xlu2 %v2643_v11  ;;  %2242 = vadd.xlane.f32.xlu1 %v2241_v62 }
 0x9d5   : > { %2239 = vadd.xlane.f32.xlu2 %v2238_v57 }
 0x9ed   : > { %4560 = vrot.lane.b32.xlu2 %v5949_v0, %s5164_s19 }
 0xa03   : > { %v2420_v8 = vpop.xlane.xlu1 %2419  ;;  %v6189_v19 = vpop.f32.mrf.mxu3 }
 0xa04   : > { %v2424_v55 = vsub.f32 %v2413_v37, %v2420_v8 }
 0xa06   : > { %v2426_v5 = vmul.f32 1.442695, %v2424_v55 }
 0xa07   : > { %v2826_v53 = vpop.f32.mrf.mxu0 }
 0xa08   : > { %4639 = vpow2.f32 %v2426_v5  ;;  %v6160_v38 = vadd.f32 %v2826_v53, %v6138_v51 }
 0xa09   : > { %4641 = vpow2.f32 %v2330_v32 }
 0xa0a   : > { %v2832_v26 = vsel %vm2129_vm15, %v6160_v38, -inf }
 0xa0b   : > { %v2423_v17 = vpop.xlane.xlu0 %2422  ;;  %2833 = vmax.xlane.f32.xlu0 %v2832_v26  ;;  %v2538_v1 = vpop.f32.mrf.mxu3 }
 0xa0c   : > { %v2425_v39 = vsub.f32 %v2416_v25, %v2423_v17  ;;  %v6199_v12 = vadd.f32 %v2538_v1, %v6138_v51 }
 0xa0e   : > { %v6164_v59 = vpop.eup %4639  ;;  %v2428_v41 = vmul.f32 1.442695, %v2425_v39  ;;  %v2544_v52 = vsel %vm2129_vm15, %v6199_v12, -inf }
 0xa0f   : > { %v2829_v31 = vpop.f32.mrf.mxu0  ;;  %v2430_v58 = vsel %vm2129_vm15, %v6164_v59, 0.0  ;;  %v6171_v61 = vpop.eup %4641 }
 0xa10   : > { %4643 = vpow2.f32 %v2428_v41  ;;  %v6169_v56 = vadd.f32 %v2829_v31, %v6138_v51  ;;  %2431 = vadd.xlane.f32.xlu1 %v2430_v58  ;;  %v2334_v43 = vsel %vm2129_vm15, %v6171_v61, 0.0 }
 0xa12   : > { %v2835_v33 = vsel %vm2129_vm15, %v6169_v56, -inf }
 0xa13   : > { %2836 = vmax.xlane.f32.xlu0 %v2835_v33  ;;  %v2541_v2 = vpop.f32.mrf.mxu3 }
 0xa14   : > { %v6196_v54 = vadd.f32 %v2541_v2, %v6138_v51 }
 0xa16   : > { %v6177_v4 = vpop.eup %4643  ;;  %2335 = vadd.xlane.f32.xlu2 %v2334_v43  ;;  %v2547_v24 = vsel %vm2129_vm15, %v6196_v54, -inf }
 0xa17   : > { %v2433_v6 = vsel %vm2129_vm15, %v6177_v4, 0.0 }
 0xa18   : > { %2434 = vadd.xlane.f32.xlu1 %v2433_v6 }
 0xa1b   : > { %v2730_v25 = vpop.f32.mrf.mxu3 }
 0xa1c   : > { %v6204_v23 = vadd.f32 %v2730_v25, %v6138_v51 }
 0xa23   : > { %v2733_v20 = vpop.f32.mrf.mxu3 }
 0xa24   : > { %v6223_v5 = vadd.f32 %v2733_v20, %v6138_v51 }
 0xa26   : > { %v2739_v41 = vsel %vm2129_vm15, %v6223_v5, -inf }
 0xa27   : > { %4565 = vrot.lane.b32.xlu0 %v5949_v0, %s5165_s8 }
 0xa2e   : > { %4575 = vrot.lane.b32.xlu2 %v6185_v15, %s5156_s24 }
 0xa38   : > { %v2642_v14 = vpop.xlane.xlu1 %2641 }
 0xa39   : > { %v2646_v36 = vsub.f32 %v2635_v49, %v2642_v14  ;;  %v2736_v49 = vsel %vm2129_vm15, %v6204_v23, -inf }
 0xa3b   : > { %v2648_v35 = vmul.f32 1.442695, %v2646_v36 }
 0xa3d   : > { %4645 = vpow2.f32 %v2648_v35 }
 0xa40   : > { %v2645_v34 = vpop.xlane.xlu2 %2644  ;;  %v2243_v21 = vpop.xlane.xlu1 %2242 }
 0xa41   : > { %v2647_v57 = vsub.f32 %v6146_v40, %v2645_v34 }
 0xa43   : > { %v6191_v37 = vpop.eup %4645  ;;  %v2650_v8 = vmul.f32 1.442695, %v2647_v57 }
 0xa44   : > { %v2652_v0 = vsel %vm2129_vm15, %v6191_v37, 0.0 }
 0xa45   : > { %2653 = vadd.xlane.f32.xlu1 %v2652_v0 }
 0xa48   : > { %v2240_v18 = vpop.xlane.xlu2 %2239 }
 0xa49   : > { %4647 = vrcp.f32 %v2240_v18 }
 0xa4a   : > { %4649 = vrcp.f32 %v2243_v21 }
 0xa4d   : > { %2548 = vmax.xlane.f32.xlu1 %v2547_v24 }
 0xa4f   : > { %v4648_v50 = vpop.eup %4647 }
 0xa50   : > { %v4561_v22 = vpop.permute.xlu2 %4560  ;;  %v2246_v48 = vmul.f32 %v4648_v50, %v6152_v42  ;;  %v4650_v47 = vpop.eup %4649 }
 0xa51   : > { %2545 = vmax.xlane.f32.xlu0 %v2544_v52  ;;  %v4562_v28 = vunpack.i.l.bf16 %v4561_v22  ;;  %v4563_v16 = vunpack.i.h.bf16 %v4561_v22  ;;  %v2247_v46 = vmul.f32 %v4650_v47, %v6143_v63 }
 0xa53   : > { %2274 = vmatpush.msrb.mxu2 %v4562_v28 }
 0xa55   : > { %2275 = vmatpush.msrb.mxu2 %v4563_v16  ;;  %2737 = vmax.xlane.f32.xlu1 %v2736_v49 }
 0xa56   : > { %4277 = vmatmul.msk.f32.vlgmr.msrb.gmra.mxu2 %vm2129_vm15, %v2246_v48 }
 0xa5e   : > { %4278 = vmatmul.msk.f32.gmra.mxu2 %vm2129_vm15, %v2247_v46 }
 0xa6e   : > { %4570 = vrot.lane.b32.xlu1 %v6185_v15, %s5164_s19 }
 0xa7e   : > { %v2834_v45 = vpop.xlane.xlu0 %2833 }
 0xa7f   : > { %v2838_v11 = vsub.f32 %v6160_v38, %v2834_v45 }
 0xa81   : > { %v2840_v62 = vmul.f32 1.442695, %v2838_v11 }
 0xa83   : > { %4651 = vpow2.f32 %v2840_v62  ;;  %v2432_v32 = vpop.xlane.xlu1 %2431 }
 0xa86   : > { %v2837_v55 = vpop.xlane.xlu0 %2836 }
 0xa87   : > { %v2839_v53 = vsub.f32 %v6169_v56, %v2837_v55 }
 0xa89   : > { %v6218_v42 = vpop.eup %4651  ;;  %v2336_v7 = vpop.xlane.xlu2 %2335  ;;  %v2842_v17 = vmul.f32 1.442695, %v2839_v53 }
 0xa8a   : > { %4653 = vrcp.f32 %v2336_v7  ;;  %v2844_v63 = vsel %vm2129_vm15, %v6218_v42, 0.0 }
 0xa8b   : > { %2845 = vadd.xlane.f32.xlu0 %v2844_v63  ;;  %4655 = vpow2.f32 %v2650_v8  ;;  %v2435_v56 = vpop.xlane.xlu1 %2434 }
 0xa8c   : > { %4657 = vrcp.f32 %v2432_v32 }
 0xa8d   : > { %4659 = vpow2.f32 %v2842_v17 }
 0xa8e   : > { %4661 = vrcp.f32 %v2435_v56 }
 0xa90   : > { %v4654_v38 = vpop.eup %4653 }
 0xa91   : > { %v2342_v40 = vmul.f32 %v4654_v38, %v6171_v61  ;;  %v4576_v26 = vpop.permute.xlu2 %4575  ;;  %v6230_v31 = vpop.eup %4655 }
 0xa92   : > { %v4577_v39 = vunpack.i.l.bf16 %v4576_v26  ;;  %v4578_v51 = vunpack.i.h.bf16 %v4576_v26  ;;  %v2655_v58 = vsel %vm2129_vm15, %v6230_v31, 0.0  ;;  %v4658_v33 = vpop.eup %4657 }
 0xa93   : > { %2740 = vmax.xlane.f32.xlu0 %v2739_v41  ;;  %4283 = vmatmul.msk.f32.vlgmr.msra.gmra.mxu1 %vm2129_vm15, %v2342_v40  ;;  %v6234_v6 = vpop.eup %4659  ;;  %v2438_v1 = vmul.f32 %v4658_v33, %v6164_v59 }
 0xa94   : > { %2592 = vmatpush.msrb.mxu1 %v4577_v39  ;;  %v2847_v36 = vsel %vm2129_vm15, %v6234_v6, 0.0  ;;  %v4662_v35 = vpop.eup %4661 }
 0xa95   : > { %v2439_v34 = vmul.f32 %v4662_v35, %v6177_v4 }
 0xa96   : > { %2593 = vmatpush.msrb.mxu1 %v4578_v51 }
 0xa98   : > { %2656 = vadd.xlane.f32.xlu1 %v2655_v58 }
 0xa99   : > { %v4566_v61 = vpop.permute.xlu0 %4565 }
 0xa9a   : > { %v4567_v43 = vunpack.i.l.bf16 %v4566_v61  ;;  %v4568_v14 = vunpack.i.h.bf16 %v4566_v61  ;;  %v6802_v61 = vld [vmem:[#allocation54_spill] sm:$0xff] }
 0xa9c   : > { %2466 = vmatpush.msra.mxu2 %v4567_v43  ;;  %v6803_v43 = vld [vmem:[#allocation53_spill] sm:$0xff] }
 0xa9e   : > { %2467 = vmatpush.msra.mxu2 %v4568_v14 }
 0xa9f   : > { %4289 = vmatmul.msk.f32.vlgmr.msra.gmra.mxu2 %vm2129_vm15, %v2438_v1 }
 0xaa0   : > { %2848 = vadd.xlane.f32.xlu1 %v2847_v36 }
 0xaa7   : > { %4290 = vmatmul.msk.f32.gmra.mxu2 %vm2129_vm15, %v2439_v34 }
 0xab8   : > { %v2654_v2 = vpop.xlane.xlu1 %2653 }
 0xab9   : > { %4585 = vrot.lane.b32.xlu1 %v6185_v15, %s5162_s1 }
 0xac0   : > { %v2549_v0 = vpop.xlane.xlu1 %2548 }
 0xac1   : > { %v2551_v24 = vsub.f32 %v6196_v54, %v2549_v0 }
 0xac3   : > { %v2554_v52 = vmul.f32 1.442695, %v2551_v24  ;;  %v6806_v24 = vld [vmem:[#allocation61_spill] sm:$0xff] }
 0xac4   : > { %v2546_v18 = vpop.xlane.xlu0 %2545 }
 0xac5   : > { %v2550_v59 = vsub.f32 %v6199_v12, %v2546_v18  ;;  %v6805_v18 = vld [vmem:[#allocation62_spill] sm:$0xff] }
 0xac7   : > { %v2552_v25 = vmul.f32 1.442695, %v2550_v59 }
 0xac8   : > { %v2738_v21 = vpop.xlane.xlu1 %2737 }
 0xac9   : > { %4663 = vpow2.f32 %v2552_v25  ;;  %v2742_v22 = vsub.f32 %v6204_v23, %v2738_v21  ;;  %v6807_v21 = vld [vmem:[#allocation60_spill] sm:$0xff] }
 0xacb   : > { %v2744_v50 = vmul.f32 1.442695, %v2742_v22 }
 0xacd   : > { %4665 = vpow2.f32 %v2744_v50 }
 0xace   : > { %4667 = vpow2.f32 %v2554_v52 }
 0xacf   : > { %v4664_v4 = vpop.eup %4663  ;;  %4669 = vrcp.f32 %v2654_v2  ;;  %v6804_v2 = vld [vmem:[#allocation63_spill] sm:$0xff] }
 0xad0   : > { %v2556_v28 = vsel %vm2129_vm15, %v4664_v4, 0.0 }
 0xad1   : > { %2557 = vadd.xlane.f32.xlu0 %v2556_v28 }
 0xad3   : > { %v6248_v16 = vpop.eup %4665 }
 0xad4   : > { %v2748_v12 = vsel %vm2129_vm15, %v6248_v16, 0.0  ;;  %v4668_v49 = vpop.eup %4667 }
 0xad5   : > { %2749 = vadd.xlane.f32.xlu2 %v2748_v12  ;;  %v2559_v54 = vsel %vm2129_vm15, %v4668_v49, 0.0  ;;  %v4670_v48 = vpop.eup %4669 }
 0xad6   : > { %v2660_v45 = vmul.f32 %v4670_v48, %v6191_v37 }
 0xad9   : > { %2560 = vadd.xlane.f32.xlu0 %v2559_v54  ;;  %v2277_v11 = vpop.f32.mrf.mxu2 }
 0xae0   : > { %v4571_v23 = vpop.permute.xlu1 %4570 }
 0xae1   : > { %v4572_v47 = vunpack.i.l.bf16 %v4571_v23  ;;  %v4573_v46 = vunpack.i.h.bf16 %v4571_v23 }
 0xae3   : > { %2688 = vmatpush.msrb.mxu2 %v4572_v47 }
 0xae5   : > { %2689 = vmatpush.msrb.mxu2 %v4573_v46 }
 0xae6   : > { %4301 = vmatmul.msk.f32.vlgmr.msrb.gmra.mxu2 %vm2129_vm15, %v2660_v45 }
 0xaed   : > { %2477 = vrot.lane.b32.xlu2 %v2277_v11, %s5166_s18  ;;  %4580 = vrot.lane.b32.xlu0 %v6185_v15, %s5165_s8 }
 0xaf5   : > { %2487 = vrot.lane.b32.xlu2 %v6189_v19, %s5167_s17  ;;  %v2280_v19 = vpop.f32.mrf.mxu2 }
 0xafe   : > { %v2846_v62 = vpop.xlane.xlu0 %2845 }
 0xb06   : > { %v2741_v57 = vpop.xlane.xlu0 %2740 }
 0xb07   : > { %v2743_v7 = vsub.f32 %v6223_v5, %v2741_v57 }
 0xb09   : > { %v2746_v8 = vmul.f32 1.442695, %v2743_v7 }
 0xb0b   : > { %v2657_v37 = vpop.xlane.xlu1 %2656 }
 0xb0c   : > { %4671 = vrcp.f32 %v2657_v37 }
 0xb0d   : > { %4673 = vpow2.f32 %v2746_v8  ;;  %v6808_v8 = vld [vmem:[#allocation51_spill] sm:$0xff] }
 0xb0e   : > { %v2920_v37 = vperm.slane %v6808_v8, 0 }
 0xb10   : > { %v2373_v63 = vpop.f32.mrf.mxu1 }
 0xb11   : > { %2485 = vrot.lane.b32.xlu1 %v2373_v63, %s5167_s17 }
 0xb12   : > { %v4672_v20 = vpop.eup %4671 }
 0xb13   : > { %v4674_v55 = vpop.eup %4673  ;;  %v2661_v53 = vmul.f32 %v4672_v20, %v6230_v31  ;;  %v2849_v38 = vpop.xlane.xlu1 %2848 }
 0xb14   : > { %v2751_v15 = vsel %vm2129_vm15, %v4674_v55, 0.0 }
 0xb15   : > { %4302 = vmatmul.msk.f32.gmra.mxu2 %vm2129_vm15, %v2661_v53 }
 0xb17   : > { %2752 = vadd.xlane.f32.xlu0 %v2751_v15 }
 0xb22   : > { %v2469_v32 = vpop.f32.mrf.mxu2 }
 0xb23   : > { %2493 = vrot.lane.b32.xlu1 %v2469_v32, %s5168_s15 }
 0xb2a   : > { %v2472_v5 = vpop.f32.mrf.mxu2 }
 0xb2b   : > { %v4586_v40 = vpop.permute.xlu1 %4585  ;;  %2495 = vrot.lane.b32.xlu0 %v2472_v5, %s5168_s15  ;;  %2479 = vrot.lane.b32.xlu1 %v2280_v19, %s5166_s18 }
 0xb2c   : > { %v4587_v26 = vunpack.i.l.bf16 %v4586_v40  ;;  %v4588_v17 = vunpack.i.h.bf16 %v4586_v40 }
 0xb2e   : > { %2784 = vmatpush.msra.mxu1 %v4587_v26 }
 0xb30   : > { %2785 = vmatpush.msra.mxu1 %v4588_v17 }
 0xb44   : > { %v2558_v39 = vpop.xlane.xlu0 %2557 }
 0xb45   : > { %4675 = vrcp.f32 %v2558_v39 }
 0xb48   : > { %v2750_v58 = vpop.xlane.xlu2 %2749 }
 0xb4b   : > { %v4676_v41 = vpop.eup %4675 }
 0xb4c   : > { %v2564_v31 = vmul.f32 %v4676_v41, %v4664_v4  ;;  %v2561_v51 = vpop.xlane.xlu0 %2560 }
 0xb4d   : > { %4677 = vrcp.f32 %v2561_v51 }
 0xb4e   : > { %4295 = vmatmul.msk.f32.vlgmr.msrb.gmra.mxu1 %vm2129_vm15, %v2564_v31  ;;  %4679 = vrcp.f32 %v2750_v58 }
 0xb4f   : > { %3092 = vmatpush.msrb.mxu1 %v5656_v30  ;;  %4681 = vrcp.f32 %v2846_v62 }
 0xb50   : > { %4683 = vrcp.f32 %v2849_v38  ;;  %v2478_v50 = vpop.permute.xlu2 %2477 }
 0xb51   : > { %3093 = vmatpush.msrb.mxu1 %v5652_v29  ;;  %v2499_v28 = vsel %vm2097_vm14, %v6035_v13, %v2478_v50 }
 0xb53   : > { %v4678_v56 = vpop.eup %4677  ;;  %3094 = vmatpush.msrb.mxu1 %v6802_v61 }
 0xb54   : > { %v2565_v33 = vmul.f32 %v4678_v56, %v4668_v49  ;;  %v4680_v14 = vpop.eup %4679 }
 0xb55   : > { %3095 = vmatpush.msrb.mxu1 %v6803_v43  ;;  %v2756_v1 = vmul.f32 %v4680_v14, %v6248_v16  ;;  %v4682_v30 = vpop.eup %4681 }
 0xb56   : > { %4296 = vmatmul.msk.f32.gmra.mxu1 %vm2129_vm15, %v2565_v33  ;;  %v2852_v34 = vmul.f32 %v4682_v30, %v6218_v42  ;;  %v4684_v0 = vpop.eup %4683 }
 0xb57   : > { %v2853_v25 = vmul.f32 %v4684_v0, %v6234_v6 }
 0xb58   : > { %v2488_v54 = vpop.permute.xlu2 %2487 }
 0xb5e   : > { %4307 = vmatmul.msk.f32.vlgmr.msra.gmra.mxu1 %vm2129_vm15, %v2756_v1 }
 0xb5f   : > { %v4581_v36 = vpop.permute.xlu0 %4580 }
 0xb60   : > { %v4582_v35 = vunpack.i.l.bf16 %v4581_v36  ;;  %v4583_v29 = vunpack.i.h.bf16 %v4581_v36 }
 0xb62   : > { %2880 = vmatpush.msra.mxu2 %v4582_v35 }
 0xb64   : > { %2881 = vmatpush.msra.mxu2 %v4583_v29 }
 0xb65   : > { %4313 = vmatmul.msk.f32.vlgmr.msra.gmra.mxu2 %vm2129_vm15, %v2852_v34 }
 0xb66   : > { %3569 = vmatpush.msrb.mxu2 %v6804_v2 }
 0xb68   : > { %3570 = vmatpush.msrb.mxu2 %v6805_v18 }
 0xb69   : > { %v2691_v59 = vpop.f32.mrf.mxu2 }
 0xb6a   : > { %2891 = vrot.lane.b32.xlu1 %v2691_v59, %s5166_s18  ;;  %3571 = vmatpush.msrb.mxu2 %v6806_v24 }
 0xb6c   : > { %3572 = vmatpush.msrb.mxu2 %v6807_v21 }
 0xb6d   : > { %4314 = vmatmul.msk.f32.gmra.mxu2 %vm2129_vm15, %v2853_v25 }
 0xb83   : > { %v2486_v22 = vpop.permute.xlu1 %2485 }
 0xb84   : > { %v2501_v16 = vsel %vm2129_vm15, %v2499_v28, %v2486_v22 }
 0xb8a   : > { %v2753_v42 = vpop.xlane.xlu0 %2752 }
 0xb8b   : > { %4685 = vrcp.f32 %v2753_v42 }
 0xb91   : > { %v4686_v52 = vpop.eup %4685 }
 0xb92   : > { %v2757_v4 = vmul.f32 %v4686_v52, %v4674_v55 }
 0xb94   : > { %4308 = vmatmul.msk.f32.gmra.mxu1 %vm2129_vm15, %v2757_v4 }
 0xb95   : > { %v2494_v12 = vpop.permute.xlu1 %2493 }
 0xb96   : > { %v2504_v6 = vsel %vm2503_vm7, %v2501_v16, %v2494_v12 }
 0xb97   : > { %4315 = vmatmul.msk.f32.vlgmr.msrb.gmra.mxu3 %vm1725_vm8, %v2504_v6 }
 0xb98   : > { %v2694_v62 = vpop.f32.mrf.mxu2 }
 0xb9d   : > { %v2480_v49 = vpop.permute.xlu1 %2479  ;;  %v2496_v48 = vpop.permute.xlu0 %2495 }
 0xb9e   : > { %v2500_v23 = vsel %vm2097_vm14, %v6037_v9, %v2480_v49  ;;  %v6809_v49 = vld [vmem:[#allocation52_spill] sm:$0xff] }
 0xb9f   : > { %v2502_v47 = vsel %vm2129_vm15, %v2500_v23, %v2488_v54 }
 0xba0   : > { %v2505_v46 = vsel %vm2503_vm7, %v2502_v47, %v2496_v48  ;;  %v6341_v48 = vperm.slane %v6809_v49, 1 }
 0xba1   : > { %4316 = vmatmul.msk.f32.gmra.mxu3 %vm1725_vm8, %v2505_v46 }
 0xbcb   : > { %v2595_v13 = vpop.f32.mrf.mxu1 }
 0xbd3   : > { %v2598_v45 = vpop.f32.mrf.mxu1 }
 0xbdb   : > { %v2787_v11 = vpop.f32.mrf.mxu1 }
 0xbdc   : > { %2899 = vrot.lane.b32.xlu2 %v2787_v11, %s5167_s17  ;;  %v2892_v5 = vpop.permute.xlu1 %2891 }
 0xbdd   : > { %v2913_v26 = vsel %vm2097_vm14, %v2595_v13, %v2892_v5 }
 0xbe4   : > { %2893 = vrot.lane.b32.xlu2 %v2694_v62, %s5166_s18 }
 0xbe8   : > { %v2883_v57 = vpop.f32.mrf.mxu2 }
 0xbe9   : > { %2907 = vrot.lane.b32.xlu1 %v2883_v57, %s5168_s15 }
 0xbf0   : > { %v2886_v7 = vpop.f32.mrf.mxu2 }
 0xbf1   : > { %2909 = vrot.lane.b32.xlu1 %v2886_v7, %s5168_s15 }
 0xc11   : > { %v2790_v9 = vpop.f32.mrf.mxu1 }
 0xc12   : > { %2901 = vrot.lane.b32.xlu0 %v2790_v9, %s5167_s17 }
 0xc1a   : > { %v2951_v63 = vpop.f32.mrf.mxu3 }
 0xc1b   : > { %v2952_v20 = vadd.f32 %v2951_v63, %v2920_v37 }
 0xc1d   : > { %v6303_v55 = vadd.f32 %v2952_v20, %v5880_v27 }
 0xc1f   : > { %v2967_v53 = vsel %vm1725_vm8, %v6303_v55, 0.0 }
 0xc20   : > { %2968 = vadd.xlane.f32.xlu2 %v2967_v53 }
 0xc24   : > { %v2954_v15 = vpop.f32.mrf.mxu3 }
 0xc25   : > { %v2955_v19 = vadd.f32 %v2954_v15, %v2920_v37 }
 0xc27   : > { %v6308_v32 = vadd.f32 %v2955_v19, %v5886_v3 }
 0xc29   : > { %v2970_v38 = vsel %vm1725_vm8, %v6308_v32, 0.0 }
 0xc36   : > { %v2900_v40 = vpop.permute.xlu2 %2899 }
 0xc37   : > { %v2915_v27 = vsel %vm2129_vm15, %v2913_v26, %v2900_v40 }
 0xc3c   : > { %2971 = vadd.xlane.f32.xlu0 %v2970_v38 }
 0xc3e   : > { %v2894_v41 = vpop.permute.xlu2 %2893 }
 0xc3f   : > { %v2914_v31 = vsel %vm2097_vm14, %v2598_v45, %v2894_v41 }
 0xc5b   : > { %v2908_v17 = vpop.permute.xlu1 %2907 }
 0xc5c   : > { %v2917_v39 = vsel %vm2503_vm7, %v2915_v27, %v2908_v17 }
 0xc5d   : > { %4317 = vmatmul.msk.f32.gmra.mxu3 %vm1725_vm8, %v2917_v39 }
 0xc63   : > { %v2910_v51 = vpop.permute.xlu1 %2909 }
 0xc84   : > { %v2902_v3 = vpop.permute.xlu0 %2901 }
 0xc85   : > { %v2916_v58 = vsel %vm2129_vm15, %v2914_v31, %v2902_v3  ;;  %v6810_v3 = vld [vmem:[#allocation55_spill] sm:$0xff] }
 0xc86   : > { %v2918_v56 = vsel %vm2503_vm7, %v2916_v58, %v2910_v51  ;;  %v6357_v51 = vperm.slane %v6810_v3, 0 }
 0xc87   : > { %4318 = vmatmul.msk.f32.gmra.mxu3 %vm1725_vm8, %v2918_v56 }
 0xc93   : > { %v2969_v61 = vpop.xlane.xlu2 %2968 }
 0xc94   : > { %v2979_v33 = vmul.f32 %v2969_v61, %v5835_v10 }
 0xc96   : > { %v2983_v43 = vsub.f32 %v6303_v55, %v2979_v33 }
 0xc98   : > { %v2987_v14 = vmul.f32 %v2983_v43, %v2983_v43 }
 0xc9a   : > { %v2991_v1 = vsel %vm1725_vm8, %v2987_v14, 0.0 }
 0xc9b   : > { %2992 = vadd.xlane.f32.xlu0 %v2991_v1 }
 0xcaf   : > { %v2972_v36 = vpop.xlane.xlu0 %2971 }
 0xcb0   : > { %v2980_v35 = vmul.f32 %v2972_v36, %v5835_v10 }
 0xcb2   : > { %v2984_v2 = vsub.f32 %v6308_v32, %v2980_v35 }
 0xcb4   : > { %v2988_v18 = vmul.f32 %v2984_v2, %v2984_v2 }
 0xcb6   : > { %v2994_v59 = vsel %vm1725_vm8, %v2988_v18, 0.0 }
 0xce0   : > { %v2957_v30 = vpop.f32.mrf.mxu3 }
 0xce1   : > { %v2958_v29 = vadd.f32 %v2957_v30, %v2920_v37 }
 0xce3   : > { %v6325_v34 = vadd.f32 %v2958_v29, %v5960_v44 }
 0xce5   : > { %v2973_v0 = vsel %vm1725_vm8, %v6325_v34, 0.0 }
 0xce6   : > { %2974 = vadd.xlane.f32.xlu1 %v2973_v0 }
 0xcee   : > { %2995 = vadd.xlane.f32.xlu1 %v2994_v59 }
 0xd0a   : > { %v2960_v24 = vpop.f32.mrf.mxu3 }
 0xd0b   : > { %v2961_v25 = vadd.f32 %v2960_v24, %v2920_v37 }
 0xd0d   : > { %v6332_v21 = vadd.f32 %v2961_v25, %v6000_v60  ;;  %v6338_v60 = vperm.slane %v6809_v49, 0 }
 0xd0e   : > { %v2993_v42 = vpop.xlane.xlu0 %2992 }
 0xd0f   : > { %v3003_v22 = vmul.f32 %v2993_v42, %v5835_v10  ;;  %v2976_v44 = vsel %vm1725_vm8, %v6332_v21, 0.0 }
 0xd10   : > { %2977 = vadd.xlane.f32.xlu2 %v2976_v44 }
 0xd11   : > { %v3007_v52 = vadd.f32 1e-05, %v3003_v22 }
 0xd13   : > { %4687 = vrsqrt.f32 %v3007_v52  ;;  %vm3017_vm10 = vweird.f32 %v3007_v52 }
 0xd19   : > { %v4688_v50 = vpop.eup %4687 }
 0xd1a   : > { %v3012_v4 = vmul.f32 %v4688_v50, %v3007_v52  ;;  %vm3018_vm9 = vweird.f32 %v4688_v50 }
 0xd1b   : > { %vm3019_vm11 = vmor %vm3017_vm10, %vm3018_vm9 }
 0xd1c   : > { %v3013_v28 = vmul.f32 %v4688_v50, %v3012_v4 }
 0xd1e   : > { %v3014_v16 = vmul.f32 0.5, %v3013_v28 }
 0xd20   : > { %v3015_v12 = vsub.f32 1.5, %v3014_v16 }
 0xd22   : > { %v3016_v6 = vmul.f32 %v4688_v50, %v3015_v12 }
 0xd24   : > { %v3020_v54 = vsel %vm3019_vm11, %v4688_v50, %v3016_v6 }
 0xd25   : > { %v3051_v23 = vmul.f32 %v3020_v54, %v2983_v43 }
 0xd27   : > { %v3056_v47 = vmul.f32 %v6338_v60, %v3051_v23 }
 0xd29   : > { %v3061_v46 = vadd.f32 %v6341_v48, %v3056_v47 }
 0xd2b   : > { %4319 = vmatmul.msk.f32.vlgmr.msrb.gmra.mxu1 %vm1725_vm8, %v3061_v46 }
 0xd59   : > { %v2975_v13 = vpop.xlane.xlu1 %2974 }
 0xd5a   : > { %v2981_v45 = vmul.f32 %v2975_v13, %v5835_v10 }
 0xd5c   : > { %v2985_v11 = vsub.f32 %v6325_v34, %v2981_v45 }
 0xd5e   : > { %v2989_v62 = vmul.f32 %v2985_v11, %v2985_v11 }
 0xd60   : > { %v2997_v57 = vsel %vm1725_vm8, %v2989_v62, 0.0 }
 0xd61   : > { %2998 = vadd.xlane.f32.xlu2 %v2997_v57  ;;  %v2996_v7 = vpop.xlane.xlu1 %2995 }
 0xd62   : > { %v3004_v9 = vmul.f32 %v2996_v7, %v5835_v10 }
 0xd64   : > { %v3008_v8 = vadd.f32 1e-05, %v3004_v9 }
 0xd66   : > { %4689 = vrsqrt.f32 %v3008_v8  ;;  %vm3027_vm13 = vweird.f32 %v3008_v8 }
 0xd6c   : > { %v4690_v37 = vpop.eup %4689 }
 0xd6d   : > { %v3022_v63 = vmul.f32 %v4690_v37, %v3008_v8  ;;  %vm3028_vm12 = vweird.f32 %v4690_v37 }
 0xd6e   : > { %vm3029_vm14 = vmor %vm3027_vm13, %vm3028_vm12 }
 0xd6f   : > { %v3023_v20 = vmul.f32 %v4690_v37, %v3022_v63  ;;  %v3151_v63 = vlaneseq }
 0xd71   : > { %v3024_v53 = vmul.f32 0.5, %v3023_v20 }
 0xd73   : > { %v3025_v15 = vsub.f32 1.5, %v3024_v53  ;;  %v6373_v53 = vshrl.u32 %v3151_v63, 7 }
 0xd75   : > { %v3026_v19 = vmul.f32 %v4690_v37, %v3025_v15  ;;  %v6811_v15 = vld [vmem:[#allocation56_spill] sm:$0xff]  ;;  %vm3153_vm6 = vcmp.lt.s32.totalorder %v6373_v53, 3  ;;  %vm3178_vm7 = vcmp.lt.s32.totalorder %v6373_v53, 2  ;;  %vm3202_vm10 = vcmp.lt.s32.totalorder %v6373_v53, 1 }
 0xd76   : > { %v6400_v3 = vperm.slane %v6811_v15, 1  ;;  %vm3231_vm13 = vcmp.lt.s32.totalorder %v6373_v53, 7 }
 0xd77   : > { %v3030_v38 = vsel %vm3029_vm14, %v4690_v37, %v3026_v19  ;;  %v6376_v19 = vperm.slane %v6811_v15, 3  ;;  %vm3255_vm14 = vcmp.lt.s32.totalorder %v6373_v53, 6 }
 0xd78   : > { %v3052_v5 = vmul.f32 %v3030_v38, %v2984_v2  ;;  %v6381_v38 = vadd.s32 4294967293, %v6373_v53 }
 0xd7a   : > { %v3057_v40 = vmul.f32 %v6338_v60, %v3052_v5  ;;  %v6386_v5 = vadd.s32 4294967294, %v6373_v53  ;;  %vm3159_vm9 = vcmp.ge.s32.totalorder %v6381_v38, 0 }
 0xd7c   : > { %v3062_v26 = vadd.f32 %v6341_v48, %v3057_v40  ;;  %v6389_v40 = vadd.s32 4294967295, %v6373_v53  ;;  %vm3183_vm11 = vcmp.ge.s32.totalorder %v6386_v5, 0 }
 0xd7e   : > { %4320 = vmatmul.msk.f32.gmra.mxu1 %vm1725_vm8, %v3062_v26  ;;  %vm3207_vm12 = vcmp.ge.s32.totalorder %v6389_v40, 0 }
 0xd83   : > { %v2978_v27 = vpop.xlane.xlu2 %2977 }
 0xd84   : > { %v2982_v17 = vmul.f32 %v2978_v27, %v5835_v10 }
 0xd86   : > { %v2986_v39 = vsub.f32 %v6332_v21, %v2982_v17 }
 0xd88   : > { %v2990_v41 = vmul.f32 %v2986_v39, %v2986_v39 }
 0xd8a   : > { %v3000_v31 = vsel %vm1725_vm8, %v2990_v41, 0.0 }
 0xd8b   : > { %3001 = vadd.xlane.f32.xlu0 %v3000_v31  ;;  %v6397_v31 = vperm.slane %v6811_v15, 0 }
 0xda8   : > { %v3097_v58 = vpop.f32.mrf.mxu1 }
 0xda9   : > { %v3098_v56 = vadd.f32 %v3097_v58, %v6357_v51 }
 0xdab   : > { %v3109_v61 = vsub.f32 0.0, %v3098_v56 }
 0xdad   : > { %v3113_v33 = vmul.f32 1.442695, %v3109_v61 }
 0xdaf   : > { %4691 = vpow2.f32 %v3113_v33  ;;  %v6407_v33 = vperm.slane %v6811_v15, 2 }
 0xdb5   : > { %v4692_v43 = vpop.eup %4691 }
 0xdb6   : > { %v3121_v14 = vadd.f32 1.0, %v4692_v43 }
 0xdb8   : > { %4693 = vrcp.f32 %v3121_v14  ;;  %v6413_v14 = vperm.slane %v6811_v15, 4 }
 0xdbe   : > { %v4694_v1 = vpop.eup %4693 }
 0xdbf   : > { %3133 = vrot.lane.b32.xlu1 %v4694_v1, %s5155_s14 }
 0xdd4   : > { %v2999_v36 = vpop.xlane.xlu2 %2998 }
 0xdd5   : > { %v3005_v30 = vmul.f32 %v2999_v36, %v5835_v10 }
 0xdd7   : > { %v3009_v35 = vadd.f32 1e-05, %v3005_v30 }
 0xdd9   : > { %4695 = vrsqrt.f32 %v3009_v35  ;;  %vm3037_vm1 = vweird.f32 %v3009_v35 }
 0xddf   : > { %v4696_v29 = vpop.eup %4695 }
 0xde0   : > { %v3032_v2 = vmul.f32 %v4696_v29, %v3009_v35  ;;  %vm3038_vm15 = vweird.f32 %v4696_v29 }
 0xde1   : > { %vm3039_vm2 = vmor %vm3037_vm1, %vm3038_vm15  ;;  %vm3279_vm15 = vcmp.lt.s32.totalorder %v6373_v53, 5 }
 0xde2   : > { %v3033_v0 = vmul.f32 %v4696_v29, %v3032_v2  ;;  %v6424_v2 = vperm.slane %v6811_v15, 6 }
 0xde4   : > { %v3034_v18 = vmul.f32 0.5, %v3033_v0 }
 0xde6   : > { %v3035_v59 = vsub.f32 1.5, %v3034_v18 }
 0xde8   : > { %v3036_v24 = vmul.f32 %v4696_v29, %v3035_v59 }
 0xdea   : > { %v3040_v25 = vsel %vm3039_vm2, %v4696_v29, %v3036_v24  ;;  %v6420_v29 = vperm.slane %v6811_v15, 5 }
 0xdeb   : > { %v3053_v42 = vmul.f32 %v3040_v25, %v2985_v11 }
 0xded   : > { %v3058_v22 = vmul.f32 %v6338_v60, %v3053_v42 }
 0xdef   : > { %v3063_v44 = vadd.f32 %v6341_v48, %v3058_v22 }
 0xdf1   : > { %4321 = vmatmul.msk.f32.gmra.mxu1 %vm1725_vm8, %v3063_v44 }
 0xdfb   : > { %v3100_v52 = vpop.f32.mrf.mxu1 }
 0xdfc   : > { %v3101_v50 = vadd.f32 %v3100_v52, %v6357_v51 }
 0xdfe   : > { %v3110_v4 = vsub.f32 0.0, %v3101_v50  ;;  %v3002_v28 = vpop.xlane.xlu0 %3001 }
 0xdff   : > { %v3006_v16 = vmul.f32 %v3002_v28, %v5835_v10 }
 0xe00   : > { %v3115_v12 = vmul.f32 1.442695, %v3110_v4 }
 0xe01   : > { %v3010_v6 = vadd.f32 1e-05, %v3006_v16 }
 0xe02   : > { %4697 = vpow2.f32 %v3115_v12 }
 0xe03   : > { %4699 = vrsqrt.f32 %v3010_v6  ;;  %vm3047_vm4 = vweird.f32 %v3010_v6 }
 0xe08   : > { %v4698_v49 = vpop.eup %4697 }
 0xe09   : > { %v4700_v54 = vpop.eup %4699  ;;  %v3122_v23 = vadd.f32 1.0, %v4698_v49 }
 0xe0a   : > { %v3042_v47 = vmul.f32 %v4700_v54, %v3010_v6  ;;  %vm3048_vm3 = vweird.f32 %v4700_v54 }
 0xe0b   : > { %4701 = vrcp.f32 %v3122_v23  ;;  %vm3049_vm5 = vmor %vm3047_vm4, %vm3048_vm3 }
 0xe0c   : > { %v3043_v46 = vmul.f32 %v4700_v54, %v3042_v47 }
 0xe0e   : > { %v3044_v13 = vmul.f32 0.5, %v3043_v46 }
 0xe10   : > { %v3045_v45 = vsub.f32 1.5, %v3044_v13 }
 0xe11   : > { %v4702_v11 = vpop.eup %4701 }
 0xe12   : > { %v3046_v62 = vmul.f32 %v4700_v54, %v3045_v45  ;;  %3135 = vrot.lane.b32.xlu2 %v4702_v11, %s5155_s14 }
 0xe14   : > { %v3050_v57 = vsel %vm3049_vm5, %v4700_v54, %v3046_v62 }
 0xe15   : > { %v3054_v7 = vmul.f32 %v3050_v57, %v2986_v39 }
 0xe17   : > { %v3059_v9 = vmul.f32 %v6338_v60, %v3054_v7 }
 0xe19   : > { %v3064_v8 = vadd.f32 %v6341_v48, %v3059_v9 }
 0xe1b   : > { %4322 = vmatmul.msk.f32.gmra.mxu1 %vm1725_vm8, %v3064_v8 }
 0xe31   : > { %v3134_v37 = vpop.permute.xlu1 %3133 }
 0xe32   : > { %v6371_v20 = vmul.f32 %v3134_v37, %v3098_v56  ;;  %v3156_v56 = vadd.s32 8, %v6373_v53 }
 0xe34   : > { %v3149_v60 = vrot.slane %v6371_v20, 5  ;;  %v3176_v48 = vrot.slane %v6371_v20, 6  ;;  %v3200_v26 = vrot.slane %v6371_v20, 7  ;;  %v3229_v27 = vrot.slane %v6371_v20, 1 }
 0xe35   : > { %v3253_v17 = vrot.slane %v6371_v20, 2  ;;  %v3225_v39 = vmul.f32 %v6376_v19, %v6371_v20  ;;  %v3277_v58 = vrot.slane %v6371_v20, 3  ;;  %v6441_v4 = vadd.s32 1, %v3156_v56 }
 0xe36   : > { %v6443_v28 = vadd.s32 2, %v3156_v56  ;;  %v6455_v11 = vadd.s32 3, %v3156_v56 }
 0xe37   : > { %vm3239_vm1 = vcmp.lt.s32.totalorder %v6441_v4, 16 }
 0xe38   : > { %vm3263_vm2 = vcmp.lt.s32.totalorder %v6443_v28, 16  ;;  %vm3287_vm3 = vcmp.lt.s32.totalorder %v6455_v11, 16 }
 0xe6c   : > { %v3136_v41 = vpop.permute.xlu2 %3135 }
 0xe6d   : > { %v3146_v61 = vmul.f32 %v3136_v41, %v3101_v50 }
 0xe6e   : > { %v3103_v43 = vpop.f32.mrf.mxu1 }
 0xe6f   : > { %v3150_v1 = vrot.slane %v3146_v61, 5  ;;  %v3177_v36 = vrot.slane %v3146_v61, 6  ;;  %v3201_v30 = vrot.slane %v3146_v61, 7  ;;  %v6417_v35 = vadd.f32 %v3103_v43, %v6357_v51 }
 0xe70   : > { %v3230_v59 = vrot.slane %v3146_v61, 1  ;;  %v3254_v16 = vrot.slane %v3146_v61, 2  ;;  %v3278_v6 = vrot.slane %v3146_v61, 3 }
 0xe71   : > { %v3155_v0 = vsel %vm3153_vm6, %v3150_v1, %v3149_v60  ;;  %v3180_v18 = vsel %vm3178_vm7, %v3177_v36, %v3176_v48  ;;  %v3204_v24 = vsel %vm3202_vm10, %v3201_v30, %v3200_v26  ;;  %v3111_v25 = vsub.f32 0.0, %v6417_v35 }
 0xe72   : > { %v3169_v42 = vsel %vm3159_vm9, %v3155_v0, 0.0  ;;  %v3193_v22 = vsel %vm3183_vm11, %v3180_v18, 0.0  ;;  %v3217_v44 = vsel %vm3207_vm12, %v3204_v24, 0.0  ;;  %v3154_v49 = vsel %vm3153_vm6, %v3149_v60, %v3150_v1 }
 0xe73   : > { %v3172_v52 = vmul.f32 %v6397_v31, %v3169_v42  ;;  %v3196_v50 = vmul.f32 %v6400_v3, %v3193_v22  ;;  %v3117_v12 = vmul.f32 1.442695, %v3111_v25  ;;  %v3220_v23 = vmul.f32 %v6407_v33, %v3217_v44 }
 0xe74   : > { %v3232_v47 = vsel %vm3231_vm13, %v3229_v27, %v3230_v59  ;;  %v3173_v46 = vmul.f32 %v6397_v31, %v3154_v49  ;;  %v3179_v13 = vsel %vm3178_vm7, %v3176_v48, %v3177_v36  ;;  %v3203_v45 = vsel %vm3202_vm10, %v3200_v26, %v3201_v30  ;;  %v6812_v36 = vld [vmem:[#allocation57_spill] sm:$0xff] }
 0xe75   : > { %v3198_v54 = vadd.f32 %v3196_v50, %v3172_v52  ;;  %4703 = vpow2.f32 %v3117_v12  ;;  %v3197_v57 = vmul.f32 %v6400_v3, %v3179_v13  ;;  %v3233_v7 = vsel %vm3231_vm13, %v3230_v59, %v3229_v27 }
 0xe76   : > { %v3249_v9 = vmul.f32 %v6413_v14, %v3232_v47  ;;  %v3256_v8 = vsel %vm3255_vm14, %v3253_v17, %v3254_v16  ;;  %v3280_v37 = vsel %vm3279_vm15, %v3277_v58, %v3278_v6  ;;  %v3221_v15 = vmul.f32 %v6407_v33, %v3203_v45 }
 0xe77   : > { %v3222_v62 = vadd.f32 %v3220_v23, %v3198_v54  ;;  %v3199_v20 = vadd.f32 %v3197_v57, %v3173_v46  ;;  %v3257_v60 = vsel %vm3255_vm14, %v3254_v16, %v3253_v17  ;;  %v3226_v48 = vmul.f32 %v6376_v19, %v3146_v61 }
 0xe78   : > { %v3247_v26 = vsel %vm3239_vm1, %v3233_v7, 0.0  ;;  %v3273_v41 = vmul.f32 %v6420_v29, %v3256_v8  ;;  %v3297_v1 = vmul.f32 %v6424_v2, %v3280_v37  ;;  %v6479_v30 = vperm.slane %v6812_v36, 0 }
 0xe79   : > { %v3227_v63 = vadd.f32 %v3225_v39, %v3222_v62  ;;  %v3223_v56 = vadd.f32 %v3221_v15, %v3199_v20  ;;  %v3281_v39 = vsel %vm3279_vm15, %v3278_v6, %v3277_v58  ;;  %v3271_v17 = vsel %vm3263_vm2, %v3257_v60, 0.0 }
 0xe7a   : > { %v3250_v59 = vmul.f32 %v6413_v14, %v3247_v26  ;;  %v3295_v24 = vsel %vm3287_vm3, %v3281_v39, 0.0  ;;  %v3274_v42 = vmul.f32 %v6420_v29, %v3271_v17  ;;  %v6813_v26 = vld [vmem:[#allocation58_spill] sm:$0xff] }
 0xe7b   : > { %v3251_v27 = vadd.f32 %v3249_v9, %v3227_v63  ;;  %v4704_v43 = vpop.eup %4703  ;;  %v3228_v18 = vadd.f32 %v3226_v48, %v3223_v56  ;;  %v3298_v52 = vmul.f32 %v6424_v2, %v3295_v24 }
 0xe7c   : > { %v3123_v61 = vadd.f32 1.0, %v4704_v43 }
 0xe7d   : > { %v3275_v0 = vadd.f32 %v3273_v41, %v3251_v27  ;;  %v3252_v58 = vadd.f32 %v3250_v59, %v3228_v18  ;;  %v6496_v27 = vperm.slane %v6813_v26, 0 }
 0xe7e   : > { %4705 = vrcp.f32 %v3123_v61 }
 0xe7f   : > { %v3299_v25 = vadd.f32 %v3297_v1, %v3275_v0  ;;  %v3276_v44 = vadd.f32 %v3274_v42, %v3252_v58 }
 0xe81   : > { %v3368_v22 = vadd.f32 %v6479_v30, %v3299_v25  ;;  %v3300_v16 = vadd.f32 %v3298_v52, %v3276_v44 }
 0xe83   : > { %v3372_v50 = vsub.f32 0.0, %v3368_v22  ;;  %v3369_v49 = vadd.f32 %v6479_v30, %v3300_v16 }
 0xe84   : > { %v4706_v12 = vpop.eup %4705 }
 0xe85   : > { %v3376_v6 = vmul.f32 1.442695, %v3372_v50  ;;  %3137 = vrot.lane.b32.xlu0 %v4706_v12, %s5155_s14  ;;  %v3373_v54 = vsub.f32 0.0, %v3369_v49 }
 0xe87   : > { %4707 = vpow2.f32 %v3376_v6  ;;  %v3378_v23 = vmul.f32 1.442695, %v3373_v54 }
 0xe89   : > { %4709 = vpow2.f32 %v3378_v23 }
 0xe8d   : > { %v4708_v47 = vpop.eup %4707 }
 0xe8e   : > { %v3384_v46 = vadd.f32 1.0, %v4708_v47 }
 0xe8f   : > { %v4710_v13 = vpop.eup %4709 }
 0xe90   : > { %4711 = vrcp.f32 %v3384_v46  ;;  %v3385_v45 = vadd.f32 1.0, %v4710_v13 }
 0xe92   : > { %4713 = vrcp.f32 %v3385_v45 }
 0xe96   : > { %v4712_v62 = vpop.eup %4711 }
 0xe97   : > { %v3392_v57 = vmul.f32 %v4712_v62, %v3368_v22 }
 0xe98   : > { %v3106_v7 = vpop.f32.mrf.mxu1  ;;  %v4714_v37 = vpop.eup %4713 }
 0xe99   : > { %v3107_v9 = vadd.f32 %v3106_v7, %v6357_v51  ;;  %4323 = vmatmul.msk.f32.vlgmr.msrb.gmra.mxu0 %vm1725_vm8, %v3392_v57  ;;  %v3393_v20 = vmul.f32 %v4714_v37, %v3369_v49 }
 0xe9b   : > { %v3112_v8 = vsub.f32 0.0, %v3107_v9 }
 0xe9d   : > { %v3119_v63 = vmul.f32 1.442695, %v3112_v8 }
 0xe9f   : > { %4715 = vpow2.f32 %v3119_v63 }
 0xea1   : > { %4324 = vmatmul.msk.f32.gmra.mxu0 %vm1725_vm8, %v3393_v20 }
 0xea5   : > { %v4716_v15 = vpop.eup %4715 }
 0xea6   : > { %v3124_v60 = vadd.f32 1.0, %v4716_v15 }
 0xea8   : > { %4717 = vrcp.f32 %v3124_v60 }
 0xeae   : > { %v4718_v48 = vpop.eup %4717 }
 0xeaf   : > { %3139 = vrot.lane.b32.xlu1 %v4718_v48, %s5155_s14 }
 0xef7   : > { %v3138_v43 = vpop.permute.xlu0 %3137 }
 0xef8   : > { %v3147_v36 = vmul.f32 %v3138_v43, %v6417_v35 }
 0xefa   : > { %v3301_v59 = vrot.slane %v3147_v36, 5  ;;  %v3311_v24 = vrot.slane %v3147_v36, 6  ;;  %v3321_v42 = vrot.slane %v3147_v36, 7  ;;  %v3331_v52 = vmul.f32 %v6376_v19, %v3147_v36 }
 0xefb   : > { %v3335_v23 = vrot.slane %v3147_v36, 1  ;;  %v3345_v46 = vrot.slane %v3147_v36, 2 }
 0xf16   : > { %v3428_v41 = vpop.f32.mrf.mxu0 }
 0xf17   : > { %v3429_v51 = vadd.f32 %v3428_v41, %v6496_v27 }
 0xf19   : > { %v6500_v56 = vadd.f32 %v3429_v51, %v6303_v55 }
 0xf1b   : > { %v3444_v39 = vsel %vm1725_vm8, %v6500_v56, 0.0 }
 0xf1c   : > { %3445 = vadd.xlane.f32.xlu2 %v3444_v39 }
 0xf1e   : > { %v3431_v1 = vpop.f32.mrf.mxu0 }
 0xf1f   : > { %v3432_v17 = vadd.f32 %v3431_v1, %v6496_v27 }
 0xf21   : > { %v6507_v61 = vadd.f32 %v3432_v17, %v6308_v32  ;;  %v3140_v0 = vpop.permute.xlu1 %3139 }
 0xf22   : > { %v3148_v18 = vmul.f32 %v3140_v0, %v3107_v9  ;;  %v3355_v9 = vrot.slane %v3147_v36, 3 }
 0xf23   : > { %v3447_v55 = vsel %vm1725_vm8, %v6507_v61, 0.0 }
 0xf24   : > { %v3302_v25 = vrot.slane %v3148_v18, 5  ;;  %v3312_v58 = vrot.slane %v3148_v18, 6  ;;  %3448 = vadd.xlane.f32.xlu0 %v3447_v55  ;;  %v3322_v22 = vrot.slane %v3148_v18, 7  ;;  %v3336_v6 = vrot.slane %v3148_v18, 1 }
 0xf25   : > { %v3346_v47 = vrot.slane %v3148_v18, 2  ;;  %v3356_v13 = vrot.slane %v3148_v18, 3 }
 0xf26   : > { %v3304_v35 = vsel %vm3153_vm6, %v3302_v25, %v3301_v59  ;;  %v3314_v44 = vsel %vm3178_vm7, %v3312_v58, %v3311_v24  ;;  %v3324_v32 = vsel %vm3202_vm10, %v3322_v22, %v3321_v42  ;;  %v3303_v45 = vsel %vm3153_vm6, %v3301_v59, %v3302_v25 }
 0xf27   : > { %v3305_v50 = vsel %vm3159_vm9, %v3304_v35, 0.0  ;;  %v3315_v16 = vsel %vm3183_vm11, %v3314_v44, 0.0  ;;  %v3325_v12 = vsel %vm3207_vm12, %v3324_v32, 0.0  ;;  %v3313_v38 = vsel %vm3178_vm7, %v3311_v24, %v3312_v58 }
 0xf28   : > { %v3307_v49 = vmul.f32 %v3305_v50, %v6397_v31  ;;  %v3317_v54 = vmul.f32 %v3315_v16, %v6400_v3  ;;  %v3327_v62 = vmul.f32 %v3325_v12, %v6407_v33  ;;  %v3308_v40 = vmul.f32 %v3303_v45, %v6397_v31 }
 0xf29   : > { %v3318_v57 = vmul.f32 %v3313_v38, %v6400_v3  ;;  %v3337_v7 = vsel %vm3231_vm13, %v3335_v23, %v3336_v6  ;;  %v3323_v8 = vsel %vm3202_vm10, %v3321_v42, %v3322_v22  ;;  %v3338_v37 = vsel %vm3231_vm13, %v3336_v6, %v3335_v23 }
 0xf2a   : > { %v3319_v5 = vadd.f32 %v3317_v54, %v3307_v49  ;;  %v3328_v15 = vmul.f32 %v3323_v8, %v6407_v33  ;;  %v3348_v60 = vsel %vm3255_vm14, %v3346_v47, %v3345_v46  ;;  %v3347_v31 = vsel %vm3255_vm14, %v3345_v46, %v3346_v47 }
 0xf2b   : > { %v3320_v20 = vadd.f32 %v3318_v57, %v3308_v40  ;;  %v3332_v3 = vmul.f32 %v6376_v19, %v3148_v18  ;;  %v3340_v48 = vsel %vm3239_vm1, %v3338_v37, 0.0  ;;  %v3341_v41 = vmul.f32 %v3337_v7, %v6413_v14 }
 0xf2c   : > { %v3329_v63 = vadd.f32 %v3327_v62, %v3319_v5  ;;  %v3358_v39 = vsel %vm3279_vm15, %v3356_v13, %v3355_v9  ;;  %v3357_v33 = vsel %vm3279_vm15, %v3355_v9, %v3356_v13  ;;  %v3350_v43 = vsel %vm3263_vm2, %v3348_v60, 0.0 }
 0xf2d   : > { %v3330_v51 = vadd.f32 %v3328_v15, %v3320_v20  ;;  %v3351_v36 = vmul.f32 %v3347_v31, %v6420_v29  ;;  %v3342_v4 = vmul.f32 %v3340_v48, %v6413_v14  ;;  %v3360_v17 = vsel %vm3287_vm3, %v3358_v39, 0.0  ;;  %v6814_v48 = vld [vmem:[#allocation59_spill] sm:$0xff] }
 0xf2e   : > { %v3333_v26 = vadd.f32 %v3331_v52, %v3329_v63  ;;  %v3361_v18 = vmul.f32 %v3357_v33, %v6424_v2  ;;  %v3352_v24 = vmul.f32 %v3350_v43, %v6420_v29  ;;  %v3362_v28 = vmul.f32 %v3360_v17, %v6424_v2 }
 0xf2f   : > { %v3334_v19 = vadd.f32 %v3332_v3, %v3330_v51  ;;  %v6588_v39 = vperm.slane %v6814_v48, 1 }
 0xf30   : > { %v3343_v1 = vadd.f32 %v3341_v41, %v3333_v26  ;;  %v6585_v26 = vperm.slane %v6814_v48, 0 }
 0xf31   : > { %v3344_v59 = vadd.f32 %v3342_v4, %v3334_v19 }
 0xf32   : > { %v3353_v0 = vadd.f32 %v3351_v36, %v3343_v1 }
 0xf33   : > { %v3354_v55 = vadd.f32 %v3352_v24, %v3344_v59 }
 0xf34   : > { %v3363_v53 = vadd.f32 %v3361_v18, %v3353_v0 }
 0xf35   : > { %v3364_v58 = vadd.f32 %v3362_v28, %v3354_v55 }
 0xf36   : > { %v3370_v25 = vadd.f32 %v6479_v30, %v3363_v53 }
 0xf37   : > { %v3371_v22 = vadd.f32 %v6479_v30, %v3364_v58 }
 0xf38   : > { %v3374_v42 = vsub.f32 0.0, %v3370_v25 }
 0xf39   : > { %v3375_v35 = vsub.f32 0.0, %v3371_v22 }
 0xf3a   : > { %v3380_v14 = vmul.f32 1.442695, %v3374_v42 }
 0xf3b   : > { %v3382_v11 = vmul.f32 1.442695, %v3375_v35 }
 0xf3c   : > { %4719 = vpow2.f32 %v3380_v14 }
 0xf3d   : > { %4721 = vpow2.f32 %v3382_v11 }
 0xf42   : > { %v4720_v44 = vpop.eup %4719 }
 0xf43   : > { %v3386_v32 = vadd.f32 1.0, %v4720_v44  ;;  %v4722_v52 = vpop.eup %4721 }
 0xf44   : > { %v3387_v29 = vadd.f32 1.0, %v4722_v52 }
 0xf45   : > { %4723 = vrcp.f32 %v3386_v32 }
 0xf46   : > { %4725 = vrcp.f32 %v3387_v29 }
 0xf4b   : > { %v4724_v50 = vpop.eup %4723 }
 0xf4c   : > { %v3394_v16 = vmul.f32 %v4724_v50, %v3370_v25  ;;  %v4726_v2 = vpop.eup %4725  ;;  %v6815_v50 = vld [vmem:[#allocation64_spill] sm:$0xff] }
 0xf4d   : > { %v3395_v12 = vmul.f32 %v4726_v2, %v3371_v22 }
 0xf4e   : > { %4325 = vmatmul.msk.f32.gmra.mxu0 %vm1725_vm8, %v3394_v16  ;;  %v6608_v16 = vperm.slane %v6815_v50, 0 }
 0xf56   : > { %4326 = vmatmul.msk.f32.gmra.mxu0 %vm1725_vm8, %v3395_v12 }
 0xf8f   : > { %v3446_v30 = vpop.xlane.xlu2 %3445 }
 0xf90   : > { %v3456_v6 = vmul.f32 %v3446_v30, %v5835_v10 }
 0xf92   : > { %v3460_v49 = vsub.f32 %v6500_v56, %v3456_v6 }
 0xf94   : > { %v3464_v54 = vmul.f32 %v3460_v49, %v3460_v49 }
 0xf96   : > { %v3468_v23 = vsel %vm1725_vm8, %v3464_v54, 0.0 }
 0xf97   : > { %3469 = vadd.xlane.f32.xlu0 %v3468_v23  ;;  %v3449_v38 = vpop.xlane.xlu0 %3448 }
 0xf98   : > { %v3457_v62 = vmul.f32 %v3449_v38, %v5835_v10 }
 0xf9a   : > { %v3461_v7 = vsub.f32 %v6507_v61, %v3457_v62 }
 0xfcb   : > { %v3434_v47 = vpop.f32.mrf.mxu0 }
 0xfcc   : > { %v3435_v46 = vadd.f32 %v3434_v47, %v6496_v27 }
 0xfce   : > { %v6570_v13 = vadd.f32 %v3435_v46, %v6325_v34  ;;  %v3465_v34 = vmul.f32 %v3461_v7, %v3461_v7 }
 0xfd0   : > { %v3450_v45 = vsel %vm1725_vm8, %v6570_v13, 0.0  ;;  %v3471_v8 = vsel %vm1725_vm8, %v3465_v34, 0.0 }
 0xfd1   : > { %3451 = vadd.xlane.f32.xlu1 %v3450_v45 }
 0xfd3   : > { %v3437_v5 = vpop.f32.mrf.mxu0 }
 0xfd4   : > { %v3438_v40 = vadd.f32 %v3437_v5, %v6496_v27 }
 0xfd6   : > { %v6577_v57 = vadd.f32 %v3438_v40, %v6332_v21 }
 0xfd8   : > { %v3453_v9 = vsel %vm1725_vm8, %v6577_v57, 0.0 }
 0xfd9   : > { %3454 = vadd.xlane.f32.xlu2 %v3453_v9 }
 0xfe1   : > { %3472 = vadd.xlane.f32.xlu2 %v3471_v8 }
0x100a   : > { %v3470_v37 = vpop.xlane.xlu0 %3469 }
0x100b   : > { %v3480_v63 = vmul.f32 %v3470_v37, %v5835_v10 }
0x100d   : > { %v3484_v20 = vadd.f32 1e-05, %v3480_v63 }
0x100f   : > { %4727 = vrsqrt.f32 %v3484_v20  ;;  %vm3494_vm5 = vweird.f32 %v3484_v20 }
0x1015   : > { %v4728_v15 = vpop.eup %4727 }
0x1016   : > { %v3489_v27 = vmul.f32 %v4728_v15, %v3484_v20  ;;  %vm3495_vm4 = vweird.f32 %v4728_v15 }
0x1017   : > { %vm3496_vm6 = vmor %vm3494_vm5, %vm3495_vm4 }
0x1018   : > { %v3490_v60 = vmul.f32 %v4728_v15, %v3489_v27 }
0x101a   : > { %v3491_v21 = vmul.f32 0.5, %v3490_v60 }
0x101c   : > { %v3492_v31 = vsub.f32 1.5, %v3491_v21 }
0x101e   : > { %v3493_v3 = vmul.f32 %v4728_v15, %v3492_v31 }
0x1020   : > { %v3497_v41 = vsel %vm3496_vm6, %v4728_v15, %v3493_v3 }
0x1021   : > { %v3528_v51 = vmul.f32 %v3497_v41, %v3460_v49 }
0x1023   : > { %v3533_v33 = vmul.f32 %v6585_v26, %v3528_v51 }
0x1025   : > { %v3538_v43 = vadd.f32 %v6588_v39, %v3533_v33 }
0x1027   : > { %4327 = vmatmul.msk.f32.vlgmr.msrb.gmra.mxu2 %vm1725_vm8, %v3538_v43 }
0x1044   : > { %v3452_v1 = vpop.xlane.xlu1 %3451 }
0x1045   : > { %v3458_v36 = vmul.f32 %v3452_v1, %v5835_v10 }
0x1047   : > { %v3462_v19 = vsub.f32 %v6570_v13, %v3458_v36 }
0x1049   : > { %v3466_v4 = vmul.f32 %v3462_v19, %v3462_v19 }
0x104b   : > { %v3474_v17 = vsel %vm1725_vm8, %v3466_v4, 0.0 }
0x104c   : > { %3475 = vadd.xlane.f32.xlu1 %v3474_v17  ;;  %v3455_v0 = vpop.xlane.xlu2 %3454 }
0x104d   : > { %v3459_v18 = vmul.f32 %v3455_v0, %v5835_v10 }
0x104f   : > { %v6598_v59 = vsub.f32 %v6577_v57, %v3459_v18 }
0x1051   : > { %v3467_v24 = vmul.f32 %v6598_v59, %v6598_v59 }
0x1053   : > { %v3477_v53 = vsel %vm1725_vm8, %v3467_v24, 0.0 }
0x1054   : > { %3478 = vadd.xlane.f32.xlu0 %v3477_v53  ;;  %v3473_v55 = vpop.xlane.xlu2 %3472 }
0x1055   : > { %v3481_v28 = vmul.f32 %v3473_v55, %v5835_v10 }
0x1057   : > { %v3485_v25 = vadd.f32 1e-05, %v3481_v28 }
0x1059   : > { %4729 = vrsqrt.f32 %v3485_v25  ;;  %vm3504_vm9 = vweird.f32 %v3485_v25 }
0x105f   : > { %v4730_v58 = vpop.eup %4729 }
0x1060   : > { %v3499_v42 = vmul.f32 %v4730_v58, %v3485_v25  ;;  %vm3505_vm7 = vweird.f32 %v4730_v58 }
0x1061   : > { %vm3506_vm10 = vmor %vm3504_vm9, %vm3505_vm7 }
0x1062   : > { %v3500_v22 = vmul.f32 %v4730_v58, %v3499_v42 }
0x1064   : > { %v3501_v14 = vmul.f32 0.5, %v3500_v22 }
0x1066   : > { %v3502_v35 = vsub.f32 1.5, %v3501_v14 }
0x1068   : > { %v3503_v11 = vmul.f32 %v4730_v58, %v3502_v35 }
0x106a   : > { %v3507_v44 = vsel %vm3506_vm10, %v4730_v58, %v3503_v11 }
0x106b   : > { %v3529_v32 = vmul.f32 %v3507_v44, %v3461_v7 }
0x106d   : > { %v3534_v52 = vmul.f32 %v6585_v26, %v3529_v32 }
0x106f   : > { %v3539_v29 = vadd.f32 %v6588_v39, %v3534_v52 }
0x1071   : > { %4328 = vmatmul.msk.f32.gmra.mxu2 %vm1725_vm8, %v3539_v29 }
0x10aa   : > { %v3574_v2 = vpop.f32.mrf.mxu2 }
0x10ab   : > { %v3575_v12 = vadd.f32 %v3574_v2, %v6608_v16 }
0x10ad   : > { %v3586_v30 = vsub.f32 0.0, %v3575_v12 }
0x10af   : > { %v3590_v6 = vmul.f32 1.442695, %v3586_v30 }
0x10b1   : > { %4731 = vpow2.f32 %v3590_v6 }
0x10b7   : > { %v4732_v49 = vpop.eup %4731 }
0x10b8   : > { %v3598_v54 = vadd.f32 1.0, %v4732_v49 }
0x10ba   : > { %4733 = vrcp.f32 %v3598_v54 }
0x10bf   : > { %v3476_v23 = vpop.xlane.xlu1 %3475 }
0x10c0   : > { %v4734_v47 = vpop.eup %4733  ;;  %v3482_v46 = vmul.f32 %v3476_v23, %v5835_v10 }
0x10c1   : > { %v3606_v45 = vmul.f32 %v4734_v47, %v3575_v12 }
0x10c2   : > { %v3486_v38 = vadd.f32 1e-05, %v3482_v46 }
0x10c3   : > { %4331 = vmatmul.msk.f32.vlgmr.msra.gmra.mxu3 %vm1902_vm0, %v3606_v45 }
0x10c4   : > { %4735 = vrsqrt.f32 %v3486_v38  ;;  %vm3514_vm12 = vweird.f32 %v3486_v38 }
0x10c7   : > { %v3479_v5 = vpop.xlane.xlu0 %3478 }
0x10c8   : > { %v3483_v62 = vmul.f32 %v3479_v5, %v5835_v10 }
0x10ca   : > { %v4736_v40 = vpop.eup %4735  ;;  %v3487_v7 = vadd.f32 1e-05, %v3483_v62 }
0x10cb   : > { %v3509_v9 = vmul.f32 %v4736_v40, %v3486_v38  ;;  %vm3515_vm11 = vweird.f32 %v4736_v40 }
0x10cc   : > { %4737 = vrsqrt.f32 %v3487_v7  ;;  %vm3516_vm13 = vmor %vm3514_vm12, %vm3515_vm11  ;;  %vm3524_vm15 = vweird.f32 %v3487_v7 }
0x10cd   : > { %v3510_v34 = vmul.f32 %v4736_v40, %v3509_v9 }
0x10cf   : > { %v3511_v8 = vmul.f32 0.5, %v3510_v34 }
0x10d1   : > { %v3512_v37 = vsub.f32 1.5, %v3511_v8 }
0x10d2   : > { %v4738_v63 = vpop.eup %4737 }
0x10d3   : > { %v3513_v20 = vmul.f32 %v4736_v40, %v3512_v37  ;;  %v3519_v15 = vmul.f32 %v4738_v63, %v3487_v7  ;;  %vm3525_vm14 = vweird.f32 %v4738_v63 }
0x10d4   : > { %vm3526_vm1 = vmor %vm3524_vm15, %vm3525_vm14 }
0x10d5   : > { %v3517_v27 = vsel %vm3516_vm13, %v4736_v40, %v3513_v20  ;;  %v3520_v60 = vmul.f32 %v4738_v63, %v3519_v15 }
0x10d6   : > { %v3530_v21 = vmul.f32 %v3517_v27, %v3462_v19 }
0x10d7   : > { %v3521_v31 = vmul.f32 0.5, %v3520_v60 }
0x10d8   : > { %v3535_v3 = vmul.f32 %v6585_v26, %v3530_v21 }
0x10d9   : > { %v3522_v48 = vsub.f32 1.5, %v3521_v31 }
0x10da   : > { %v3540_v41 = vadd.f32 %v6588_v39, %v3535_v3 }
0x10db   : > { %v3523_v51 = vmul.f32 %v4738_v63, %v3522_v48 }
0x10dc   : > { %4329 = vmatmul.msk.f32.gmra.mxu2 %vm1725_vm8, %v3540_v41 }
0x10dd   : > { %v3527_v33 = vsel %vm3526_vm1, %v4738_v63, %v3523_v51 }
0x10de   : > { %v3531_v43 = vmul.f32 %v3527_v33, %v6598_v59  ;;  %v6816_v59 = vld [vmem:[#allocation65_spill] sm:$0xff] }
0x10df   : > { %v3611_v28 = vperm.slane %v6816_v59, 0 }
0x10e0   : > { %v3536_v1 = vmul.f32 %v6585_v26, %v3531_v43 }
0x10e2   : > { %v3541_v36 = vadd.f32 %v6588_v39, %v3536_v1  ;;  %v6817_v1 = vld [vmem:[#allocation66_spill] sm:$0xff] }
0x10e4   : > { %4330 = vmatmul.msk.f32.gmra.mxu2 %vm1725_vm8, %v3541_v36  ;;  %v6642_v36 = vperm.slane %v6817_v1, 0 }
0x10f4   : > { %v3577_v19 = vpop.f32.mrf.mxu2 }
0x10f5   : > { %v3578_v4 = vadd.f32 %v3577_v19, %v6608_v16 }
0x10f7   : > { %v3587_v17 = vsub.f32 0.0, %v3578_v4 }
0x10f9   : > { %v3592_v0 = vmul.f32 1.442695, %v3587_v17 }
0x10fb   : > { %4739 = vpow2.f32 %v3592_v0 }
0x1101   : > { %v4740_v18 = vpop.eup %4739 }
0x1102   : > { %v3599_v24 = vadd.f32 1.0, %v4740_v18 }
0x1104   : > { %4741 = vrcp.f32 %v3599_v24 }
0x110a   : > { %v4742_v53 = vpop.eup %4741 }
0x110b   : > { %v3607_v55 = vmul.f32 %v4742_v53, %v3578_v4  ;;  %v6645_v4 = vperm.slane %v6817_v1, 1 }
0x110d   : > { %4332 = vmatmul.msk.f32.gmra.mxu3 %vm1902_vm0, %v3607_v55 }
0x1146   : > { %v3642_v26 = vpop.f32.mrf.mxu3 }
0x1147   : > { %v3643_v25 = vadd.f32 %v3642_v26, %v3611_v28 }
0x1149   : > { %v3654_v39 = vadd.f32 %v3643_v25, %v6500_v56 }
0x114b   : > { %v3658_v58 = vsel %vm1725_vm8, %v3654_v39, 0.0 }
0x114c   : > { %3659 = vadd.xlane.f32.xlu2 %v3658_v58 }
0x115f   : > { %v3580_v42 = vpop.f32.mrf.mxu2 }
0x1160   : > { %v3581_v22 = vadd.f32 %v3580_v42, %v6608_v16 }
0x1162   : > { %v3588_v14 = vsub.f32 0.0, %v3581_v22 }
0x1164   : > { %v3594_v35 = vmul.f32 1.442695, %v3588_v14 }
0x1166   : > { %4743 = vpow2.f32 %v3594_v35 }
0x1167   : > { %v3583_v11 = vpop.f32.mrf.mxu2 }
0x1168   : > { %v3584_v44 = vadd.f32 %v3583_v11, %v6608_v16 }
0x116a   : > { %v3589_v32 = vsub.f32 0.0, %v3584_v44 }
0x116c   : > { %v4744_v52 = vpop.eup %4743  ;;  %v3596_v29 = vmul.f32 1.442695, %v3589_v32 }
0x116d   : > { %v3600_v50 = vadd.f32 1.0, %v4744_v52 }
0x116e   : > { %4745 = vpow2.f32 %v3596_v29 }
0x116f   : > { %4747 = vrcp.f32 %v3600_v50 }
0x1174   : > { %v4746_v2 = vpop.eup %4745 }
0x1175   : > { %v4748_v56 = vpop.eup %4747  ;;  %v3601_v12 = vadd.f32 1.0, %v4746_v2 }
0x1176   : > { %v3608_v30 = vmul.f32 %v4748_v56, %v3581_v22 }
0x1177   : > { %4749 = vrcp.f32 %v3601_v12 }
0x1178   : > { %4333 = vmatmul.msk.f32.gmra.mxu3 %vm1902_vm0, %v3608_v30 }
0x117d   : > { %v4750_v6 = vpop.eup %4749 }
0x117e   : > { %v3609_v49 = vmul.f32 %v4750_v6, %v3584_v44 }
0x1180   : > { %4334 = vmatmul.msk.f32.gmra.mxu3 %vm1902_vm0, %v3609_v49 }
0x1190   : > { %v3645_v54 = vpop.f32.mrf.mxu3 }
0x1191   : > { %v3646_v23 = vadd.f32 %v3645_v54, %v3611_v28 }
0x1193   : > { %v3655_v16 = vadd.f32 %v3646_v23, %v6507_v61 }
0x1195   : > { %v3661_v47 = vsel %vm1725_vm8, %v3655_v16, 0.0 }
0x1196   : > { %3662 = vadd.xlane.f32.xlu1 %v3661_v47 }
0x11bf   : > { %v3660_v46 = vpop.xlane.xlu2 %3659 }
0x11c0   : > { %v3670_v45 = vmul.f32 %v3660_v46, %v5835_v10 }
0x11c2   : > { %v3674_v38 = vsub.f32 %v3654_v39, %v3670_v45 }
0x11c4   : > { %v3678_v5 = vmul.f32 %v3674_v38, %v3674_v38 }
0x11c6   : > { %v3682_v62 = vsel %vm1725_vm8, %v3678_v5, 0.0 }
0x11c7   : > { %3683 = vadd.xlane.f32.xlu1 %v3682_v62 }
0x11fb   : > { %v3648_v40 = vpop.f32.mrf.mxu3 }
0x11fc   : > { %v3649_v7 = vadd.f32 %v3648_v40, %v3611_v28 }
0x11fe   : > { %v3656_v9 = vadd.f32 %v3649_v7, %v6570_v13 }
0x1200   : > { %v3664_v34 = vsel %vm1725_vm8, %v3656_v9, 0.0 }
0x1201   : > { %3665 = vadd.xlane.f32.xlu0 %v3664_v34 }
0x1203   : > { %v3651_v8 = vpop.f32.mrf.mxu3 }
0x1204   : > { %v3652_v61 = vadd.f32 %v3651_v8, %v3611_v28 }
0x1206   : > { %v3657_v37 = vadd.f32 %v3652_v61, %v6577_v57 }
0x1208   : > { %v3667_v63 = vsel %vm1725_vm8, %v3657_v37, 0.0 }
0x1209   : > { %v3663_v20 = vpop.xlane.xlu1 %3662  ;;  %3668 = vadd.xlane.f32.xlu2 %v3667_v63 }
0x120a   : > { %v3671_v15 = vmul.f32 %v3663_v20, %v5835_v10 }
0x120c   : > { %v3675_v27 = vsub.f32 %v3655_v16, %v3671_v15 }
0x120e   : > { %v3679_v60 = vmul.f32 %v3675_v27, %v3675_v27 }
0x1210   : > { %v3685_v21 = vsel %vm1725_vm8, %v3679_v60, 0.0 }
0x1211   : > { %3686 = vadd.xlane.f32.xlu0 %v3685_v21 }
0x123a   : > { %v3684_v31 = vpop.xlane.xlu1 %3683 }
0x123b   : > { %v3694_v13 = vmul.f32 %v3684_v31, %v5835_v10 }
0x123d   : > { %v3698_v3 = vadd.f32 1e-05, %v3694_v13 }
0x123f   : > { %4751 = vrsqrt.f32 %v3698_v3  ;;  %vm3708_vm2 = vweird.f32 %v3698_v3 }
0x1245   : > { %v4752_v48 = vpop.eup %4751 }
0x1246   : > { %v3703_v41 = vmul.f32 %v4752_v48, %v3698_v3  ;;  %vm3709_vm0 = vweird.f32 %v4752_v48 }
0x1247   : > { %vm3710_vm3 = vmor %vm3708_vm2, %vm3709_vm0 }
0x1248   : > { %v3704_v51 = vmul.f32 %v4752_v48, %v3703_v41 }
0x124a   : > { %v3705_v57 = vmul.f32 0.5, %v3704_v51 }
0x124c   : > { %v3706_v33 = vsub.f32 1.5, %v3705_v57 }
0x124e   : > { %v3707_v43 = vmul.f32 %v4752_v48, %v3706_v33 }
0x1250   : > { %v3711_v19 = vsel %vm3710_vm3, %v4752_v48, %v3707_v43 }
0x1251   : > { %v3742_v17 = vmul.f32 %v3711_v19, %v3674_v38 }
0x1253   : > { %v3747_v0 = vmul.f32 %v6642_v36, %v3742_v17 }
0x1255   : > { %v6649_v18 = vadd.f32 %v6645_v4, %v3747_v0 }
0x1257   : > { %3756 = vst.msk [vmem:[#allocation2] sm:$0xff] %vm1725_vm8, %v6649_v18 }
0x1274   : > { %v3666_v24 = vpop.xlane.xlu0 %3665 }
0x1275   : > { %v3672_v53 = vmul.f32 %v3666_v24, %v5835_v10 }
0x1277   : > { %v3676_v55 = vsub.f32 %v3656_v9, %v3672_v53 }
0x1279   : > { %v3680_v59 = vmul.f32 %v3676_v55, %v3676_v55 }
0x127b   : > { %v3688_v28 = vsel %vm1725_vm8, %v3680_v59, 0.0 }
0x127c   : > { %v3669_v26 = vpop.xlane.xlu2 %3668  ;;  %3689 = vadd.xlane.f32.xlu2 %v3688_v28 }
0x127d   : > { %v3673_v25 = vmul.f32 %v3669_v26, %v5835_v10 }
0x127f   : > { %v3677_v39 = vsub.f32 %v3657_v37, %v3673_v25 }
0x1281   : > { %v3681_v58 = vmul.f32 %v3677_v39, %v3677_v39 }
0x1283   : > { %v3691_v42 = vsel %vm1725_vm8, %v3681_v58, 0.0 }
0x1284   : > { %3692 = vadd.xlane.f32.xlu1 %v3691_v42  ;;  %v3687_v22 = vpop.xlane.xlu0 %3686 }
0x1285   : > { %v3695_v14 = vmul.f32 %v3687_v22, %v5835_v10 }
0x1287   : > { %v3699_v35 = vadd.f32 1e-05, %v3695_v14 }
0x1289   : > { %4753 = vrsqrt.f32 %v3699_v35  ;;  %vm3718_vm5 = vweird.f32 %v3699_v35 }
0x128f   : > { %v4754_v11 = vpop.eup %4753 }
0x1290   : > { %v3713_v44 = vmul.f32 %v4754_v11, %v3699_v35  ;;  %vm3719_vm4 = vweird.f32 %v4754_v11 }
0x1291   : > { %vm3720_vm6 = vmor %vm3718_vm5, %vm3719_vm4 }
0x1292   : > { %v3714_v32 = vmul.f32 %v4754_v11, %v3713_v44 }
0x1294   : > { %v3715_v52 = vmul.f32 0.5, %v3714_v32 }
0x1296   : > { %v3716_v29 = vsub.f32 1.5, %v3715_v52 }
0x1298   : > { %v3717_v50 = vmul.f32 %v4754_v11, %v3716_v29 }
0x129a   : > { %v3721_v2 = vsel %vm3720_vm6, %v4754_v11, %v3717_v50 }
0x129b   : > { %v3743_v56 = vmul.f32 %v3721_v2, %v3675_v27 }
0x129d   : > { %v3748_v12 = vmul.f32 %v6642_v36, %v3743_v56 }
0x129f   : > { %v6660_v30 = vadd.f32 %v6645_v4, %v3748_v12 }
0x12a1   : > { %3757 = vst.msk [vmem:[#allocation2 + $0x8] sm:$0xff] %vm1725_vm8, %v6660_v30 }
0x12ef   : > { %v3690_v6 = vpop.xlane.xlu2 %3689 }
0x12f0   : > { %v3696_v49 = vmul.f32 %v3690_v6, %v5835_v10 }
0x12f2   : > { %v3700_v54 = vadd.f32 1e-05, %v3696_v49 }
0x12f4   : > { %4755 = vrsqrt.f32 %v3700_v54  ;;  %vm3728_vm9 = vweird.f32 %v3700_v54 }
0x12f7   : > { %v3693_v23 = vpop.xlane.xlu1 %3692 }
0x12f8   : > { %v3697_v16 = vmul.f32 %v3693_v23, %v5835_v10 }
0x12fa   : > { %v4756_v47 = vpop.eup %4755  ;;  %v3701_v46 = vadd.f32 1e-05, %v3697_v16 }
0x12fb   : > { %v3723_v45 = vmul.f32 %v4756_v47, %v3700_v54  ;;  %vm3729_vm7 = vweird.f32 %v4756_v47 }
0x12fc   : > { %4757 = vrsqrt.f32 %v3701_v46  ;;  %vm3730_vm10 = vmor %vm3728_vm9, %vm3729_vm7  ;;  %vm3738_vm12 = vweird.f32 %v3701_v46 }
0x12fd   : > { %v3724_v38 = vmul.f32 %v4756_v47, %v3723_v45 }
0x12ff   : > { %v3725_v5 = vmul.f32 0.5, %v3724_v38 }
0x1301   : > { %v3726_v62 = vsub.f32 1.5, %v3725_v5 }
0x1302   : > { %v4758_v40 = vpop.eup %4757 }
0x1303   : > { %v3727_v7 = vmul.f32 %v4756_v47, %v3726_v62  ;;  %v3733_v9 = vmul.f32 %v4758_v40, %v3701_v46  ;;  %vm3739_vm11 = vweird.f32 %v4758_v40 }
0x1304   : > { %vm3740_vm13 = vmor %vm3738_vm12, %vm3739_vm11 }
0x1305   : > { %v3731_v34 = vsel %vm3730_vm10, %v4756_v47, %v3727_v7  ;;  %v3734_v8 = vmul.f32 %v4758_v40, %v3733_v9 }
0x1306   : > { %v3744_v61 = vmul.f32 %v3731_v34, %v3676_v55 }
0x1307   : > { %v3735_v37 = vmul.f32 0.5, %v3734_v8 }
0x1308   : > { %v3749_v63 = vmul.f32 %v6642_v36, %v3744_v61 }
0x1309   : > { %v3736_v10 = vsub.f32 1.5, %v3735_v37 }
0x130a   : > { %v3754_v20 = vadd.f32 %v6645_v4, %v3749_v63 }
0x130b   : > { %v3737_v15 = vmul.f32 %v4758_v40, %v3736_v10 }
0x130c   : > { %3758 = vst.msk [vmem:[#allocation2 + $0x10] sm:$0xff] %vm1725_vm8, %v3754_v20 }
0x130d   : > { %v3741_v27 = vsel %vm3740_vm13, %v4758_v40, %v3737_v15 }
0x130e   : > { %v3745_v60 = vmul.f32 %v3741_v27, %v3677_v39 }
0x1310   : > { %v3750_v21 = vmul.f32 %v6642_v36, %v3745_v60  ;;  %3763 = sbr.rel (%p4335_p8) target bundleno = 5029 (0x13a5), region = 184 }
0x1312   : > { %v3755_v31 = vadd.f32 %v6645_v4, %v3750_v21 }
0x1314   : > { %3759 = vst.msk [vmem:[#allocation2 + $0x18] sm:$0xff] %vm1725_vm8, %v3755_v31 }
0x1315   : > { %v3767_v13 = vld [vmem:[#allocation17 + $0x18] sm:$0xff]  ;;  %v3766_v3 = vld [vmem:[#allocation17 + $0x10] sm:$0xff]  ;;  %v3765_v48 = vld [vmem:[#allocation17 + $0x8] sm:$0xff]  ;;  %vm3813_vm14 = vcmask 392192  }
0x1316   : > { %4382 = vmatpush.msra.mxu2 %v3767_v13  ;;  %4383 = vmatpush.msra.mxu3 %v3767_v13  ;;  %v3764_v41 = vld [vmem:[#allocation17] sm:$0xff]  ;;  %v4759_v51 = vld [vmem:[%s6818_s22] ss:$0 sm:$0xff] }
0x1317   : > { %3796 = vmatpush.msra.mxu0 %v3767_v13  ;;  %4381 = vmatpush.msra.mxu1 %v3767_v13 }
0x1318   : > { %4385 = vmatpush.msra.mxu2 %v3766_v3  ;;  %4386 = vmatpush.msra.mxu3 %v3766_v3 }
0x1319   : > { %3797 = vmatpush.msra.mxu0 %v3766_v3  ;;  %4384 = vmatpush.msra.mxu1 %v3766_v3 }
0x131a   : > { %4388 = vmatpush.msra.mxu2 %v3765_v48  ;;  %4389 = vmatpush.msra.mxu3 %v3765_v48 }
0x131b   : > { %3798 = vmatpush.msra.mxu0 %v3765_v48  ;;  %4387 = vmatpush.msra.mxu1 %v3765_v48 }
0x131c   : > { %4391 = vmatpush.msra.mxu2 %v3764_v41  ;;  %4392 = vmatpush.msra.mxu3 %v3764_v41 }
0x131d   : > { %4338 = vmatmul.msk.f32.vlgmr.msra.gmra.mxu2 %vm1725_vm8, %v3754_v20  ;;  %4339 = vmatmul.msk.f32.vlgmr.msra.gmra.mxu3 %vm1725_vm8, %v3755_v31 }
0x131e   : > { %3799 = vmatpush.msra.mxu0 %v3764_v41  ;;  %4390 = vmatpush.msra.mxu1 %v3764_v41 }
0x131f   : > { %4336 = vmatmul.msk.f32.vlgmr.msra.gmra.mxu0 %vm1725_vm8, %v6649_v18  ;;  %4337 = vmatmul.msk.f32.vlgmr.msra.gmra.mxu1 %vm1725_vm8, %v6660_v30 }
0x139c   : > { %v3801_v57 = vpop.f32.mrf.mxu0  ;;  %v3804_v33 = vpop.f32.mrf.mxu1 }
0x139d   : > { %v3802_v43 = vadd.f32 %v4759_v51, %v3801_v57  ;;  %v3805_v1 = vadd.f32 %v4759_v51, %v3804_v33 }
0x139f   : > { %3814 = vst.msk [vmem:[#allocation18] sm:$0xff] %vm3813_vm14, %v3802_v43 }
0x13a0   : > { %3815 = vst.msk [vmem:[#allocation18 + $0x8] sm:$0xff] %vm3813_vm14, %v3805_v1  ;;  %v3807_v36 = vpop.f32.mrf.mxu2  ;;  %v3810_v19 = vpop.f32.mrf.mxu3 }
0x13a1   : > { %v3808_v4 = vadd.f32 %v4759_v51, %v3807_v36  ;;  %v3811_v17 = vadd.f32 %v4759_v51, %v3810_v19 }
0x13a3   : > { %3816 = vst.msk [vmem:[#allocation18 + $0x10] sm:$0xff] %vm3813_vm14, %v3808_v4 }
0x13a4   : > { %3817 = vst.msk [vmem:[#allocation18 + $0x18] sm:$0xff] %vm3813_vm14, %v3811_v17 }
0x13a5 PF: > { %s6819_s12 = sld [smem:[#allocation47_spill]]  ;;  %p4453_p0 = scmp.eq.s32.totalorder %s5350_s0, 1 }
0x13a6   : > { %s5169_s2 = smov [#allocation18]  }
0x13a7   : > { %s3823_s14 = sshll.u32 %s5169_s2, 4  ;;  %s3824_s14 = int_to_ptr.vmem [resolvable:$true] %s3823_s14 }
0x13ab   : > { %s3825_s24 = sshll.u32 %s6819_s12, 4  ;;  %s5050_s11 = scalar_lea.hbm %s6819_s12, 32  ;;  %s3826_s24 = int_to_ptr.hbm [resolvable:$true] %s3825_s24 }
0x13ac   : > { %s5044_s6 = sshra.s32 %s3826_s24, 4  ;;  %s5045_s6 = int_to_ptr.hbm [resolvable:$true] %s5044_s6 }
0x13ad   : > { %s5046_s10 = scalar_lea.hbm %s5045_s6, 32  ;;  %p5051_p2 = scmp.lt.s32.totalorder %s5045_s6, %s6819_s12 }
0x13ae   : > { %p5047_p9 = scmp.ne.s32.totalorder %s5045_s6, %s5046_s10  ;;  %p5052_p3 = scmp.lt.s32.totalorder %s5050_s11, %s5046_s10 }
0x13b0   : > { %p5048_p4 = pnand %p5047_p9, %p4453_p0  ;;  %p5053_p6 = por %p5052_p3, %p5051_p2 }
0x13b2   : > { %p5049_p13 = pneg %p5048_p4 }
0x13b4   : > { %p5054_p7 = pnand %p5053_p6, %p5049_p13 }
0x13b6   : > { %5057 = shalt.err (!%p5054_p7)
}
0x13b7   : > { %s5170_s23 = smov 128  }
0x13b8   : > { %4416 = dma.vmem_to_hbm [thread:$0]  (%p4453_p0), %s3824_s14, 512, %s3826_s24, [#allocation5], %s5170_s23, %s5170_s23, %s5166_s18  }
0x13b9   : > { %5099 = dma.done.wait (%p4453_p0), [#allocation5], 512  }
0x13ba   : > { %5101 = vsyncadd (%p4453_p0), [#allocation5], 4294966784 }
0x13bb PF: > { %s6820_s22 = sld [smem:[#allocation49_spill]]  ;;  %s6823_s15 = smov %s5108_s16 }
0x13bc   : > { %s6821_s20 = sld [smem:[#allocation48_spill]] }
0x13bd   : > { %s6822_s18 = sld [smem:[#allocation50_spill]] }
0x13c1   : > { %p82_p12 = scmp.ge.s32.totalorder %s6820_s22, 4  }
0x13c2   : > { %s6824_s16 = smov %s6821_s20 }
0x13c3   :  { %84 = sbr.rel (!%p82_p12) target bundleno = 68 (0x44), region = 344 }
0x13c8   :  { %3842 = vsyncpa [#allocation4], 1 }
0x13c9   :  { %3844 = vsyncpa [#allocation4 + $0x1], 1 }
0x13ca   :  { %3845 = vsyncpa [#allocation7], 1 }
0x13cb   :  { %3847 = vsyncpa [#allocation7 + $0x1], 1 }
0x13cc   :  { %3848 = vsyncpa [#allocation10], 1 }
0x13cd   :  { %3850 = vsyncpa [#allocation10 + $0x1], 1 }
0x13ce   :  { %3851 = vsyncpa [#allocation13], 1 }
0x13cf   :  { %3853 = vsyncpa [#allocation13 + $0x1], 1 }
0x13d0   :  { %3854 = vsyncpa [#allocation16], 1 }
0x13d1   :  { %3856 = vsyncpa [#allocation16 + $0x1], 1 }
0x13d2   :  { %3857 = vsyncpa [#allocation5], 1 }
0x13d3   :  { %3859 = vsyncpa [#allocation5 + $0x1], 1 }

</bundles_post_ra>
